<compile_context>
chip_gen: v6e
topology: v6e:2x2x1
jax: 0.10.0
libtpu: 0.0.40
codegen_flags: <defaults>
</compile_context>

<pallas_src>
import math

import jax
import jax.numpy as jnp
from jax.experimental import pallas as pl
from jax.experimental.pallas import tpu as pltpu

batch_size = 2
seq_len = 10
d_model = 32
num_heads = 4
d_k = d_model // num_heads
dim_feedforward = 2048
FF_CHUNK = 512                      # FFN processed in F-chunks to cap live vregs
LN_EPS = 1e-5


# -----------------------------------------------------------------------------
# Pallas kernel: the full decoder block for one block of token rows.
# -----------------------------------------------------------------------------
def _decoder_block_kernel(
    x_ref, enc_ref, bias_ref,
    sa_wqkv_ref, sa_bqkv_ref, sa_wo_ref, sa_bo_ref,
    ca_wq_ref, ca_bq_ref, ca_wkv_ref, ca_bkv_ref, ca_wo_ref, ca_bo_ref,
    ln_g_ref, ln_b_ref,
    ff_w1_ref, ff_b1_ref, ff_w2_ref, ff_b2_ref,
    out_ref,
):
    f32 = jnp.float32
    bf16 = jnp.bfloat16
    scale = 1.0 / math.sqrt(d_k)

    def load2d(ref):
        # (n, D) block on single-core path; (1, S, D) block on the per-row path.
        v = ref[...] if len(ref.shape) == 2 else ref[0]
        return v.astype(f32)

    def layer_norm(h, idx):
        mu = jnp.mean(h, axis=-1, keepdims=True)
        var = jnp.mean((h - mu) ** 2, axis=-1, keepdims=True)
        g = ln_g_ref[idx:idx + 1, :]                                    # (1, D)
        b = ln_b_ref[idx:idx + 1, :]                                    # (1, D)
        return (h - mu) * jax.lax.rsqrt(var + LN_EPS) * g + b

    # Block-diagonal additive bias: 0 within a batch row, -1e30 across rows
    # (all zeros when the block holds a single batch row).
    attn_bias = bias_ref[...]                                           # (n, n)

    def attend(q_all, k_all, v_all, wo_ref, bo_ref):
        # q_all/k_all/v_all: (n, D) f32; head h lives in columns [h*d_k, (h+1)*d_k).
        head_ctx = []
        for h in range(num_heads):                                      # static unroll (4 heads)
            c0 = h * d_k
            qh = q_all[:, c0:c0 + d_k]
            kh = k_all[:, c0:c0 + d_k]
            vh = v_all[:, c0:c0 + d_k]
            s = jnp.einsum("qd,kd->qk", qh, kh,
                           preferred_element_type=f32) * scale + attn_bias   # (n, n)
            s = s - jnp.max(s, axis=-1, keepdims=True)
            p = jnp.exp(s)
            p = p * pl.reciprocal(jnp.sum(p, axis=-1, keepdims=True), approx=True)
            head_ctx.append(jnp.dot(p, vh, preferred_element_type=f32))      # (n, d_k)
        # Head concat stays inside one 128-lane vreg (4 x 8 = 32 lanes); single W_O matmul.
        ctx = jnp.concatenate(head_ctx, axis=-1)                              # (n, D)
        return jnp.dot(ctx.astype(bf16), wo_ref[...],
                       preferred_element_type=f32) + bo_ref[...]

    x = load2d(x_ref)                                                   # (n, D)
    enc = load2d(enc_ref)                                               # (n, D)

    # ---- self-attention: single fused QKV projection (n,32)x(32,96) ----
    qkv = jnp.dot(x.astype(bf16), sa_wqkv_ref[...],
                  preferred_element_type=f32) + sa_bqkv_ref[...]        # (n, 3D)
    sa = attend(qkv[:, :d_model], qkv[:, d_model:2 * d_model],
                qkv[:, 2 * d_model:], sa_wo_ref, sa_bo_ref)
    x = layer_norm(x + sa, 0)

    # ---- cross-attention: Q from x, fused K|V projection from encoder output ----
    q = jnp.dot(x.astype(bf16), ca_wq_ref[...],
                preferred_element_type=f32) + ca_bq_ref[...]            # (n, D)
    kv = jnp.dot(enc.astype(bf16), ca_wkv_ref[...],
                 preferred_element_type=f32) + ca_bkv_ref[...]          # (n, 2D)
    ca = attend(q, kv[:, :d_model], kv[:, d_model:], ca_wo_ref, ca_bo_ref)
    x = layer_norm(x + ca, 1)

    # ---- feed-forward, chunked along dim_feedforward (caps vreg pressure) ----
    x_bf = x.astype(bf16)

    def ff_chunk(c, acc):
        start = pl.multiple_of(c * FF_CHUNK, FF_CHUNK)
        w1c = ff_w1_ref[:, pl.ds(start, FF_CHUNK)]                      # (D, Fc) bf16
        b1c = ff_b1_ref[:, pl.ds(start, FF_CHUNK)]                      # (1, Fc) f32
        w2c = ff_w2_ref[pl.ds(start, FF_CHUNK), :]                      # (Fc, D) bf16
        hid = jnp.maximum(
            jnp.dot(x_bf, w1c, preferred_element_type=f32) + b1c, 0.0)  # (n, Fc)
        return acc + jnp.dot(hid.astype(bf16), w2c, preferred_element_type=f32)

    n = x.shape[0]
    ff = jax.lax.fori_loop(0, dim_feedforward // FF_CHUNK, ff_chunk,
                           jnp.zeros((n, d_model), f32), unroll=True)
    x = layer_norm(x + ff + ff_b2_ref[...], 2)

    res = x.astype(out_ref.dtype)
    if len(out_ref.shape) == 2:
        out_ref[...] = res
    else:
        out_ref[0] = res


# -----------------------------------------------------------------------------
# Wrapper: grid / BlockSpec selection.
# -----------------------------------------------------------------------------
def _dual_tensorcore_chip():
    # v7x (and v4 / v5p) expose two TensorCores per chip; v5e / v6e are single-core.
    try:
        kind = jax.devices()[0].device_kind.lower()
    except Exception:
        return False
    return any(t in kind for t in ("v7", "7x", "v4", "v5p"))


def _block_diag_bias(rows):
    n = rows * seq_len
    bid = jnp.arange(n, dtype=jnp.int32) // seq_len
    same = bid[:, None] == bid[None, :]
    return jnp.where(same, 0.0, -1e30).astype(jnp.float32)


def _full_spec(arr):
    """Full-array, VMEM-resident BlockSpec (same block for every grid step)."""
    zeros = (0,) * arr.ndim
    return pl.BlockSpec(arr.shape, lambda i, _z=zeros: _z)


def transformer_decoder_block(x, encoder_output, packed_params, split_batch=None):
    """x, encoder_output: (B, S, D) float32 -> (B, S, D) float32."""
    b, s, d = x.shape
    if split_batch is None:
        split_batch = _dual_tensorcore_chip() and b > 1
    weight_specs = [_full_spec(p) for p in packed_params]
    cparams = pltpu.CompilerParams(dimension_semantics=("parallel",))

    if not split_batch:
        # Single-core chips (v5e/v6e): fold batch into the token axis -> one grid step,
        # (B*S)-row GEMMs for the projections and the FFN.
        bias = _block_diag_bias(b)
        xf = x.reshape(b * s, d)
        ef = encoder_output.reshape(b * s, d)
        data_spec = pl.BlockSpec((b * s, d), lambda i: (0, 0))
        out = pl.pallas_call(
            _decoder_block_kernel,
            out_shape=jax.ShapeDtypeStruct((b * s, d), x.dtype),
            grid=(1,),
            in_specs=[data_spec, data_spec, _full_spec(bias)] + weight_specs,
            out_specs=data_spec,
            compiler_params=cparams,
        )(xf, ef, bias, *packed_params)
        return out.reshape(b, s, d)

    # Dual-TensorCore chips (v7x; also v4/v5p): one batch row per grid step so the
    # "parallel" batch axis feeds both cores.
    bias = _block_diag_bias(1)
    data_spec = pl.BlockSpec((1, s, d), lambda i: (i, 0, 0))
    return pl.pallas_call(
        _decoder_block_kernel,
        out_shape=jax.ShapeDtypeStruct((b, s, d), x.dtype),
        grid=(b,),
        in_specs=[data_spec, data_spec, _full_spec(bias)] + weight_specs,
        out_specs=data_spec,
        compiler_params=cparams,
    )(x, encoder_output, bias, *packed_params)


# -----------------------------------------------------------------------------
# Parameter construction / packing and a pure-JAX reference.
# -----------------------------------------------------------------------------
def _init_linear(key, fan_in, fan_out):
    kw, kb = jax.random.split(key)
    s = 1.0 / math.sqrt(fan_in)
    w = jax.random.uniform(kw, (fan_in, fan_out), jnp.float32, -s, s)   # (in, out)
    b = jax.random.uniform(kb, (fan_out,), jnp.float32, -s, s)
    return w, b


def _init_attn(key):
    ks = jax.random.split(key, 4)
    p = {}
    p["wq"], p["bq"] = _init_linear(ks[0], d_model, d_model)
    p["wk"], p["bk"] = _init_linear(ks[1], d_model, d_model)
    p["wv"], p["bv"] = _init_linear(ks[2], d_model, d_model)
    p["wo"], p["bo"] = _init_linear(ks[3], d_model, d_model)
    return p


def _pack_params(sa, ca, ln_g, ln_b, ff_w1, ff_b1, ff_w2, ff_b2):
    wdt = jnp.bfloat16   # weight matrices stored bf16 (halves weight DMA); biases stay f32
    sa_wqkv = jnp.concatenate([sa["wq"], sa["wk"], sa["wv"]], axis=1).astype(wdt)  # (D, 3D)
    sa_bqkv = jnp.concatenate([sa["bq"], sa["bk"], sa["bv"]]).reshape(1, 3 * d_model)
    ca_wkv = jnp.concatenate([ca["wk"], ca["wv"]], axis=1).astype(wdt)             # (D, 2D)
    ca_bkv = jnp.concatenate([ca["bk"], ca["bv"]]).reshape(1, 2 * d_model)
    return (
        sa_wqkv, sa_bqkv, sa["wo"].astype(wdt), sa["bo"].reshape(1, d_model),
        ca["wq"].astype(wdt), ca["bq"].reshape(1, d_model),
        ca_wkv, ca_bkv, ca["wo"].astype(wdt), ca["bo"].reshape(1, d_model),
        ln_g, ln_b,
        ff_w1.astype(wdt), ff_b1.reshape(1, dim_feedforward),
        ff_w2.astype(wdt), ff_b2.reshape(1, d_model),
    )


def _ref_layer_norm(h, g, b):
    mu = jnp.mean(h, axis=-1, keepdims=True)
    var = jnp.mean((h - mu) ** 2, axis=-1, keepdims=True)
    return (h - mu) / jnp.sqrt(var + LN_EPS) * g + b


def _ref_mha(q_in, kv_in, p):
    b, s, d = q_in.shape

    def split(t):
        return t.reshape(b, s, num_heads, d_k).transpose(0, 2, 1, 3)

    q = split(jnp.dot(q_in, p["wq"]) + p["bq"])
    k = split(jnp.dot(kv_in, p["wk"]) + p["bk"])
    v = split(jnp.dot(kv_in, p["wv"]) + p["bv"])
    scores = jnp.einsum("bhqd,bhkd->bhqk", q, k) / math.sqrt(d_k)
    attn = jax.nn.softmax(scores, axis=-1)
    ctx = jnp.einsum("bhqk,bhkd->bhqd", attn, v)
    ctx = ctx.transpose(0, 2, 1, 3).reshape(b, s, d)
    return jnp.dot(ctx, p["wo"]) + p["bo"]


def _ref_decoder_block(x, enc, sa, ca, ln_g, ln_b, w1, b1, w2, b2):
    h = _ref_layer_norm(x + _ref_mha(x, x, sa), ln_g[0], ln_b[0])
    h = _ref_layer_norm(h + _ref_mha(h, enc, ca), ln_g[1], ln_b[1])
    ff = jnp.dot(jnp.maximum(jnp.dot(h, w1) + b1, 0.0), w2) + b2
    return _ref_layer_norm(h + ff, ln_g[2], ln_b[2])


if __name__ == "__main__":
    key = jax.random.PRNGKey(0)
    (k_x, k_enc, k_sa, k_ca, k_ff1, k_ff2, k_lng, k_lnb) = jax.random.split(key, 8)

    x = jax.random.normal(k_x, (batch_size, seq_len, d_model), dtype=jnp.float32)
    encoder_output = jax.random.normal(
        k_enc, (batch_size, seq_len, d_model), dtype=jnp.float32)

    sa_params = _init_attn(k_sa)
    ca_params = _init_attn(k_ca)
    ff_w1, ff_b1 = _init_linear(k_ff1, d_model, dim_feedforward)
    ff_w2, ff_b2 = _init_linear(k_ff2, dim_feedforward, d_model)
    ln_g = 1.0 + 0.1 * jax.random.normal(k_lng, (3, d_model), dtype=jnp.float32)
    ln_b = 0.1 * jax.random.normal(k_lnb, (3, d_model), dtype=jnp.float32)

    packed = _pack_params(sa_params, ca_params, ln_g, ln_b, ff_w1, ff_b1, ff_w2, ff_b2)

    out = transformer_decoder_block(x, encoder_output, packed)
    out = jax.block_until_ready(out)

    ref = _ref_decoder_block(
        x, encoder_output, sa_params, ca_params, ln_g, ln_b,
        ff_w1, ff_b1, ff_w2, ff_b2)

    assert out.shape == (batch_size, seq_len, d_model)
    assert out.dtype == jnp.float32
    assert bool(jnp.all(jnp.isfinite(out)))
    # bf16-stored weight matrices with f32-accumulated matmuls keep the error well inside 2e-2.
    assert jnp.allclose(out, ref, atol=2e-2, rtol=2e-2), (
        float(jnp.max(jnp.abs(out - ref))))

    print("KERNEL_OK")
</pallas_src>

<mosaic_0001>
module attributes {stable_mosaic.version = 11 : i64} {
  func.func @_decoder_block_kernel(%arg0: i32, %arg1: memref<20x32xf32, #tpu.memory_space<vmem>>, %arg2: memref<20x32xf32, #tpu.memory_space<vmem>>, %arg3: memref<20x20xf32, #tpu.memory_space<vmem>>, %arg4: memref<32x96xbf16, #tpu.memory_space<vmem>>, %arg5: memref<1x96xf32, #tpu.memory_space<vmem>>, %arg6: memref<32x32xbf16, #tpu.memory_space<vmem>>, %arg7: memref<1x32xf32, #tpu.memory_space<vmem>>, %arg8: memref<32x32xbf16, #tpu.memory_space<vmem>>, %arg9: memref<1x32xf32, #tpu.memory_space<vmem>>, %arg10: memref<32x64xbf16, #tpu.memory_space<vmem>>, %arg11: memref<1x64xf32, #tpu.memory_space<vmem>>, %arg12: memref<32x32xbf16, #tpu.memory_space<vmem>>, %arg13: memref<1x32xf32, #tpu.memory_space<vmem>>, %arg14: memref<3x32xf32, #tpu.memory_space<vmem>>, %arg15: memref<3x32xf32, #tpu.memory_space<vmem>>, %arg16: memref<32x2048xbf16, #tpu.memory_space<vmem>>, %arg17: memref<1x2048xf32, #tpu.memory_space<vmem>>, %arg18: memref<2048x32xbf16, #tpu.memory_space<vmem>>, %arg19: memref<1x32xf32, #tpu.memory_space<vmem>>, %arg20: memref<20x32xf32, #tpu.memory_space<vmem>>) attributes {dimension_semantics = [#tpu.dimension_semantics<parallel>], iteration_bounds = array<i64: 1>, scalar_prefetch = 0 : i64, scratch_operands = 0 : i64, tpu.core_type = #tpu.core_type<tc>, window_params = [{pipeline_mode = #tpu.pipeline_mode<synchronous>, transform_indices = @transform_0, window_bounds = array<i64: 20, 32>}, {pipeline_mode = #tpu.pipeline_mode<synchronous>, transform_indices = @transform_1, window_bounds = array<i64: 20, 32>}, {pipeline_mode = #tpu.pipeline_mode<synchronous>, transform_indices = @transform_2, window_bounds = array<i64: 20, 20>}, {pipeline_mode = #tpu.pipeline_mode<synchronous>, transform_indices = @transform_3, window_bounds = array<i64: 32, 96>}, {pipeline_mode = #tpu.pipeline_mode<synchronous>, transform_indices = @transform_4, window_bounds = array<i64: 1, 96>}, {pipeline_mode = #tpu.pipeline_mode<synchronous>, transform_indices = @transform_5, window_bounds = array<i64: 32, 32>}, {pipeline_mode = #tpu.pipeline_mode<synchronous>, transform_indices = @transform_6, window_bounds = array<i64: 1, 32>}, {pipeline_mode = #tpu.pipeline_mode<synchronous>, transform_indices = @transform_7, window_bounds = array<i64: 32, 32>}, {pipeline_mode = #tpu.pipeline_mode<synchronous>, transform_indices = @transform_8, window_bounds = array<i64: 1, 32>}, {pipeline_mode = #tpu.pipeline_mode<synchronous>, transform_indices = @transform_9, window_bounds = array<i64: 32, 64>}, {pipeline_mode = #tpu.pipeline_mode<synchronous>, transform_indices = @transform_10, window_bounds = array<i64: 1, 64>}, {pipeline_mode = #tpu.pipeline_mode<synchronous>, transform_indices = @transform_11, window_bounds = array<i64: 32, 32>}, {pipeline_mode = #tpu.pipeline_mode<synchronous>, transform_indices = @transform_12, window_bounds = array<i64: 1, 32>}, {pipeline_mode = #tpu.pipeline_mode<synchronous>, transform_indices = @transform_13, window_bounds = array<i64: 3, 32>}, {pipeline_mode = #tpu.pipeline_mode<synchronous>, transform_indices = @transform_14, window_bounds = array<i64: 3, 32>}, {pipeline_mode = #tpu.pipeline_mode<synchronous>, transform_indices = @transform_15, window_bounds = array<i64: 32, 2048>}, {pipeline_mode = #tpu.pipeline_mode<synchronous>, transform_indices = @transform_16, window_bounds = array<i64: 1, 2048>}, {pipeline_mode = #tpu.pipeline_mode<synchronous>, transform_indices = @transform_17, window_bounds = array<i64: 2048, 32>}, {pipeline_mode = #tpu.pipeline_mode<synchronous>, transform_indices = @transform_18, window_bounds = array<i64: 1, 32>}, {pipeline_mode = #tpu.pipeline_mode<synchronous>, transform_indices = @transform_19, window_bounds = array<i64: 20, 32>}]} {
    %c0 = arith.constant 0 : index
    %c0_0 = arith.constant 0 : index
    %0 = vector.load %arg3[%c0, %c0_0] : memref<20x20xf32, #tpu.memory_space<vmem>>, vector<20x20xf32>
    %c0_1 = arith.constant 0 : index
    %c0_2 = arith.constant 0 : index
    %1 = vector.load %arg1[%c0_1, %c0_2] : memref<20x32xf32, #tpu.memory_space<vmem>>, vector<20x32xf32>
    %c0_3 = arith.constant 0 : index
    %c0_4 = arith.constant 0 : index
    %2 = vector.load %arg2[%c0_3, %c0_4] : memref<20x32xf32, #tpu.memory_space<vmem>>, vector<20x32xf32>
    %3 = arith.truncf %1 : vector<20x32xf32> to vector<20x32xbf16>
    %c0_5 = arith.constant 0 : index
    %c0_6 = arith.constant 0 : index
    %4 = vector.load %arg4[%c0_5, %c0_6] : memref<32x96xbf16, #tpu.memory_space<vmem>>, vector<32x96xbf16>
    %cst = arith.constant dense<0.000000e+00> : vector<20x96xf32>
    %5 = tpu.matmul %3, %4, %cst {dimension_numbers = #tpu.dot_dimension_numbers<[1], [0], [0], [1], [0, 0, 1, 1], [], []>} : vector<20x32xbf16>, vector<32x96xbf16>, vector<20x96xf32> -> vector<20x96xf32>
    %c0_7 = arith.constant 0 : index
    %c0_8 = arith.constant 0 : index
    %6 = vector.load %arg5[%c0_7, %c0_8] : memref<1x96xf32, #tpu.memory_space<vmem>>, vector<1x96xf32>
    %7 = vector.broadcast %6 : vector<1x96xf32> to vector<20x96xf32>
    %8 = arith.addf %5, %7 : vector<20x96xf32>
    %9 = vector.extract_strided_slice %8 {offsets = [0, 0], sizes = [20, 32], strides = [1, 1]} : vector<20x96xf32> to vector<20x32xf32>
    %10 = vector.extract_strided_slice %8 {offsets = [0, 32], sizes = [20, 32], strides = [1, 1]} : vector<20x96xf32> to vector<20x32xf32>
    %11 = vector.extract_strided_slice %8 {offsets = [0, 64], sizes = [20, 32], strides = [1, 1]} : vector<20x96xf32> to vector<20x32xf32>
    %12 = vector.extract_strided_slice %9 {offsets = [0, 0], sizes = [20, 8], strides = [1, 1]} : vector<20x32xf32> to vector<20x8xf32>
    %13 = vector.extract_strided_slice %10 {offsets = [0, 0], sizes = [20, 8], strides = [1, 1]} : vector<20x32xf32> to vector<20x8xf32>
    %14 = vector.extract_strided_slice %11 {offsets = [0, 0], sizes = [20, 8], strides = [1, 1]} : vector<20x32xf32> to vector<20x8xf32>
    "tpu.trace_start"() <{level = 10 : i32, message = "qd,kd->qk"}> : () -> ()
    %cst_9 = arith.constant dense<0.000000e+00> : vector<20x20xf32>
    %15 = tpu.matmul %12, %13, %cst_9 {dimension_numbers = #tpu.dot_dimension_numbers<[1], [1], [0], [0], [0, 0, 1, 0], [], []>} : vector<20x8xf32>, vector<20x8xf32>, vector<20x20xf32> -> vector<20x20xf32>
    "tpu.trace_stop"() : () -> ()
    %cst_10 = arith.constant 0.353553385 : f32
    %16 = vector.broadcast %cst_10 : f32 to vector<20x20xf32>
    %17 = arith.mulf %15, %16 : vector<20x20xf32>
    %18 = arith.addf %17, %0 : vector<20x20xf32>
    %cst_11 = arith.constant dense<0xFF800000> : vector<20xf32>
    %19 = vector.multi_reduction <maximumf>, %18, %cst_11 [1] : vector<20x20xf32> to vector<20xf32>
    %20 = vector.shape_cast %19 : vector<20xf32> to vector<20x1xf32>
    %21 = vector.broadcast %20 : vector<20x1xf32> to vector<20x20xf32>
    %22 = arith.subf %18, %21 : vector<20x20xf32>
    %23 = math.exp %22 : vector<20x20xf32>
    %cst_12 = arith.constant dense<0.000000e+00> : vector<20xf32>
    %24 = vector.multi_reduction <add>, %23, %cst_12 [1] : vector<20x20xf32> to vector<20xf32>
    %25 = vector.shape_cast %24 : vector<20xf32> to vector<20x1xf32>
    %26 = tpu.reciprocal %25 {approx = true} : vector<20x1xf32> -> vector<20x1xf32>
    %27 = vector.broadcast %26 : vector<20x1xf32> to vector<20x20xf32>
    %28 = arith.mulf %23, %27 : vector<20x20xf32>
    %cst_13 = arith.constant dense<0.000000e+00> : vector<20x8xf32>
    %29 = tpu.matmul %28, %14, %cst_13 {dimension_numbers = #tpu.dot_dimension_numbers<[1], [0], [0], [1], [0, 0, 1, 1], [], []>} : vector<20x20xf32>, vector<20x8xf32>, vector<20x8xf32> -> vector<20x8xf32>
    %30 = vector.extract_strided_slice %9 {offsets = [0, 8], sizes = [20, 8], strides = [1, 1]} : vector<20x32xf32> to vector<20x8xf32>
    %31 = vector.extract_strided_slice %10 {offsets = [0, 8], sizes = [20, 8], strides = [1, 1]} : vector<20x32xf32> to vector<20x8xf32>
    %32 = vector.extract_strided_slice %11 {offsets = [0, 8], sizes = [20, 8], strides = [1, 1]} : vector<20x32xf32> to vector<20x8xf32>
    "tpu.trace_start"() <{level = 10 : i32, message = "qd,kd->qk"}> : () -> ()
    %cst_14 = arith.constant dense<0.000000e+00> : vector<20x20xf32>
    %33 = tpu.matmul %30, %31, %cst_14 {dimension_numbers = #tpu.dot_dimension_numbers<[1], [1], [0], [0], [0, 0, 1, 0], [], []>} : vector<20x8xf32>, vector<20x8xf32>, vector<20x20xf32> -> vector<20x20xf32>
    "tpu.trace_stop"() : () -> ()
    %cst_15 = arith.constant 0.353553385 : f32
    %34 = vector.broadcast %cst_15 : f32 to vector<20x20xf32>
    %35 = arith.mulf %33, %34 : vector<20x20xf32>
    %36 = arith.addf %35, %0 : vector<20x20xf32>
    %cst_16 = arith.constant dense<0xFF800000> : vector<20xf32>
    %37 = vector.multi_reduction <maximumf>, %36, %cst_16 [1] : vector<20x20xf32> to vector<20xf32>
    %38 = vector.shape_cast %37 : vector<20xf32> to vector<20x1xf32>
    %39 = vector.broadcast %38 : vector<20x1xf32> to vector<20x20xf32>
    %40 = arith.subf %36, %39 : vector<20x20xf32>
    %41 = math.exp %40 : vector<20x20xf32>
    %cst_17 = arith.constant dense<0.000000e+00> : vector<20xf32>
    %42 = vector.multi_reduction <add>, %41, %cst_17 [1] : vector<20x20xf32> to vector<20xf32>
    %43 = vector.shape_cast %42 : vector<20xf32> to vector<20x1xf32>
    %44 = tpu.reciprocal %43 {approx = true} : vector<20x1xf32> -> vector<20x1xf32>
    %45 = vector.broadcast %44 : vector<20x1xf32> to vector<20x20xf32>
    %46 = arith.mulf %41, %45 : vector<20x20xf32>
    %cst_18 = arith.constant dense<0.000000e+00> : vector<20x8xf32>
    %47 = tpu.matmul %46, %32, %cst_18 {dimension_numbers = #tpu.dot_dimension_numbers<[1], [0], [0], [1], [0, 0, 1, 1], [], []>} : vector<20x20xf32>, vector<20x8xf32>, vector<20x8xf32> -> vector<20x8xf32>
    %48 = vector.extract_strided_slice %9 {offsets = [0, 16], sizes = [20, 8], strides = [1, 1]} : vector<20x32xf32> to vector<20x8xf32>
    %49 = vector.extract_strided_slice %10 {offsets = [0, 16], sizes = [20, 8], strides = [1, 1]} : vector<20x32xf32> to vector<20x8xf32>
    %50 = vector.extract_strided_slice %11 {offsets = [0, 16], sizes = [20, 8], strides = [1, 1]} : vector<20x32xf32> to vector<20x8xf32>
    "tpu.trace_start"() <{level = 10 : i32, message = "qd,kd->qk"}> : () -> ()
    %cst_19 = arith.constant dense<0.000000e+00> : vector<20x20xf32>
    %51 = tpu.matmul %48, %49, %cst_19 {dimension_numbers = #tpu.dot_dimension_numbers<[1], [1], [0], [0], [0, 0, 1, 0], [], []>} : vector<20x8xf32>, vector<20x8xf32>, vector<20x20xf32> -> vector<20x20xf32>
    "tpu.trace_stop"() : () -> ()
    %cst_20 = arith.constant 0.353553385 : f32
    %52 = vector.broadcast %cst_20 : f32 to vector<20x20xf32>
    %53 = arith.mulf %51, %52 : vector<20x20xf32>
    %54 = arith.addf %53, %0 : vector<20x20xf32>
    %cst_21 = arith.constant dense<0xFF800000> : vector<20xf32>
    %55 = vector.multi_reduction <maximumf>, %54, %cst_21 [1] : vector<20x20xf32> to vector<20xf32>
    %56 = vector.shape_cast %55 : vector<20xf32> to vector<20x1xf32>
    %57 = vector.broadcast %56 : vector<20x1xf32> to vector<20x20xf32>
    %58 = arith.subf %54, %57 : vector<20x20xf32>
    %59 = math.exp %58 : vector<20x20xf32>
    %cst_22 = arith.constant dense<0.000000e+00> : vector<20xf32>
    %60 = vector.multi_reduction <add>, %59, %cst_22 [1] : vector<20x20xf32> to vector<20xf32>
    %61 = vector.shape_cast %60 : vector<20xf32> to vector<20x1xf32>
    %62 = tpu.reciprocal %61 {approx = true} : vector<20x1xf32> -> vector<20x1xf32>
    %63 = vector.broadcast %62 : vector<20x1xf32> to vector<20x20xf32>
    %64 = arith.mulf %59, %63 : vector<20x20xf32>
    %cst_23 = arith.constant dense<0.000000e+00> : vector<20x8xf32>
    %65 = tpu.matmul %64, %50, %cst_23 {dimension_numbers = #tpu.dot_dimension_numbers<[1], [0], [0], [1], [0, 0, 1, 1], [], []>} : vector<20x20xf32>, vector<20x8xf32>, vector<20x8xf32> -> vector<20x8xf32>
    %66 = vector.extract_strided_slice %9 {offsets = [0, 24], sizes = [20, 8], strides = [1, 1]} : vector<20x32xf32> to vector<20x8xf32>
    %67 = vector.extract_strided_slice %10 {offsets = [0, 24], sizes = [20, 8], strides = [1, 1]} : vector<20x32xf32> to vector<20x8xf32>
    %68 = vector.extract_strided_slice %11 {offsets = [0, 24], sizes = [20, 8], strides = [1, 1]} : vector<20x32xf32> to vector<20x8xf32>
    "tpu.trace_start"() <{level = 10 : i32, message = "qd,kd->qk"}> : () -> ()
    %cst_24 = arith.constant dense<0.000000e+00> : vector<20x20xf32>
    %69 = tpu.matmul %66, %67, %cst_24 {dimension_numbers = #tpu.dot_dimension_numbers<[1], [1], [0], [0], [0, 0, 1, 0], [], []>} : vector<20x8xf32>, vector<20x8xf32>, vector<20x20xf32> -> vector<20x20xf32>
    "tpu.trace_stop"() : () -> ()
    %cst_25 = arith.constant 0.353553385 : f32
    %70 = vector.broadcast %cst_25 : f32 to vector<20x20xf32>
    %71 = arith.mulf %69, %70 : vector<20x20xf32>
    %72 = arith.addf %71, %0 : vector<20x20xf32>
    %cst_26 = arith.constant dense<0xFF800000> : vector<20xf32>
    %73 = vector.multi_reduction <maximumf>, %72, %cst_26 [1] : vector<20x20xf32> to vector<20xf32>
    %74 = vector.shape_cast %73 : vector<20xf32> to vector<20x1xf32>
    %75 = vector.broadcast %74 : vector<20x1xf32> to vector<20x20xf32>
    %76 = arith.subf %72, %75 : vector<20x20xf32>
    %77 = math.exp %76 : vector<20x20xf32>
    %cst_27 = arith.constant dense<0.000000e+00> : vector<20xf32>
    %78 = vector.multi_reduction <add>, %77, %cst_27 [1] : vector<20x20xf32> to vector<20xf32>
    %79 = vector.shape_cast %78 : vector<20xf32> to vector<20x1xf32>
    %80 = tpu.reciprocal %79 {approx = true} : vector<20x1xf32> -> vector<20x1xf32>
    %81 = vector.broadcast %80 : vector<20x1xf32> to vector<20x20xf32>
    %82 = arith.mulf %77, %81 : vector<20x20xf32>
    %cst_28 = arith.constant dense<0.000000e+00> : vector<20x8xf32>
    %83 = tpu.matmul %82, %68, %cst_28 {dimension_numbers = #tpu.dot_dimension_numbers<[1], [0], [0], [1], [0, 0, 1, 1], [], []>} : vector<20x20xf32>, vector<20x8xf32>, vector<20x8xf32> -> vector<20x8xf32>
    %84 = tpu.concatenate %29, %47, %65, %83 in 1 : vector<20x8xf32>, vector<20x8xf32>, vector<20x8xf32>, vector<20x8xf32> -> vector<20x32xf32>
    %85 = arith.truncf %84 : vector<20x32xf32> to vector<20x32xbf16>
    %c0_29 = arith.constant 0 : index
    %c0_30 = arith.constant 0 : index
    %86 = vector.load %arg6[%c0_29, %c0_30] : memref<32x32xbf16, #tpu.memory_space<vmem>>, vector<32x32xbf16>
    %cst_31 = arith.constant dense<0.000000e+00> : vector<20x32xf32>
    %87 = tpu.matmul %85, %86, %cst_31 {dimension_numbers = #tpu.dot_dimension_numbers<[1], [0], [0], [1], [0, 0, 1, 1], [], []>} : vector<20x32xbf16>, vector<32x32xbf16>, vector<20x32xf32> -> vector<20x32xf32>
    %c0_32 = arith.constant 0 : index
    %c0_33 = arith.constant 0 : index
    %88 = vector.load %arg7[%c0_32, %c0_33] : memref<1x32xf32, #tpu.memory_space<vmem>>, vector<1x32xf32>
    %89 = vector.broadcast %88 : vector<1x32xf32> to vector<20x32xf32>
    %90 = arith.addf %87, %89 : vector<20x32xf32>
    %91 = arith.addf %1, %90 : vector<20x32xf32>
    %cst_34 = arith.constant dense<0.000000e+00> : vector<20xf32>
    %92 = vector.multi_reduction <add>, %91, %cst_34 [1] : vector<20x32xf32> to vector<20xf32>
    %93 = vector.shape_cast %92 : vector<20xf32> to vector<20x1xf32>
    %cst_35 = arith.constant 3.200000e+01 : f32
    %94 = vector.broadcast %cst_35 : f32 to vector<20x1xf32>
    %95 = arith.divf %93, %94 : vector<20x1xf32>
    %96 = vector.broadcast %95 : vector<20x1xf32> to vector<20x32xf32>
    %97 = arith.subf %91, %96 : vector<20x32xf32>
    %98 = arith.mulf %97, %97 : vector<20x32xf32>
    %cst_36 = arith.constant dense<0.000000e+00> : vector<20xf32>
    %99 = vector.multi_reduction <add>, %98, %cst_36 [1] : vector<20x32xf32> to vector<20xf32>
    %100 = vector.shape_cast %99 : vector<20xf32> to vector<20x1xf32>
    %cst_37 = arith.constant 3.200000e+01 : f32
    %101 = vector.broadcast %cst_37 : f32 to vector<20x1xf32>
    %102 = arith.divf %100, %101 : vector<20x1xf32>
    %c0_38 = arith.constant 0 : index
    %c0_39 = arith.constant 0 : index
    %103 = vector.load %arg14[%c0_38, %c0_39] : memref<3x32xf32, #tpu.memory_space<vmem>>, vector<1x32xf32>
    %c0_40 = arith.constant 0 : index
    %c0_41 = arith.constant 0 : index
    %104 = vector.load %arg15[%c0_40, %c0_41] : memref<3x32xf32, #tpu.memory_space<vmem>>, vector<1x32xf32>
    %105 = vector.broadcast %95 : vector<20x1xf32> to vector<20x32xf32>
    %106 = arith.subf %91, %105 : vector<20x32xf32>
    %cst_42 = arith.constant 9.99999974E-6 : f32
    %107 = vector.broadcast %cst_42 : f32 to vector<20x1xf32>
    %108 = arith.addf %102, %107 : vector<20x1xf32>
    %109 = math.rsqrt %108 : vector<20x1xf32>
    %110 = vector.broadcast %109 : vector<20x1xf32> to vector<20x32xf32>
    %111 = arith.mulf %106, %110 : vector<20x32xf32>
    %112 = vector.broadcast %103 : vector<1x32xf32> to vector<20x32xf32>
    %113 = arith.mulf %111, %112 : vector<20x32xf32>
    %114 = vector.broadcast %104 : vector<1x32xf32> to vector<20x32xf32>
    %115 = arith.addf %113, %114 : vector<20x32xf32>
    %116 = arith.truncf %115 : vector<20x32xf32> to vector<20x32xbf16>
    %c0_43 = arith.constant 0 : index
    %c0_44 = arith.constant 0 : index
    %117 = vector.load %arg8[%c0_43, %c0_44] : memref<32x32xbf16, #tpu.memory_space<vmem>>, vector<32x32xbf16>
    %cst_45 = arith.constant dense<0.000000e+00> : vector<20x32xf32>
    %118 = tpu.matmul %116, %117, %cst_45 {dimension_numbers = #tpu.dot_dimension_numbers<[1], [0], [0], [1], [0, 0, 1, 1], [], []>} : vector<20x32xbf16>, vector<32x32xbf16>, vector<20x32xf32> -> vector<20x32xf32>
    %c0_46 = arith.constant 0 : index
    %c0_47 = arith.constant 0 : index
    %119 = vector.load %arg9[%c0_46, %c0_47] : memref<1x32xf32, #tpu.memory_space<vmem>>, vector<1x32xf32>
    %120 = vector.broadcast %119 : vector<1x32xf32> to vector<20x32xf32>
    %121 = arith.addf %118, %120 : vector<20x32xf32>
    %122 = arith.truncf %2 : vector<20x32xf32> to vector<20x32xbf16>
    %c0_48 = arith.constant 0 : index
    %c0_49 = arith.constant 0 : index
    %123 = vector.load %arg10[%c0_48, %c0_49] : memref<32x64xbf16, #tpu.memory_space<vmem>>, vector<32x64xbf16>
    %cst_50 = arith.constant dense<0.000000e+00> : vector<20x64xf32>
    %124 = tpu.matmul %122, %123, %cst_50 {dimension_numbers = #tpu.dot_dimension_numbers<[1], [0], [0], [1], [0, 0, 1, 1], [], []>} : vector<20x32xbf16>, vector<32x64xbf16>, vector<20x64xf32> -> vector<20x64xf32>
    %c0_51 = arith.constant 0 : index
    %c0_52 = arith.constant 0 : index
    %125 = vector.load %arg11[%c0_51, %c0_52] : memref<1x64xf32, #tpu.memory_space<vmem>>, vector<1x64xf32>
    %126 = vector.broadcast %125 : vector<1x64xf32> to vector<20x64xf32>
    %127 = arith.addf %124, %126 : vector<20x64xf32>
    %128 = vector.extract_strided_slice %127 {offsets = [0, 0], sizes = [20, 32], strides = [1, 1]} : vector<20x64xf32> to vector<20x32xf32>
    %129 = vector.extract_strided_slice %127 {offsets = [0, 32], sizes = [20, 32], strides = [1, 1]} : vector<20x64xf32> to vector<20x32xf32>
    %130 = vector.extract_strided_slice %121 {offsets = [0, 0], sizes = [20, 8], strides = [1, 1]} : vector<20x32xf32> to vector<20x8xf32>
    %131 = vector.extract_strided_slice %128 {offsets = [0, 0], sizes = [20, 8], strides = [1, 1]} : vector<20x32xf32> to vector<20x8xf32>
    %132 = vector.extract_strided_slice %129 {offsets = [0, 0], sizes = [20, 8], strides = [1, 1]} : vector<20x32xf32> to vector<20x8xf32>
    "tpu.trace_start"() <{level = 10 : i32, message = "qd,kd->qk"}> : () -> ()
    %cst_53 = arith.constant dense<0.000000e+00> : vector<20x20xf32>
    %133 = tpu.matmul %130, %131, %cst_53 {dimension_numbers = #tpu.dot_dimension_numbers<[1], [1], [0], [0], [0, 0, 1, 0], [], []>} : vector<20x8xf32>, vector<20x8xf32>, vector<20x20xf32> -> vector<20x20xf32>
    "tpu.trace_stop"() : () -> ()
    %cst_54 = arith.constant 0.353553385 : f32
    %134 = vector.broadcast %cst_54 : f32 to vector<20x20xf32>
    %135 = arith.mulf %133, %134 : vector<20x20xf32>
    %136 = arith.addf %135, %0 : vector<20x20xf32>
    %cst_55 = arith.constant dense<0xFF800000> : vector<20xf32>
    %137 = vector.multi_reduction <maximumf>, %136, %cst_55 [1] : vector<20x20xf32> to vector<20xf32>
    %138 = vector.shape_cast %137 : vector<20xf32> to vector<20x1xf32>
    %139 = vector.broadcast %138 : vector<20x1xf32> to vector<20x20xf32>
    %140 = arith.subf %136, %139 : vector<20x20xf32>
    %141 = math.exp %140 : vector<20x20xf32>
    %cst_56 = arith.constant dense<0.000000e+00> : vector<20xf32>
    %142 = vector.multi_reduction <add>, %141, %cst_56 [1] : vector<20x20xf32> to vector<20xf32>
    %143 = vector.shape_cast %142 : vector<20xf32> to vector<20x1xf32>
    %144 = tpu.reciprocal %143 {approx = true} : vector<20x1xf32> -> vector<20x1xf32>
    %145 = vector.broadcast %144 : vector<20x1xf32> to vector<20x20xf32>
    %146 = arith.mulf %141, %145 : vector<20x20xf32>
    %cst_57 = arith.constant dense<0.000000e+00> : vector<20x8xf32>
    %147 = tpu.matmul %146, %132, %cst_57 {dimension_numbers = #tpu.dot_dimension_numbers<[1], [0], [0], [1], [0, 0, 1, 1], [], []>} : vector<20x20xf32>, vector<20x8xf32>, vector<20x8xf32> -> vector<20x8xf32>
    %148 = vector.extract_strided_slice %121 {offsets = [0, 8], sizes = [20, 8], strides = [1, 1]} : vector<20x32xf32> to vector<20x8xf32>
    %149 = vector.extract_strided_slice %128 {offsets = [0, 8], sizes = [20, 8], strides = [1, 1]} : vector<20x32xf32> to vector<20x8xf32>
    %150 = vector.extract_strided_slice %129 {offsets = [0, 8], sizes = [20, 8], strides = [1, 1]} : vector<20x32xf32> to vector<20x8xf32>
    "tpu.trace_start"() <{level = 10 : i32, message = "qd,kd->qk"}> : () -> ()
    %cst_58 = arith.constant dense<0.000000e+00> : vector<20x20xf32>
    %151 = tpu.matmul %148, %149, %cst_58 {dimension_numbers = #tpu.dot_dimension_numbers<[1], [1], [0], [0], [0, 0, 1, 0], [], []>} : vector<20x8xf32>, vector<20x8xf32>, vector<20x20xf32> -> vector<20x20xf32>
    "tpu.trace_stop"() : () -> ()
    %cst_59 = arith.constant 0.353553385 : f32
    %152 = vector.broadcast %cst_59 : f32 to vector<20x20xf32>
    %153 = arith.mulf %151, %152 : vector<20x20xf32>
    %154 = arith.addf %153, %0 : vector<20x20xf32>
    %cst_60 = arith.constant dense<0xFF800000> : vector<20xf32>
    %155 = vector.multi_reduction <maximumf>, %154, %cst_60 [1] : vector<20x20xf32> to vector<20xf32>
    %156 = vector.shape_cast %155 : vector<20xf32> to vector<20x1xf32>
    %157 = vector.broadcast %156 : vector<20x1xf32> to vector<20x20xf32>
    %158 = arith.subf %154, %157 : vector<20x20xf32>
    %159 = math.exp %158 : vector<20x20xf32>
    %cst_61 = arith.constant dense<0.000000e+00> : vector<20xf32>
    %160 = vector.multi_reduction <add>, %159, %cst_61 [1] : vector<20x20xf32> to vector<20xf32>
    %161 = vector.shape_cast %160 : vector<20xf32> to vector<20x1xf32>
    %162 = tpu.reciprocal %161 {approx = true} : vector<20x1xf32> -> vector<20x1xf32>
    %163 = vector.broadcast %162 : vector<20x1xf32> to vector<20x20xf32>
    %164 = arith.mulf %159, %163 : vector<20x20xf32>
    %cst_62 = arith.constant dense<0.000000e+00> : vector<20x8xf32>
    %165 = tpu.matmul %164, %150, %cst_62 {dimension_numbers = #tpu.dot_dimension_numbers<[1], [0], [0], [1], [0, 0, 1, 1], [], []>} : vector<20x20xf32>, vector<20x8xf32>, vector<20x8xf32> -> vector<20x8xf32>
    %166 = vector.extract_strided_slice %121 {offsets = [0, 16], sizes = [20, 8], strides = [1, 1]} : vector<20x32xf32> to vector<20x8xf32>
    %167 = vector.extract_strided_slice %128 {offsets = [0, 16], sizes = [20, 8], strides = [1, 1]} : vector<20x32xf32> to vector<20x8xf32>
    %168 = vector.extract_strided_slice %129 {offsets = [0, 16], sizes = [20, 8], strides = [1, 1]} : vector<20x32xf32> to vector<20x8xf32>
    "tpu.trace_start"() <{level = 10 : i32, message = "qd,kd->qk"}> : () -> ()
    %cst_63 = arith.constant dense<0.000000e+00> : vector<20x20xf32>
    %169 = tpu.matmul %166, %167, %cst_63 {dimension_numbers = #tpu.dot_dimension_numbers<[1], [1], [0], [0], [0, 0, 1, 0], [], []>} : vector<20x8xf32>, vector<20x8xf32>, vector<20x20xf32> -> vector<20x20xf32>
    "tpu.trace_stop"() : () -> ()
    %cst_64 = arith.constant 0.353553385 : f32
    %170 = vector.broadcast %cst_64 : f32 to vector<20x20xf32>
    %171 = arith.mulf %169, %170 : vector<20x20xf32>
    %172 = arith.addf %171, %0 : vector<20x20xf32>
    %cst_65 = arith.constant dense<0xFF800000> : vector<20xf32>
    %173 = vector.multi_reduction <maximumf>, %172, %cst_65 [1] : vector<20x20xf32> to vector<20xf32>
    %174 = vector.shape_cast %173 : vector<20xf32> to vector<20x1xf32>
    %175 = vector.broadcast %174 : vector<20x1xf32> to vector<20x20xf32>
    %176 = arith.subf %172, %175 : vector<20x20xf32>
    %177 = math.exp %176 : vector<20x20xf32>
    %cst_66 = arith.constant dense<0.000000e+00> : vector<20xf32>
    %178 = vector.multi_reduction <add>, %177, %cst_66 [1] : vector<20x20xf32> to vector<20xf32>
    %179 = vector.shape_cast %178 : vector<20xf32> to vector<20x1xf32>
    %180 = tpu.reciprocal %179 {approx = true} : vector<20x1xf32> -> vector<20x1xf32>
    %181 = vector.broadcast %180 : vector<20x1xf32> to vector<20x20xf32>
    %182 = arith.mulf %177, %181 : vector<20x20xf32>
    %cst_67 = arith.constant dense<0.000000e+00> : vector<20x8xf32>
    %183 = tpu.matmul %182, %168, %cst_67 {dimension_numbers = #tpu.dot_dimension_numbers<[1], [0], [0], [1], [0, 0, 1, 1], [], []>} : vector<20x20xf32>, vector<20x8xf32>, vector<20x8xf32> -> vector<20x8xf32>
    %184 = vector.extract_strided_slice %121 {offsets = [0, 24], sizes = [20, 8], strides = [1, 1]} : vector<20x32xf32> to vector<20x8xf32>
    %185 = vector.extract_strided_slice %128 {offsets = [0, 24], sizes = [20, 8], strides = [1, 1]} : vector<20x32xf32> to vector<20x8xf32>
    %186 = vector.extract_strided_slice %129 {offsets = [0, 24], sizes = [20, 8], strides = [1, 1]} : vector<20x32xf32> to vector<20x8xf32>
    "tpu.trace_start"() <{level = 10 : i32, message = "qd,kd->qk"}> : () -> ()
    %cst_68 = arith.constant dense<0.000000e+00> : vector<20x20xf32>
    %187 = tpu.matmul %184, %185, %cst_68 {dimension_numbers = #tpu.dot_dimension_numbers<[1], [1], [0], [0], [0, 0, 1, 0], [], []>} : vector<20x8xf32>, vector<20x8xf32>, vector<20x20xf32> -> vector<20x20xf32>
    "tpu.trace_stop"() : () -> ()
    %cst_69 = arith.constant 0.353553385 : f32
    %188 = vector.broadcast %cst_69 : f32 to vector<20x20xf32>
    %189 = arith.mulf %187, %188 : vector<20x20xf32>
    %190 = arith.addf %189, %0 : vector<20x20xf32>
    %cst_70 = arith.constant dense<0xFF800000> : vector<20xf32>
    %191 = vector.multi_reduction <maximumf>, %190, %cst_70 [1] : vector<20x20xf32> to vector<20xf32>
    %192 = vector.shape_cast %191 : vector<20xf32> to vector<20x1xf32>
    %193 = vector.broadcast %192 : vector<20x1xf32> to vector<20x20xf32>
    %194 = arith.subf %190, %193 : vector<20x20xf32>
    %195 = math.exp %194 : vector<20x20xf32>
    %cst_71 = arith.constant dense<0.000000e+00> : vector<20xf32>
    %196 = vector.multi_reduction <add>, %195, %cst_71 [1] : vector<20x20xf32> to vector<20xf32>
    %197 = vector.shape_cast %196 : vector<20xf32> to vector<20x1xf32>
    %198 = tpu.reciprocal %197 {approx = true} : vector<20x1xf32> -> vector<20x1xf32>
    %199 = vector.broadcast %198 : vector<20x1xf32> to vector<20x20xf32>
    %200 = arith.mulf %195, %199 : vector<20x20xf32>
    %cst_72 = arith.constant dense<0.000000e+00> : vector<20x8xf32>
    %201 = tpu.matmul %200, %186, %cst_72 {dimension_numbers = #tpu.dot_dimension_numbers<[1], [0], [0], [1], [0, 0, 1, 1], [], []>} : vector<20x20xf32>, vector<20x8xf32>, vector<20x8xf32> -> vector<20x8xf32>
    %202 = tpu.concatenate %147, %165, %183, %201 in 1 : vector<20x8xf32>, vector<20x8xf32>, vector<20x8xf32>, vector<20x8xf32> -> vector<20x32xf32>
    %203 = arith.truncf %202 : vector<20x32xf32> to vector<20x32xbf16>
    %c0_73 = arith.constant 0 : index
    %c0_74 = arith.constant 0 : index
    %204 = vector.load %arg12[%c0_73, %c0_74] : memref<32x32xbf16, #tpu.memory_space<vmem>>, vector<32x32xbf16>
    %cst_75 = arith.constant dense<0.000000e+00> : vector<20x32xf32>
    %205 = tpu.matmul %203, %204, %cst_75 {dimension_numbers = #tpu.dot_dimension_numbers<[1], [0], [0], [1], [0, 0, 1, 1], [], []>} : vector<20x32xbf16>, vector<32x32xbf16>, vector<20x32xf32> -> vector<20x32xf32>
    %c0_76 = arith.constant 0 : index
    %c0_77 = arith.constant 0 : index
    %206 = vector.load %arg13[%c0_76, %c0_77] : memref<1x32xf32, #tpu.memory_space<vmem>>, vector<1x32xf32>
    %207 = vector.broadcast %206 : vector<1x32xf32> to vector<20x32xf32>
    %208 = arith.addf %205, %207 : vector<20x32xf32>
    %209 = arith.addf %115, %208 : vector<20x32xf32>
    %cst_78 = arith.constant dense<0.000000e+00> : vector<20xf32>
    %210 = vector.multi_reduction <add>, %209, %cst_78 [1] : vector<20x32xf32> to vector<20xf32>
    %211 = vector.shape_cast %210 : vector<20xf32> to vector<20x1xf32>
    %cst_79 = arith.constant 3.200000e+01 : f32
    %212 = vector.broadcast %cst_79 : f32 to vector<20x1xf32>
    %213 = arith.divf %211, %212 : vector<20x1xf32>
    %214 = vector.broadcast %213 : vector<20x1xf32> to vector<20x32xf32>
    %215 = arith.subf %209, %214 : vector<20x32xf32>
    %216 = arith.mulf %215, %215 : vector<20x32xf32>
    %cst_80 = arith.constant dense<0.000000e+00> : vector<20xf32>
    %217 = vector.multi_reduction <add>, %216, %cst_80 [1] : vector<20x32xf32> to vector<20xf32>
    %218 = vector.shape_cast %217 : vector<20xf32> to vector<20x1xf32>
    %cst_81 = arith.constant 3.200000e+01 : f32
    %219 = vector.broadcast %cst_81 : f32 to vector<20x1xf32>
    %220 = arith.divf %218, %219 : vector<20x1xf32>
    %c1 = arith.constant 1 : index
    %c0_82 = arith.constant 0 : index
    %221 = vector.load %arg14[%c1, %c0_82] : memref<3x32xf32, #tpu.memory_space<vmem>>, vector<1x32xf32>
    %c1_83 = arith.constant 1 : index
    %c0_84 = arith.constant 0 : index
    %222 = vector.load %arg15[%c1_83, %c0_84] : memref<3x32xf32, #tpu.memory_space<vmem>>, vector<1x32xf32>
    %223 = vector.broadcast %213 : vector<20x1xf32> to vector<20x32xf32>
    %224 = arith.subf %209, %223 : vector<20x32xf32>
    %cst_85 = arith.constant 9.99999974E-6 : f32
    %225 = vector.broadcast %cst_85 : f32 to vector<20x1xf32>
    %226 = arith.addf %220, %225 : vector<20x1xf32>
    %227 = math.rsqrt %226 : vector<20x1xf32>
    %228 = vector.broadcast %227 : vector<20x1xf32> to vector<20x32xf32>
    %229 = arith.mulf %224, %228 : vector<20x32xf32>
    %230 = vector.broadcast %221 : vector<1x32xf32> to vector<20x32xf32>
    %231 = arith.mulf %229, %230 : vector<20x32xf32>
    %232 = vector.broadcast %222 : vector<1x32xf32> to vector<20x32xf32>
    %233 = arith.addf %231, %232 : vector<20x32xf32>
    %234 = arith.truncf %233 : vector<20x32xf32> to vector<20x32xbf16>
    %cst_86 = arith.constant 0.000000e+00 : f32
    %235 = vector.broadcast %cst_86 : f32 to vector<20x32xf32>
    %c0_i32 = arith.constant 0 : i32
    %c512_i32 = arith.constant 512 : i32
    %236 = arith.muli %c0_i32, %c512_i32 : i32
    %237 = tpu.assume_multiple %236, 512 : i32
    %c0_87 = arith.constant 0 : index
    %238 = arith.index_cast %237 : i32 to index
    %239 = vector.load %arg16[%c0_87, %238] : memref<32x2048xbf16, #tpu.memory_space<vmem>>, vector<32x512xbf16>
    %c0_88 = arith.constant 0 : index
    %240 = arith.index_cast %237 : i32 to index
    %241 = vector.load %arg17[%c0_88, %240] : memref<1x2048xf32, #tpu.memory_space<vmem>>, vector<1x512xf32>
    %242 = arith.index_cast %237 : i32 to index
    %c0_89 = arith.constant 0 : index
    %243 = vector.load %arg18[%242, %c0_89] : memref<2048x32xbf16, #tpu.memory_space<vmem>>, vector<512x32xbf16>
    %cst_90 = arith.constant dense<0.000000e+00> : vector<20x512xf32>
    %244 = tpu.matmul %234, %239, %cst_90 {dimension_numbers = #tpu.dot_dimension_numbers<[1], [0], [0], [1], [0, 0, 1, 1], [], []>} : vector<20x32xbf16>, vector<32x512xbf16>, vector<20x512xf32> -> vector<20x512xf32>
    %245 = vector.broadcast %241 : vector<1x512xf32> to vector<20x512xf32>
    %246 = arith.addf %244, %245 : vector<20x512xf32>
    %cst_91 = arith.constant 0.000000e+00 : f32
    %247 = vector.broadcast %cst_91 : f32 to vector<20x512xf32>
    %248 = arith.maximumf %246, %247 : vector<20x512xf32>
    %249 = arith.truncf %248 : vector<20x512xf32> to vector<20x512xbf16>
    %cst_92 = arith.constant dense<0.000000e+00> : vector<20x32xf32>
    %250 = tpu.matmul %249, %243, %cst_92 {dimension_numbers = #tpu.dot_dimension_numbers<[1], [0], [0], [1], [0, 0, 1, 1], [], []>} : vector<20x512xbf16>, vector<512x32xbf16>, vector<20x32xf32> -> vector<20x32xf32>
    %251 = arith.addf %235, %250 : vector<20x32xf32>
    %c1_i32 = arith.constant 1 : i32
    %c512_i32_93 = arith.constant 512 : i32
    %252 = arith.muli %c1_i32, %c512_i32_93 : i32
    %253 = tpu.assume_multiple %252, 512 : i32
    %c0_94 = arith.constant 0 : index
    %254 = arith.index_cast %253 : i32 to index
    %255 = vector.load %arg16[%c0_94, %254] : memref<32x2048xbf16, #tpu.memory_space<vmem>>, vector<32x512xbf16>
    %c0_95 = arith.constant 0 : index
    %256 = arith.index_cast %253 : i32 to index
    %257 = vector.load %arg17[%c0_95, %256] : memref<1x2048xf32, #tpu.memory_space<vmem>>, vector<1x512xf32>
    %258 = arith.index_cast %253 : i32 to index
    %c0_96 = arith.constant 0 : index
    %259 = vector.load %arg18[%258, %c0_96] : memref<2048x32xbf16, #tpu.memory_space<vmem>>, vector<512x32xbf16>
    %cst_97 = arith.constant dense<0.000000e+00> : vector<20x512xf32>
    %260 = tpu.matmul %234, %255, %cst_97 {dimension_numbers = #tpu.dot_dimension_numbers<[1], [0], [0], [1], [0, 0, 1, 1], [], []>} : vector<20x32xbf16>, vector<32x512xbf16>, vector<20x512xf32> -> vector<20x512xf32>
    %261 = vector.broadcast %257 : vector<1x512xf32> to vector<20x512xf32>
    %262 = arith.addf %260, %261 : vector<20x512xf32>
    %cst_98 = arith.constant 0.000000e+00 : f32
    %263 = vector.broadcast %cst_98 : f32 to vector<20x512xf32>
    %264 = arith.maximumf %262, %263 : vector<20x512xf32>
    %265 = arith.truncf %264 : vector<20x512xf32> to vector<20x512xbf16>
    %cst_99 = arith.constant dense<0.000000e+00> : vector<20x32xf32>
    %266 = tpu.matmul %265, %259, %cst_99 {dimension_numbers = #tpu.dot_dimension_numbers<[1], [0], [0], [1], [0, 0, 1, 1], [], []>} : vector<20x512xbf16>, vector<512x32xbf16>, vector<20x32xf32> -> vector<20x32xf32>
    %267 = arith.addf %251, %266 : vector<20x32xf32>
    %c2_i32 = arith.constant 2 : i32
    %c512_i32_100 = arith.constant 512 : i32
    %268 = arith.muli %c2_i32, %c512_i32_100 : i32
    %269 = tpu.assume_multiple %268, 512 : i32
    %c0_101 = arith.constant 0 : index
    %270 = arith.index_cast %269 : i32 to index
    %271 = vector.load %arg16[%c0_101, %270] : memref<32x2048xbf16, #tpu.memory_space<vmem>>, vector<32x512xbf16>
    %c0_102 = arith.constant 0 : index
    %272 = arith.index_cast %269 : i32 to index
    %273 = vector.load %arg17[%c0_102, %272] : memref<1x2048xf32, #tpu.memory_space<vmem>>, vector<1x512xf32>
    %274 = arith.index_cast %269 : i32 to index
    %c0_103 = arith.constant 0 : index
    %275 = vector.load %arg18[%274, %c0_103] : memref<2048x32xbf16, #tpu.memory_space<vmem>>, vector<512x32xbf16>
    %cst_104 = arith.constant dense<0.000000e+00> : vector<20x512xf32>
    %276 = tpu.matmul %234, %271, %cst_104 {dimension_numbers = #tpu.dot_dimension_numbers<[1], [0], [0], [1], [0, 0, 1, 1], [], []>} : vector<20x32xbf16>, vector<32x512xbf16>, vector<20x512xf32> -> vector<20x512xf32>
    %277 = vector.broadcast %273 : vector<1x512xf32> to vector<20x512xf32>
    %278 = arith.addf %276, %277 : vector<20x512xf32>
    %cst_105 = arith.constant 0.000000e+00 : f32
    %279 = vector.broadcast %cst_105 : f32 to vector<20x512xf32>
    %280 = arith.maximumf %278, %279 : vector<20x512xf32>
    %281 = arith.truncf %280 : vector<20x512xf32> to vector<20x512xbf16>
    %cst_106 = arith.constant dense<0.000000e+00> : vector<20x32xf32>
    %282 = tpu.matmul %281, %275, %cst_106 {dimension_numbers = #tpu.dot_dimension_numbers<[1], [0], [0], [1], [0, 0, 1, 1], [], []>} : vector<20x512xbf16>, vector<512x32xbf16>, vector<20x32xf32> -> vector<20x32xf32>
    %283 = arith.addf %267, %282 : vector<20x32xf32>
    %c3_i32 = arith.constant 3 : i32
    %c512_i32_107 = arith.constant 512 : i32
    %284 = arith.muli %c3_i32, %c512_i32_107 : i32
    %285 = tpu.assume_multiple %284, 512 : i32
    %c0_108 = arith.constant 0 : index
    %286 = arith.index_cast %285 : i32 to index
    %287 = vector.load %arg16[%c0_108, %286] : memref<32x2048xbf16, #tpu.memory_space<vmem>>, vector<32x512xbf16>
    %c0_109 = arith.constant 0 : index
    %288 = arith.index_cast %285 : i32 to index
    %289 = vector.load %arg17[%c0_109, %288] : memref<1x2048xf32, #tpu.memory_space<vmem>>, vector<1x512xf32>
    %290 = arith.index_cast %285 : i32 to index
    %c0_110 = arith.constant 0 : index
    %291 = vector.load %arg18[%290, %c0_110] : memref<2048x32xbf16, #tpu.memory_space<vmem>>, vector<512x32xbf16>
    %cst_111 = arith.constant dense<0.000000e+00> : vector<20x512xf32>
    %292 = tpu.matmul %234, %287, %cst_111 {dimension_numbers = #tpu.dot_dimension_numbers<[1], [0], [0], [1], [0, 0, 1, 1], [], []>} : vector<20x32xbf16>, vector<32x512xbf16>, vector<20x512xf32> -> vector<20x512xf32>
    %293 = vector.broadcast %289 : vector<1x512xf32> to vector<20x512xf32>
    %294 = arith.addf %292, %293 : vector<20x512xf32>
    %cst_112 = arith.constant 0.000000e+00 : f32
    %295 = vector.broadcast %cst_112 : f32 to vector<20x512xf32>
    %296 = arith.maximumf %294, %295 : vector<20x512xf32>
    %297 = arith.truncf %296 : vector<20x512xf32> to vector<20x512xbf16>
    %cst_113 = arith.constant dense<0.000000e+00> : vector<20x32xf32>
    %298 = tpu.matmul %297, %291, %cst_113 {dimension_numbers = #tpu.dot_dimension_numbers<[1], [0], [0], [1], [0, 0, 1, 1], [], []>} : vector<20x512xbf16>, vector<512x32xbf16>, vector<20x32xf32> -> vector<20x32xf32>
    %299 = arith.addf %283, %298 : vector<20x32xf32>
    %c4_i32 = arith.constant 4 : i32
    %300 = arith.addf %233, %299 : vector<20x32xf32>
    %c0_114 = arith.constant 0 : index
    %c0_115 = arith.constant 0 : index
    %301 = vector.load %arg19[%c0_114, %c0_115] : memref<1x32xf32, #tpu.memory_space<vmem>>, vector<1x32xf32>
    %302 = vector.broadcast %301 : vector<1x32xf32> to vector<20x32xf32>
    %303 = arith.addf %300, %302 : vector<20x32xf32>
    %cst_116 = arith.constant dense<0.000000e+00> : vector<20xf32>
    %304 = vector.multi_reduction <add>, %303, %cst_116 [1] : vector<20x32xf32> to vector<20xf32>
    %305 = vector.shape_cast %304 : vector<20xf32> to vector<20x1xf32>
    %cst_117 = arith.constant 3.200000e+01 : f32
    %306 = vector.broadcast %cst_117 : f32 to vector<20x1xf32>
    %307 = arith.divf %305, %306 : vector<20x1xf32>
    %308 = vector.broadcast %307 : vector<20x1xf32> to vector<20x32xf32>
    %309 = arith.subf %303, %308 : vector<20x32xf32>
    %310 = arith.mulf %309, %309 : vector<20x32xf32>
    %cst_118 = arith.constant dense<0.000000e+00> : vector<20xf32>
    %311 = vector.multi_reduction <add>, %310, %cst_118 [1] : vector<20x32xf32> to vector<20xf32>
    %312 = vector.shape_cast %311 : vector<20xf32> to vector<20x1xf32>
    %cst_119 = arith.constant 3.200000e+01 : f32
    %313 = vector.broadcast %cst_119 : f32 to vector<20x1xf32>
    %314 = arith.divf %312, %313 : vector<20x1xf32>
    %c2 = arith.constant 2 : index
    %c0_120 = arith.constant 0 : index
    %315 = vector.load %arg14[%c2, %c0_120] : memref<3x32xf32, #tpu.memory_space<vmem>>, vector<1x32xf32>
    %c2_121 = arith.constant 2 : index
    %c0_122 = arith.constant 0 : index
    %316 = vector.load %arg15[%c2_121, %c0_122] : memref<3x32xf32, #tpu.memory_space<vmem>>, vector<1x32xf32>
    %317 = vector.broadcast %307 : vector<20x1xf32> to vector<20x32xf32>
    %318 = arith.subf %303, %317 : vector<20x32xf32>
    %cst_123 = arith.constant 9.99999974E-6 : f32
    %319 = vector.broadcast %cst_123 : f32 to vector<20x1xf32>
    %320 = arith.addf %314, %319 : vector<20x1xf32>
    %321 = math.rsqrt %320 : vector<20x1xf32>
    %322 = vector.broadcast %321 : vector<20x1xf32> to vector<20x32xf32>
    %323 = arith.mulf %318, %322 : vector<20x32xf32>
    %324 = vector.broadcast %315 : vector<1x32xf32> to vector<20x32xf32>
    %325 = arith.mulf %323, %324 : vector<20x32xf32>
    %326 = vector.broadcast %316 : vector<1x32xf32> to vector<20x32xf32>
    %327 = arith.addf %325, %326 : vector<20x32xf32>
    %c0_124 = arith.constant 0 : index
    %c0_125 = arith.constant 0 : index
    %328 = vector.load %arg20[%c0_124, %c0_125] : memref<20x32xf32, #tpu.memory_space<vmem>>, vector<20x32xf32>
    tpu.vector_store %arg20[%c0_124, %c0_125], %327 {strides = array<i32>} : memref<20x32xf32, #tpu.memory_space<vmem>>, vector<20x32xf32>,
    return
  }
  func.func @transform_0(%arg0: i32) -> (i32, i32) {
    %c0_i32 = arith.constant 0 : i32
    %c0_i32_0 = arith.constant 0 : i32
    %c0_i32_1 = arith.constant 0 : i32
    return %c0_i32, %c0_i32_0 : i32, i32
  }
  func.func @transform_1(%arg0: i32) -> (i32, i32) {
    %c0_i32 = arith.constant 0 : i32
    %c0_i32_0 = arith.constant 0 : i32
    %c0_i32_1 = arith.constant 0 : i32
    return %c0_i32, %c0_i32_0 : i32, i32
  }
  func.func @transform_2(%arg0: i32) -> (i32, i32) {
    %c0_i32 = arith.constant 0 : i32
    %c0_i32_0 = arith.constant 0 : i32
    %c0_i32_1 = arith.constant 0 : i32
    return %c0_i32, %c0_i32_0 : i32, i32
  }
  func.func @transform_3(%arg0: i32) -> (i32, i32) {
    %c0_i32 = arith.constant 0 : i32
    %c0_i32_0 = arith.constant 0 : i32
    %c0_i32_1 = arith.constant 0 : i32
    return %c0_i32, %c0_i32_0 : i32, i32
  }
  func.func @transform_4(%arg0: i32) -> (i32, i32) {
    %c0_i32 = arith.constant 0 : i32
    %c0_i32_0 = arith.constant 0 : i32
    %c0_i32_1 = arith.constant 0 : i32
    return %c0_i32, %c0_i32_0 : i32, i32
  }
  func.func @transform_5(%arg0: i32) -> (i32, i32) {
    %c0_i32 = arith.constant 0 : i32
    %c0_i32_0 = arith.constant 0 : i32
    %c0_i32_1 = arith.constant 0 : i32
    return %c0_i32, %c0_i32_0 : i32, i32
  }
  func.func @transform_6(%arg0: i32) -> (i32, i32) {
    %c0_i32 = arith.constant 0 : i32
    %c0_i32_0 = arith.constant 0 : i32
    %c0_i32_1 = arith.constant 0 : i32
    return %c0_i32, %c0_i32_0 : i32, i32
  }
  func.func @transform_7(%arg0: i32) -> (i32, i32) {
    %c0_i32 = arith.constant 0 : i32
    %c0_i32_0 = arith.constant 0 : i32
    %c0_i32_1 = arith.constant 0 : i32
    return %c0_i32, %c0_i32_0 : i32, i32
  }
  func.func @transform_8(%arg0: i32) -> (i32, i32) {
    %c0_i32 = arith.constant 0 : i32
    %c0_i32_0 = arith.constant 0 : i32
    %c0_i32_1 = arith.constant 0 : i32
    return %c0_i32, %c0_i32_0 : i32, i32
  }
  func.func @transform_9(%arg0: i32) -> (i32, i32) {
    %c0_i32 = arith.constant 0 : i32
    %c0_i32_0 = arith.constant 0 : i32
    %c0_i32_1 = arith.constant 0 : i32
    return %c0_i32, %c0_i32_0 : i32, i32
  }
  func.func @transform_10(%arg0: i32) -> (i32, i32) {
    %c0_i32 = arith.constant 0 : i32
    %c0_i32_0 = arith.constant 0 : i32
    %c0_i32_1 = arith.constant 0 : i32
    return %c0_i32, %c0_i32_0 : i32, i32
  }
  func.func @transform_11(%arg0: i32) -> (i32, i32) {
    %c0_i32 = arith.constant 0 : i32
    %c0_i32_0 = arith.constant 0 : i32
    %c0_i32_1 = arith.constant 0 : i32
    return %c0_i32, %c0_i32_0 : i32, i32
  }
  func.func @transform_12(%arg0: i32) -> (i32, i32) {
    %c0_i32 = arith.constant 0 : i32
    %c0_i32_0 = arith.constant 0 : i32
    %c0_i32_1 = arith.constant 0 : i32
    return %c0_i32, %c0_i32_0 : i32, i32
  }
  func.func @transform_13(%arg0: i32) -> (i32, i32) {
    %c0_i32 = arith.constant 0 : i32
    %c0_i32_0 = arith.constant 0 : i32
    %c0_i32_1 = arith.constant 0 : i32
    return %c0_i32, %c0_i32_0 : i32, i32
  }
  func.func @transform_14(%arg0: i32) -> (i32, i32) {
    %c0_i32 = arith.constant 0 : i32
    %c0_i32_0 = arith.constant 0 : i32
    %c0_i32_1 = arith.constant 0 : i32
    return %c0_i32, %c0_i32_0 : i32, i32
  }
  func.func @transform_15(%arg0: i32) -> (i32, i32) {
    %c0_i32 = arith.constant 0 : i32
    %c0_i32_0 = arith.constant 0 : i32
    %c0_i32_1 = arith.constant 0 : i32
    return %c0_i32, %c0_i32_0 : i32, i32
  }
  func.func @transform_16(%arg0: i32) -> (i32, i32) {
    %c0_i32 = arith.constant 0 : i32
    %c0_i32_0 = arith.constant 0 : i32
    %c0_i32_1 = arith.constant 0 : i32
    return %c0_i32, %c0_i32_0 : i32, i32
  }
  func.func @transform_17(%arg0: i32) -> (i32, i32) {
    %c0_i32 = arith.constant 0 : i32
    %c0_i32_0 = arith.constant 0 : i32
    %c0_i32_1 = arith.constant 0 : i32
    return %c0_i32, %c0_i32_0 : i32, i32
  }
  func.func @transform_18(%arg0: i32) -> (i32, i32) {
    %c0_i32 = arith.constant 0 : i32
    %c0_i32_0 = arith.constant 0 : i32
    %c0_i32_1 = arith.constant 0 : i32
    return %c0_i32, %c0_i32_0 : i32, i32
  }
  func.func @transform_19(%arg0: i32) -> (i32, i32) {
    %c0_i32 = arith.constant 0 : i32
    %c0_i32_0 = arith.constant 0 : i32
    %c0_i32_1 = arith.constant 0 : i32
    return %c0_i32, %c0_i32_0 : i32, i32
  }
}

</mosaic_0001>

<bundles_post_ra>
// kernel: tpu_custom_call.1
= control target key start
LH: loop header
LB: loop body
LE: loop exit
PB: predicated region body
PF: predicated region fallthrough
CT: control target
= control target key end

     0   :  { %s7982_s0 = inlined_call_operand.vmem [shape: f32[20,32], index: 0, kind: input, shape index: {}]   ;;  %s7983_s1 = inlined_call_operand.vmem [shape: f32[20,32], index: 1, kind: input, shape index: {}]   ;;  %s7984_s2 = inlined_call_operand.vmem [shape: f32[20,20], index: 2, kind: input, shape index: {}]   ;;  %s7985_s3 = inlined_call_operand.vmem [shape: bf16[32,96], index: 3, kind: input, shape index: {}]   ;;  %s7986_s4 = inlined_call_operand.vmem [shape: f32[1,96], index: 4, kind: input, shape index: {}]   ;;  %s7987_s5 = inlined_call_operand.vmem [shape: bf16[32,32], index: 5, kind: input, shape index: {}]   ;;  %s7988_s6 = inlined_call_operand.vmem [shape: f32[1,32], index: 6, kind: input, shape index: {}]   ;;  %s7989_s7 = inlined_call_operand.vmem [shape: bf16[32,32], index: 7, kind: input, shape index: {}]   ;;  %s7990_s8 = inlined_call_operand.vmem [shape: f32[1,32], index: 8, kind: input, shape index: {}]   ;;  %s7991_s9 = inlined_call_operand.vmem [shape: bf16[32,64], index: 9, kind: input, shape index: {}]   ;;  %s7992_s10 = inlined_call_operand.vmem [shape: f32[1,64], index: 10, kind: input, shape index: {}]   ;;  %s7993_s11 = inlined_call_operand.vmem [shape: bf16[32,32], index: 11, kind: input, shape index: {}]   ;;  %s7994_s12 = inlined_call_operand.vmem [shape: f32[1,32], index: 12, kind: input, shape index: {}]   ;;  %s7995_s13 = inlined_call_operand.vmem [shape: f32[3,32], index: 13, kind: input, shape index: {}]   ;;  %s7996_s14 = inlined_call_operand.vmem [shape: f32[3,32], index: 14, kind: input, shape index: {}]   ;;  %s7997_s15 = inlined_call_operand.vmem [shape: bf16[32,2048], index: 15, kind: input, shape index: {}]   ;;  %s7998_s16 = inlined_call_operand.vmem [shape: f32[1,2048], index: 16, kind: input, shape index: {}]   ;;  %s7999_s17 = inlined_call_operand.vmem [shape: bf16[2048,32], index: 17, kind: input, shape index: {}]   ;;  %s8000_s18 = inlined_call_operand.vmem [shape: f32[1,32], index: 18, kind: input, shape index: {}]   ;;  %s8001_s19 = inlined_call_operand.hbm [shape: f32[20,32], index: 19, kind: output, shape index: {}]  }
   0x1   :  { %8008 = sst [smem:[#allocation5_spill]] %s7982_s0 }
   0x2   :  { %8009 = sst [smem:[#allocation6_spill]] %s7983_s1 }
   0x3   :  { %8010 = sst [smem:[#allocation7_spill]] %s7984_s2 }
   0x4   :  { %8011 = sst [smem:[#allocation8_spill]] %s7985_s3 }
   0x5   :  { %s8012_s20 = sld [smem:[#allocation8_spill]]  ;;  %vm98_vm0 = vcmask 261120  }
   0x6   :  { %s8013_s23 = sld [smem:[#allocation5_spill]] }
   0xb   :  { %v6078_v0 = vld [vmem:[%s8012_s20 + $0x8] sm:$0xff]   ;;  %v6079_v1 = vld [vmem:[%s8012_s20] sm:$0xff]  }
   0xc   :  { %5743 = vmatprep.subr.bf16.mxu0 %v6078_v0  ;;  %v67_v2 = vld [vmem:[%s8013_s23] sm:$0xff]  ;;  %v68_v3 = vld [vmem:[%s8013_s23 + $0x8] sm:$0xff]  ;;  %v69_v4 = vld [vmem:[%s8013_s23 + $0x10] sm:$0xf] }
   0xd   :  { %5744 = vmatpush3.bf16.msra.mxu0 %v6078_v0  ;;  %v73_v5 = vpack.c.bf16 %v68_v3, %v67_v2  ;;  %v74_v6 = vpack.c.bf16 %v69_v4, %v69_v4 }
   0xe   :  { %5745 = vmatprep.subr.bf16.mxu0 %v6079_v1 }
   0xf   :  { %5747 = vmatprep.mubr.msk.bf16.mxu0 %vm98_vm0, %v73_v5 }
  0x11   :  { %5746 = vmatpush3.bf16.msra.mxu0 %v6079_v1 }
  0x14   :  { %5748 = vmatmul.mubr.msk.bf16.vlgmr.msra.gmra.mxu0 %vm98_vm0, %v74_v6 }
  0x15   :  { %24 = vsyncpa [#allocation3], 0  ;;  %v6358_v7 = vmov 0.0   ;;  %v4896_v8 = vld [vmem:[%s7986_s4] ss:$0 sm:$0xff]  ;;  %vm6359_vm1 = vmmov 0  }
  0x16   :  { %5751 = vmatprep.subr.mxu1 %v6358_v7  ;;  %5766 = vmatprep.subr.mxu0 %v6358_v7  ;;  %s6360_s29 = smov 96   ;;  %s6361_s4 = smov 88   ;;  %vm162_vm2 = vcmask 64512   ;;  %vm313_vm3 = vcmask 1043456   ;;  %vm261_vm4 = vcmask 162816   ;;  %vm268_vm5 = vcmask 158720  }
  0x17   :  { %5757 = vmatprep.mubr.msk.f32.mxu1 %vm6359_vm1, %v6358_v7  ;;  %5772 = vmatprep.mubr.msk.f32.mxu0 %vm6359_vm1, %v6358_v7  ;;  %s6362_s0 = smov 120   ;;  %s6363_s30 = smov 80   ;;  %vm1161_vm6 = vcmask 130048   ;;  %vm1165_vm7 = vcmask 195584   ;;  %vm1257_vm8 = vcmask 257024  }
  0x18   :  { %s6364_s20 = smov 112   ;;  %s6365_s21 = smov 72  }
  0x19   :  { %s6366_s1 = smov 104   ;;  %s6367_s22 = smov 64  }
  0x1a   :  { %s6368_s2 = smov 56   ;;  %s8014_s3 = sld [smem:[#allocation7_spill]] }
  0x1b   :  { %s6370_s24 = smov 40   ;;  %s6371_s25 = smov 8  }
  0x1c   :  { %s6372_s26 = smov 16  }
  0x20   :  { %v64_v41 = vld [vmem:[%s8014_s3] sm:$0xff]  ;;  %v65_v46 = vld [vmem:[%s8014_s3 + $0x8] sm:$0xff]  ;;  %v6636_v52 = vld [vmem:[%s8014_s3 + $0x10] sm:$0xf] }
  0xd4   :  { %v5749_v9 = vpop.f32.mrf.mxu0 }
  0xd5   :  { %v6499_v10 = vadd.f32 %v5749_v9, %v4896_v8 }
  0xd6   :  { %v139_v11 = vpop.f32.mrf.mxu0 }
  0xd7   :  { %v6505_v12 = vadd.f32 %v4896_v8, %v139_v11  ;;  %160 = vrot.lane.b32.xlu0 %v6499_v10, %s6360_s29 }
  0xd8   :  { %v5750_v13 = vpop.f32.mrf.mxu0 }
  0xd9   :  { %156 = vrot.lane.b32.xlu1 %v6505_v12, %s6360_s29 }
  0xda   :  { %v142_v14 = vpop.f32.mrf.mxu0 }
  0xdb   :  { %v6511_v15 = vadd.f32 %v4896_v8, %v142_v14 }
  0xdd   :  { %158 = vrot.lane.b32.xlu0 %v6511_v15, %s6360_s29  ;;  %406 = vrot.lane.b32.xlu1 %v6499_v10, %s6361_s4 }
  0xe1   :  { %404 = vrot.lane.b32.xlu0 %v6511_v15, %s6361_s4  ;;  %402 = vrot.lane.b32.xlu1 %v6505_v12, %s6361_s4 }
  0xe5   :  { %396 = vrot.lane.b32.xlu0 %v6505_v12, %s6362_s0  ;;  %648 = vrot.lane.b32.xlu1 %v6499_v10, %s6363_s30 }
  0xe9   :  { %398 = vrot.lane.b32.xlu0 %v6511_v15, %s6362_s0  ;;  %646 = vrot.lane.b32.xlu1 %v6511_v15, %s6363_s30 }
  0xed   :  { %400 = vrot.lane.b32.xlu0 %v6499_v10, %s6362_s0  ;;  %644 = vrot.lane.b32.xlu1 %v6505_v12, %s6363_s30 }
  0xf1   :  { %638 = vrot.lane.b32.xlu0 %v6505_v12, %s6364_s20  ;;  %890 = vrot.lane.b32.xlu1 %v6499_v10, %s6365_s21 }
  0xf5   :  { %640 = vrot.lane.b32.xlu0 %v6511_v15, %s6364_s20  ;;  %888 = vrot.lane.b32.xlu1 %v6511_v15, %s6365_s21 }
  0xf9   :  { %642 = vrot.lane.b32.xlu0 %v6499_v10, %s6364_s20  ;;  %886 = vrot.lane.b32.xlu1 %v6505_v12, %s6365_s21 }
  0xfd   :  { %880 = vrot.lane.b32.xlu0 %v6505_v12, %s6366_s1  ;;  %882 = vrot.lane.b32.xlu1 %v6511_v15, %s6366_s1 }
 0x101   :  { %884 = vrot.lane.b32.xlu0 %v6499_v10, %s6366_s1  ;;  %298 = vrot.lane.b32.xlu1 %v6511_v15, %s6367_s22 }
 0x105   :  { %300 = vrot.lane.b32.xlu0 %v6499_v10, %s6367_s22  ;;  %541 = vrot.lane.b32.xlu1 %v6511_v15, %s6368_s2 }
 0x109   :  { %296 = vrot.lane.b32.xlu0 %v6505_v12, %s6367_s22 }
 0x10d   :  { %543 = vrot.lane.b32.xlu0 %v6499_v10, %s6368_s2 }
 0x111   :  { %539 = vrot.lane.b32.xlu0 %v6505_v12, %s6368_s2  ;;  %s6369_s2 = smov 48  }
 0x149   :  { %v161_v16 = vpop.permute.xlu0 %160 }
 0x14a   :  { %5752 = vmatpush3.xpose.msk.msra.mxu1 %vm162_vm2, %v161_v16 }
 0x14b   :  { %v157_v17 = vpop.permute.xlu1 %156  ;;  %5753 = vmatprep.subr.mxu1 %v6358_v7 }
 0x14f   :  { %v159_v18 = vpop.permute.xlu0 %158  ;;  %v407_v19 = vpop.permute.xlu1 %406 }
 0x150   :  { %5754 = vmatpush3.xpose.msk.msra.mxu1 %vm162_vm2, %v159_v18 }
 0x151   :  { %5755 = vmatprep.subr.mxu1 %v6358_v7 }
 0x153   :  { %v405_v20 = vpop.permute.xlu0 %404  ;;  %v403_v21 = vpop.permute.xlu1 %402 }
 0x154   :  { %5756 = vmatpush3.xpose.msk.msra.mxu1 %vm162_vm2, %v157_v17 }
 0x155   :  { %5781 = vmatprep.subr.mxu1 %v6358_v7 }
 0x157   :  { %v397_v22 = vpop.permute.xlu0 %396  ;;  %5758 = vmatmul.mubr.msk.f32.vlgmr.msra.gmra.mxu1 %vm162_vm2, %v6505_v12  ;;  %v649_v23 = vpop.permute.xlu1 %648 }
 0x158   :  { %5782 = vmatpush3.xpose.msk.msra.mxu1 %vm162_vm2, %v407_v19  ;;  %5760 = vmatprep.mubr.msk.f32.mxu1 %vm6359_vm1, %v6358_v7 }
 0x159   :  { %5783 = vmatprep.subr.mxu1 %v6358_v7 }
 0x15b   :  { %v399_v24 = vpop.permute.xlu0 %398  ;;  %5761 = vmatmul.mubr.msk.f32.gmra.mxu1 %vm162_vm2, %v6511_v15  ;;  %v647_v25 = vpop.permute.xlu1 %646 }
 0x15c   :  { %5784 = vmatpush3.xpose.msk.msra.mxu1 %vm162_vm2, %v405_v20  ;;  %5763 = vmatprep.mubr.msk.f32.mxu1 %vm6359_vm1, %v6358_v7 }
 0x15d   :  { %5785 = vmatprep.subr.mxu1 %v6358_v7 }
 0x15f   :  { %v401_v26 = vpop.permute.xlu0 %400  ;;  %5764 = vmatmul.mubr.msk.f32.gmra.mxu1 %vm162_vm2, %v6499_v10  ;;  %v645_v27 = vpop.permute.xlu1 %644 }
 0x160   :  { %5786 = vmatpush3.xpose.msk.msra.mxu1 %vm162_vm2, %v403_v21  ;;  %5787 = vmatprep.mubr.msk.f32.mxu1 %vm6359_vm1, %v6358_v7 }
 0x161   :  { %5811 = vmatprep.subr.mxu1 %v6358_v7 }
 0x163   :  { %v639_v28 = vpop.permute.xlu0 %638  ;;  %5788 = vmatmul.mubr.msk.f32.vlgmr.msra.gmra.mxu1 %vm162_vm2, %v397_v22  ;;  %v891_v29 = vpop.permute.xlu1 %890 }
 0x164   :  { %5812 = vmatpush3.xpose.msk.msra.mxu1 %vm162_vm2, %v649_v23  ;;  %5790 = vmatprep.mubr.msk.f32.mxu1 %vm6359_vm1, %v6358_v7 }
 0x165   :  { %5813 = vmatprep.subr.mxu1 %v6358_v7 }
 0x167   :  { %v641_v30 = vpop.permute.xlu0 %640  ;;  %5791 = vmatmul.mubr.msk.f32.gmra.mxu1 %vm162_vm2, %v399_v24  ;;  %v889_v31 = vpop.permute.xlu1 %888 }
 0x168   :  { %5814 = vmatpush3.xpose.msk.msra.mxu1 %vm162_vm2, %v647_v25  ;;  %5793 = vmatprep.mubr.msk.f32.mxu1 %vm6359_vm1, %v6358_v7 }
 0x169   :  { %5815 = vmatprep.subr.mxu1 %v6358_v7 }
 0x16b   :  { %v643_v32 = vpop.permute.xlu0 %642  ;;  %5794 = vmatmul.mubr.msk.f32.gmra.mxu1 %vm162_vm2, %v401_v26  ;;  %v887_v33 = vpop.permute.xlu1 %886 }
 0x16c   :  { %5816 = vmatpush3.xpose.msk.msra.mxu1 %vm162_vm2, %v645_v27  ;;  %5817 = vmatprep.mubr.msk.f32.mxu1 %vm6359_vm1, %v6358_v7 }
 0x16d   :  { %5841 = vmatprep.subr.mxu1 %v6358_v7 }
 0x16f   :  { %v881_v34 = vpop.permute.xlu0 %880  ;;  %5818 = vmatmul.mubr.msk.f32.vlgmr.msra.gmra.mxu1 %vm162_vm2, %v639_v28  ;;  %v883_v35 = vpop.permute.xlu1 %882 }
 0x170   :  { %5842 = vmatpush3.xpose.msk.msra.mxu1 %vm162_vm2, %v891_v29  ;;  %5820 = vmatprep.mubr.msk.f32.mxu1 %vm6359_vm1, %v6358_v7 }
 0x171   :  { %5843 = vmatprep.subr.mxu1 %v6358_v7 }
 0x173   :  { %v885_v36 = vpop.permute.xlu0 %884  ;;  %5821 = vmatmul.mubr.msk.f32.gmra.mxu1 %vm162_vm2, %v641_v30  ;;  %v299_v38 = vpop.permute.xlu1 %298 }
 0x174   :  { %5844 = vmatpush3.xpose.msk.msra.mxu1 %vm162_vm2, %v889_v31  ;;  %5823 = vmatprep.mubr.msk.f32.mxu1 %vm6359_vm1, %v6358_v7 }
 0x175   :  { %5845 = vmatprep.subr.mxu1 %v6358_v7 }
 0x177   :  { %v301_v37 = vpop.permute.xlu0 %300  ;;  %5824 = vmatmul.mubr.msk.f32.gmra.mxu1 %vm162_vm2, %v643_v32 }
 0x178   :  { %5767 = vmatpush3.msk.msra.mxu0 %vm313_vm3, %v301_v37  ;;  %5846 = vmatpush3.xpose.msk.msra.mxu1 %vm162_vm2, %v887_v33 }
 0x179   :  { %5768 = vmatprep.subr.mxu0 %v6358_v7  ;;  %5847 = vmatprep.mubr.msk.f32.mxu1 %vm6359_vm1, %v6358_v7 }
 0x17a   :  { %5769 = vmatpush3.msra.mxu0 %v299_v38 }
 0x17b   :  { %v297_v39 = vpop.permute.xlu0 %296  ;;  %5770 = vmatprep.subr.mxu0 %v6358_v7  ;;  %5848 = vmatmul.mubr.msk.f32.vlgmr.msra.gmra.mxu1 %vm162_vm2, %v881_v34 }
 0x17c   :  { %5771 = vmatpush3.msra.mxu0 %v297_v39  ;;  %5850 = vmatprep.mubr.msk.f32.mxu1 %vm6359_vm1, %v6358_v7 }
 0x17d   :  { %5796 = vmatprep.subr.mxu0 %v6358_v7 }
 0x17f   :  { %5851 = vmatmul.mubr.msk.f32.gmra.mxu1 %vm162_vm2, %v883_v35 }
 0x180   :  { %5853 = vmatprep.mubr.msk.f32.mxu1 %vm6359_vm1, %v6358_v7 }
 0x183   :  { %5854 = vmatmul.mubr.msk.f32.gmra.mxu1 %vm162_vm2, %v885_v36 }
 0x217   :  { %v241_v40 = vpop.f32.mrf.mxu1 }
 0x218   :  { %v255_v42 = vmul.f32 0.35355338, %v241_v40 }
 0x219   :  { %v5759_v43 = vpop.f32.mrf.mxu1 }
 0x21a   :  { %v6624_v44 = vadd.f32 %v255_v42, %v64_v41  ;;  %v6687_v43 = vpop.permute.xlu0 %543 }
 0x21b   :  { %v246_v45 = vpop.f32.mrf.mxu1 }
 0x21c   :  { %v256_v47 = vmul.f32 0.35355338, %v246_v45  ;;  %v262_v48 = vsel %vm261_vm4, %v6624_v44, -inf  ;;  %v6689_v45 = vpop.permute.xlu1 %541 }
 0x21d   :  { %v5762_v49 = vpop.f32.mrf.mxu1  ;;  %263 = vmax.xlane.f32.xlu1 %v262_v48 }
 0x21e   :  { %v6631_v50 = vadd.f32 %v256_v47, %v65_v46 }
 0x21f   :  { %v251_v51 = vpop.f32.mrf.mxu1 }
 0x220   :  { %v257_v53 = vmul.f32 0.35355338, %v251_v51  ;;  %v265_v54 = vsel %vm261_vm4, %v6631_v50, -inf }
 0x221   :  { %v5765_v55 = vpop.f32.mrf.mxu1  ;;  %266 = vmax.xlane.f32.xlu0 %v265_v54 }
 0x222   :  { %v6641_v56 = vadd.f32 %v257_v53, %v6636_v52 }
 0x223   :  { %v486_v57 = vpop.f32.mrf.mxu1 }
 0x224   :  { %v500_v58 = vmul.f32 0.35355338, %v486_v57  ;;  %v269_v59 = vsel %vm268_vm5, %v6641_v56, -inf }
 0x225   :  { %v5789_v60 = vpop.f32.mrf.mxu1  ;;  %270 = vmax.xlane.f32.xlu0 %v269_v59 }
 0x226   :  { %v6645_v61 = vadd.f32 %v500_v58, %v64_v41 }
 0x227   :  { %v491_v62 = vpop.f32.mrf.mxu1 }
 0x228   :  { %v501_v63 = vmul.f32 0.35355338, %v491_v62  ;;  %v506_v0 = vsel %vm261_vm4, %v6645_v61, -inf }
 0x229   :  { %v5792_v1 = vpop.f32.mrf.mxu1  ;;  %507 = vmax.xlane.f32.xlu1 %v506_v0 }
 0x22a   :  { %v6649_v2 = vadd.f32 %v501_v63, %v65_v46 }
 0x22b   :  { %v496_v3 = vpop.f32.mrf.mxu1 }
 0x22c   :  { %v502_v4 = vmul.f32 0.35355338, %v496_v3  ;;  %v509_v5 = vsel %vm261_vm4, %v6649_v2, -inf }
 0x22d   :  { %v5795_v6 = vpop.f32.mrf.mxu1  ;;  %510 = vmax.xlane.f32.xlu0 %v509_v5 }
 0x22e   :  { %v6654_v8 = vadd.f32 %v502_v4, %v6636_v52 }
 0x22f   :  { %v728_v9 = vpop.f32.mrf.mxu1 }
 0x230   :  { %v742_v11 = vmul.f32 0.35355338, %v728_v9  ;;  %v512_v13 = vsel %vm268_vm5, %v6654_v8, -inf }
 0x231   :  { %v5819_v14 = vpop.f32.mrf.mxu1  ;;  %513 = vmax.xlane.f32.xlu1 %v512_v13 }
 0x232   :  { %v6658_v16 = vadd.f32 %v742_v11, %v64_v41 }
 0x233   :  { %v733_v17 = vpop.f32.mrf.mxu1 }
 0x234   :  { %v743_v18 = vmul.f32 0.35355338, %v733_v17  ;;  %v748_v19 = vsel %vm261_vm4, %v6658_v16, -inf }
 0x235   :  { %v5822_v20 = vpop.f32.mrf.mxu1  ;;  %749 = vmax.xlane.f32.xlu0 %v748_v19 }
 0x236   :  { %v6662_v21 = vadd.f32 %v743_v18, %v65_v46 }
 0x237   :  { %v738_v22 = vpop.f32.mrf.mxu1 }
 0x238   :  { %v744_v23 = vmul.f32 0.35355338, %v738_v22  ;;  %v751_v24 = vsel %vm261_vm4, %v6662_v21, -inf }
 0x239   :  { %v5825_v25 = vpop.f32.mrf.mxu1  ;;  %752 = vmax.xlane.f32.xlu1 %v751_v24 }
 0x23a   :  { %v6667_v26 = vadd.f32 %v744_v23, %v6636_v52 }
 0x23b   :  { %v970_v27 = vpop.f32.mrf.mxu1 }
 0x23c   :  { %v984_v28 = vmul.f32 0.35355338, %v970_v27  ;;  %v754_v29 = vsel %vm268_vm5, %v6667_v26, -inf }
 0x23d   :  { %v5849_v30 = vpop.f32.mrf.mxu1  ;;  %755 = vmax.xlane.f32.xlu0 %v754_v29 }
 0x23e   :  { %v6671_v31 = vadd.f32 %v984_v28, %v64_v41 }
 0x23f   :  { %v975_v32 = vpop.f32.mrf.mxu1 }
 0x240   :  { %v985_v33 = vmul.f32 0.35355338, %v975_v32  ;;  %v990_v34 = vsel %vm261_vm4, %v6671_v31, -inf }
 0x241   :  { %v5852_v35 = vpop.f32.mrf.mxu1  ;;  %991 = vmax.xlane.f32.xlu1 %v990_v34 }
 0x242   :  { %v6675_v36 = vadd.f32 %v985_v33, %v65_v46  ;;  %v6691_v46 = vpop.permute.xlu0 %539 }
 0x243   :  { %v980_v37 = vpop.f32.mrf.mxu1 }
 0x244   :  { %v993_v38 = vsel %vm261_vm4, %v6675_v36, -inf  ;;  %v986_v40 = vmul.f32 0.35355338, %v980_v37 }
 0x245   :  { %v5855_v39 = vpop.f32.mrf.mxu1  ;;  %994 = vmax.xlane.f32.xlu0 %v993_v38 }
 0x246   :  { %v6682_v41 = vadd.f32 %v986_v40, %v6636_v52 }
 0x248   :  { %v996_v42 = vsel %vm268_vm5, %v6682_v41, -inf }
 0x252   :  { %783 = vrot.lane.b32.xlu1 %v6511_v15, %s6369_s2 }
 0x25b   :  { %785 = vrot.lane.b32.xlu0 %v6499_v10, %s6369_s2 }
 0x276   :  { %997 = vmax.xlane.f32.xlu1 %v996_v42 }
 0x287   :  { %781 = vrot.lane.b32.xlu1 %v6505_v12, %s6369_s2  ;;  %s8015_s2 = sld [smem:[#allocation6_spill]] }
 0x2a6   :  { %v264_v47 = vpop.xlane.xlu1 %263 }
 0x2a7   :  { %v272_v48 = vsub.f32 %v6624_v44, %v264_v47 }
 0x2a9   :  { %v275_v49 = vmul.f32 1.442695, %v272_v48 }
 0x2aa   :  { %v267_v51 = vpop.xlane.xlu0 %266 }
 0x2ab   :  { %6216 = vpow2.f32 %v275_v49  ;;  %v273_v52 = vsub.f32 %v6631_v50, %v267_v51 }
 0x2ad   :  { %v277_v53 = vmul.f32 1.442695, %v273_v52 }
 0x2ae   :  { %v271_v54 = vpop.xlane.xlu0 %270 }
 0x2af   :  { %6218 = vpow2.f32 %v277_v53  ;;  %v274_v55 = vsub.f32 %v6641_v56, %v271_v54 }
 0x2b1   :  { %v279_v57 = vmul.f32 1.442695, %v274_v55 }
 0x2b2   :  { %v508_v58 = vpop.xlane.xlu1 %507 }
 0x2b3   :  { %6220 = vpow2.f32 %v279_v57  ;;  %v515_v59 = vsub.f32 %v6645_v61, %v508_v58 }
 0x2b5   :  { %v518_v60 = vmul.f32 1.442695, %v515_v59 }
 0x2b6   :  { %v511_v62 = vpop.xlane.xlu0 %510 }
 0x2b7   :  { %6222 = vpow2.f32 %v518_v60  ;;  %v516_v44 = vsub.f32 %v6649_v2, %v511_v62 }
 0x2b8   :  { %v6698_v63 = vpop.eup %6216 }
 0x2b9   :  { %v520_v0 = vmul.f32 1.442695, %v516_v44  ;;  %v281_v50 = vsel %vm261_vm4, %v6698_v63, 0.0 }
 0x2ba   :  { %282 = vadd.xlane.f32.xlu0 %v281_v50  ;;  %v514_v1 = vpop.xlane.xlu1 %513 }
 0x2bb   :  { %6224 = vpow2.f32 %v520_v0  ;;  %v517_v56 = vsub.f32 %v6654_v8, %v514_v1 }
 0x2bc   :  { %v6703_v3 = vpop.eup %6218 }
 0x2bd   :  { %v522_v4 = vmul.f32 1.442695, %v517_v56  ;;  %v284_v61 = vsel %vm261_vm4, %v6703_v3, 0.0 }
 0x2be   :  { %v750_v5 = vpop.xlane.xlu0 %749  ;;  %285 = vadd.xlane.f32.xlu1 %v284_v61 }
 0x2bf   :  { %6226 = vpow2.f32 %v522_v4  ;;  %v757_v2 = vsub.f32 %v6658_v16, %v750_v5 }
 0x2c0   :  { %v6708_v6 = vpop.eup %6220 }
 0x2c1   :  { %v760_v9 = vmul.f32 1.442695, %v757_v2  ;;  %v287_v11 = vsel %vm268_vm5, %v6708_v6, 0.0 }
 0x2c2   :  { %288 = vadd.xlane.f32.xlu0 %v287_v11  ;;  %v753_v13 = vpop.xlane.xlu1 %752 }
 0x2c3   :  { %6228 = vpow2.f32 %v760_v9  ;;  %v758_v8 = vsub.f32 %v6662_v21, %v753_v13 }
 0x2c4   :  { %v6713_v14 = vpop.eup %6222 }
 0x2c5   :  { %v762_v17 = vmul.f32 1.442695, %v758_v8  ;;  %v524_v18 = vsel %vm261_vm4, %v6713_v14, 0.0 }
 0x2c6   :  { %525 = vadd.xlane.f32.xlu1 %v524_v18  ;;  %v756_v20 = vpop.xlane.xlu0 %755 }
 0x2c7   :  { %6230 = vpow2.f32 %v762_v17  ;;  %v759_v38 = vsub.f32 %v6667_v26, %v756_v20 }
 0x2c8   :  { %v6717_v16 = vpop.eup %6224 }
 0x2c9   :  { %v527_v19 = vsel %vm261_vm4, %v6717_v16, 0.0  ;;  %v764_v39 = vmul.f32 1.442695, %v759_v38 }
 0x2ca   :  { %528 = vadd.xlane.f32.xlu0 %v527_v19  ;;  %v992_v22 = vpop.xlane.xlu1 %991 }
 0x2cb   :  { %v999_v23 = vsub.f32 %v6671_v31, %v992_v22 }
 0x2cc   :  { %v6722_v24 = vpop.eup %6226 }
 0x2cd   :  { %v1002_v21 = vmul.f32 1.442695, %v999_v23  ;;  %v530_v25 = vsel %vm268_vm5, %v6722_v24, 0.0 }
 0x2ce   :  { %v995_v27 = vpop.xlane.xlu0 %994  ;;  %531 = vadd.xlane.f32.xlu1 %v530_v25  ;;  %v784_v42 = vpop.permute.xlu1 %783 }
 0x2cf   :  { %6232 = vpow2.f32 %v1002_v21  ;;  %v1000_v28 = vsub.f32 %v6675_v36, %v995_v27 }
 0x2d0   :  { %v6727_v29 = vpop.eup %6228 }
 0x2d1   :  { %v1004_v30 = vmul.f32 1.442695, %v1000_v28  ;;  %v766_v32 = vsel %vm261_vm4, %v6727_v29, 0.0 }
 0x2d2   :  { %767 = vadd.xlane.f32.xlu1 %v766_v32 }
 0x2d3   :  { %6234 = vpow2.f32 %v1004_v30 }
 0x2d4   :  { %v6731_v31 = vpop.eup %6230  ;;  %6236 = vpow2.f32 %v764_v39 }
 0x2d5   :  { %v769_v33 = vsel %vm261_vm4, %v6731_v31, 0.0 }
 0x2d6   :  { %770 = vadd.xlane.f32.xlu1 %v769_v33 }
 0x2dc   :  { %v6735_v34 = vpop.eup %6232 }
 0x2dd   :  { %v1008_v35 = vsel %vm261_vm4, %v6735_v34, 0.0 }
 0x2de   :  { %1009 = vadd.xlane.f32.xlu1 %v1008_v35 }
 0x2e0   :  { %v6739_v36 = vpop.eup %6234  ;;  %1027 = vrot.lane.b32.xlu0 %v6499_v10, %s6370_s24 }
 0x2e1   :  { %v1011_v37 = vsel %vm261_vm4, %v6739_v36, 0.0  ;;  %v6746_v40 = vpop.eup %6236 }
 0x2e2   :  { %1012 = vadd.xlane.f32.xlu1 %v1011_v37  ;;  %v772_v47 = vsel %vm268_vm5, %v6746_v40, 0.0 }
 0x2f3   :  { %1025 = vrot.lane.b32.xlu1 %v6511_v15, %s6370_s24  ;;  %v786_v15 = vpop.permute.xlu0 %785 }
 0x2ff   :  { %773 = vadd.xlane.f32.xlu0 %v772_v47  ;;  %v998_v48 = vpop.xlane.xlu1 %997 }
 0x300   :  { %v1001_v10 = vsub.f32 %v6682_v41, %v998_v48 }
 0x302   :  { %v1006_v49 = vmul.f32 1.442695, %v1001_v10  ;;  %v6080_v10 = vld [vmem:[%s7987_s5 + $0x8] sm:$0xff]  }
 0x303   :  { %v782_v52 = vpop.permute.xlu1 %781  ;;  %5871 = vmatprep.subr.bf16.mxu1 %v6080_v10 }
 0x304   :  { %6238 = vpow2.f32 %v1006_v49  ;;  %5872 = vmatpush3.bf16.msra.mxu1 %v6080_v10 }
 0x311   :  { %v6751_v51 = vpop.eup %6238 }
 0x312   :  { %v1014_v26 = vsel %vm268_vm5, %v6751_v51, 0.0 }
 0x313   :  { %1015 = vadd.xlane.f32.xlu0 %v1014_v26  ;;  %v6081_v26 = vld [vmem:[%s7987_s5] sm:$0xff]  }
 0x314   :  { %5873 = vmatprep.subr.bf16.mxu1 %v6081_v26 }
 0x315   :  { %5874 = vmatpush3.bf16.msra.mxu1 %v6081_v26 }
 0x329   :  { %1023 = vrot.lane.b32.xlu0 %v6505_v12, %s6370_s24  ;;  %s8006_s24 = smov 24  }
 0x343   :  { %v283_v53 = vpop.xlane.xlu0 %282 }
 0x344   :  { %6240 = vrcp.f32 %v283_v53 }
 0x347   :  { %v286_v54 = vpop.xlane.xlu1 %285 }
 0x348   :  { %6242 = vrcp.f32 %v286_v54 }
 0x34b   :  { %v289_v55 = vpop.xlane.xlu0 %288 }
 0x34c   :  { %6244 = vrcp.f32 %v289_v55 }
 0x34f   :  { %v526_v57 = vpop.xlane.xlu1 %525 }
 0x350   :  { %6246 = vrcp.f32 %v526_v57 }
 0x351   :  { %v6241_v41 = vpop.eup %6240 }
 0x352   :  { %v293_v58 = vmul.f32 %v6241_v41, %v6698_v63 }
 0x353   :  { %v529_v59 = vpop.xlane.xlu0 %528 }
 0x354   :  { %6248 = vrcp.f32 %v529_v59  ;;  %5773 = vmatmul.mubr.msk.f32.vlgmr.msra.gmra.mxu0 %vm261_vm4, %v293_v58 }
 0x355   :  { %v6243_v60 = vpop.eup %6242  ;;  %5797 = vmatpush3.msk.msra.mxu0 %vm313_vm3, %v6687_v43  ;;  %5775 = vmatprep.mubr.msk.f32.mxu0 %vm6359_vm1, %v6358_v7 }
 0x356   :  { %5798 = vmatprep.subr.mxu0 %v6358_v7  ;;  %v294_v12 = vmul.f32 %v6243_v60, %v6703_v3 }
 0x357   :  { %5799 = vmatpush3.msra.mxu0 %v6689_v45  ;;  %v532_v62 = vpop.xlane.xlu1 %531 }
 0x358   :  { %5800 = vmatprep.subr.mxu0 %v6358_v7  ;;  %6250 = vrcp.f32 %v532_v62  ;;  %5776 = vmatmul.mubr.msk.f32.gmra.mxu0 %vm261_vm4, %v294_v12 }
 0x359   :  { %v6245_v44 = vpop.eup %6244  ;;  %5801 = vmatpush3.msra.mxu0 %v6691_v46  ;;  %5778 = vmatprep.mubr.msk.f32.mxu0 %vm6359_vm1, %v6358_v7 }
 0x35a   :  { %v295_v43 = vmul.f32 %v6245_v44, %v6708_v6  ;;  %5826 = vmatprep.subr.mxu0 %v6358_v7  ;;  %v1028_v6 = vpop.permute.xlu0 %1027 }
 0x35b   :  { %v768_v63 = vpop.xlane.xlu1 %767 }
 0x35c   :  { %6252 = vrcp.f32 %v768_v63  ;;  %5779 = vmatmul.mubr.msk.f32.gmra.mxu0 %vm261_vm4, %v295_v43 }
 0x35d   :  { %v6247_v45 = vpop.eup %6246  ;;  %5802 = vmatprep.mubr.msk.f32.mxu0 %vm6359_vm1, %v6358_v7 }
 0x35e   :  { %v536_v0 = vmul.f32 %v6247_v45, %v6713_v14 }
 0x35f   :  { %v771_v50 = vpop.xlane.xlu1 %770 }
 0x360   :  { %6254 = vrcp.f32 %v771_v50  ;;  %5803 = vmatmul.mubr.msk.f32.vlgmr.msra.gmra.mxu0 %vm261_vm4, %v536_v0 }
 0x361   :  { %v6249_v46 = vpop.eup %6248  ;;  %5827 = vmatpush3.msk.msra.mxu0 %vm313_vm3, %v786_v15  ;;  %5805 = vmatprep.mubr.msk.f32.mxu0 %vm6359_vm1, %v6358_v7 }
 0x362   :  { %5828 = vmatprep.subr.mxu0 %v6358_v7  ;;  %v537_v1 = vmul.f32 %v6249_v46, %v6717_v16 }
 0x363   :  { %5829 = vmatpush3.msra.mxu0 %v784_v42 }
 0x364   :  { %5830 = vmatprep.subr.mxu0 %v6358_v7  ;;  %5806 = vmatmul.mubr.msk.f32.gmra.mxu0 %vm261_vm4, %v537_v1 }
 0x365   :  { %v6251_v56 = vpop.eup %6250  ;;  %5831 = vmatpush3.msra.mxu0 %v782_v52  ;;  %5808 = vmatprep.mubr.msk.f32.mxu0 %vm6359_vm1, %v6358_v7 }
 0x366   :  { %v538_v3 = vmul.f32 %v6251_v56, %v6722_v24  ;;  %5856 = vmatprep.subr.mxu0 %v6358_v7 }
 0x367   :  { %v1010_v4 = vpop.xlane.xlu1 %1009 }
 0x368   :  { %5809 = vmatmul.mubr.msk.f32.gmra.mxu0 %vm261_vm4, %v538_v3 }
 0x369   :  { %v6253_v61 = vpop.eup %6252  ;;  %5832 = vmatprep.mubr.msk.f32.mxu0 %vm6359_vm1, %v6358_v7 }
 0x36a   :  { %v778_v5 = vmul.f32 %v6253_v61, %v6727_v29 }
 0x36b   :  { %v1013_v2 = vpop.xlane.xlu1 %1012 }
 0x36c   :  { %5833 = vmatmul.mubr.msk.f32.vlgmr.msra.gmra.mxu0 %vm261_vm4, %v778_v5 }
 0x36d   :  { %v6255_v9 = vpop.eup %6254  ;;  %5857 = vmatpush3.msk.msra.mxu0 %vm313_vm3, %v1028_v6  ;;  %5835 = vmatprep.mubr.msk.f32.mxu0 %vm6359_vm1, %v6358_v7 }
 0x36e   :  { %5858 = vmatprep.subr.mxu0 %v6358_v7  ;;  %v779_v11 = vmul.f32 %v6255_v9, %v6731_v31 }
 0x36f   :  { %v1026_v13 = vpop.permute.xlu1 %1025 }
 0x370   :  { %5836 = vmatmul.mubr.msk.f32.gmra.mxu0 %vm261_vm4, %v779_v11 }
 0x371   :  { %5859 = vmatpush3.msra.mxu0 %v1026_v13  ;;  %5838 = vmatprep.mubr.msk.f32.mxu0 %vm6359_vm1, %v6358_v7 }
 0x372   :  { %5860 = vmatprep.subr.mxu0 %v6358_v7 }
 0x388   :  { %v774_v8 = vpop.xlane.xlu0 %773 }
 0x389   :  { %6256 = vrcp.f32 %v774_v8 }
 0x38a   :  { %6258 = vrcp.f32 %v1010_v4 }
 0x38b   :  { %6260 = vrcp.f32 %v1013_v2 }
 0x396   :  { %v6257_v14 = vpop.eup %6256 }
 0x397   :  { %v780_v17 = vmul.f32 %v6257_v14, %v6746_v40  ;;  %v6259_v16 = vpop.eup %6258  ;;  %v4941_v14 = vld [vmem:[%s7988_s6] ss:$0 sm:$0xff] }
 0x398   :  { %v1020_v19 = vmul.f32 %v6259_v16, %v6735_v34  ;;  %v6261_v22 = vpop.eup %6260 }
 0x399   :  { %5839 = vmatmul.mubr.msk.f32.gmra.mxu0 %vm261_vm4, %v780_v17  ;;  %v1021_v23 = vmul.f32 %v6261_v22, %v6739_v36 }
 0x39a   :  { %5862 = vmatprep.mubr.msk.f32.mxu0 %vm6359_vm1, %v6358_v7 }
 0x39c   :  { %v1016_v18 = vpop.xlane.xlu0 %1015 }
 0x39d   :  { %6262 = vrcp.f32 %v1016_v18 }
 0x3a0   :  { %v1024_v20 = vpop.permute.xlu0 %1023 }
 0x3a1   :  { %5861 = vmatpush3.msra.mxu0 %v1024_v20 }
 0x3a2   :  { %5863 = vmatmul.mubr.msk.f32.vlgmr.msra.gmra.mxu0 %vm261_vm4, %v1020_v19  ;;  %v6330_v19 = vld [vmem:[%s8013_s23] sm:$0xff] }
 0x3a3   :  { %5865 = vmatprep.mubr.msk.f32.mxu0 %vm6359_vm1, %v6358_v7 }
 0x3a6   :  { %5866 = vmatmul.mubr.msk.f32.gmra.mxu0 %vm261_vm4, %v1021_v23 }
 0x3a7   :  { %5868 = vmatprep.mubr.msk.f32.mxu0 %vm6359_vm1, %v6358_v7 }
 0x3aa   :  { %v6263_v24 = vpop.eup %6262 }
 0x3ab   :  { %v1022_v21 = vmul.f32 %v6263_v24, %v6751_v51 }
 0x3ad   :  { %5869 = vmatmul.mubr.msk.f32.gmra.mxu0 %vm261_vm4, %v1022_v21 }
 0x414   :  { %v382_v25 = vpop.f32.mrf.mxu0 }
 0x416   :  { %v5774_v27 = vpop.f32.mrf.mxu0 }
 0x418   :  { %v387_v28 = vpop.f32.mrf.mxu0 }
 0x41a   :  { %v5777_v29 = vpop.f32.mrf.mxu0 }
 0x41b   :  { %v6332_v29 = vld [vmem:[%s8013_s23 + $0x10] sm:$0xf] }
 0x41c   :  { %v392_v30 = vpop.f32.mrf.mxu0 }
 0x41e   :  { %v5780_v32 = vpop.f32.mrf.mxu0 }
 0x420   :  { %v624_v31 = vpop.f32.mrf.mxu0 }
 0x422   :  { %v5804_v33 = vpop.f32.mrf.mxu0 }
 0x423   :  { %v6083_v33 = vld [vmem:[%s7991_s9] sm:$0xff]  }
 0x424   :  { %v629_v34 = vpop.f32.mrf.mxu0 }
 0x425   :  { %v6048_v35 = vpack.i.bf16 %v629_v34, %v624_v31  ;;  %v6082_v31 = vld [vmem:[%s7991_s9 + $0x8] sm:$0xff]  }
 0x426   :  { %v5807_v36 = vpop.f32.mrf.mxu0  ;;  %5887 = vmatprep.subr.bf16.mxu1 %v6082_v31 }
 0x427   :  { %6049 = vrot.lane.b32.xlu1 %v6048_v35, %s6371_s25 }
 0x428   :  { %v634_v37 = vpop.f32.mrf.mxu0 }
 0x429   :  { %1129 = vrot.lane.b32.xlu0 %v634_v37, %s6371_s25 }
 0x42a   :  { %v5810_v38 = vpop.f32.mrf.mxu0 }
 0x42c   :  { %v866_v39 = vpop.f32.mrf.mxu0 }
 0x42e   :  { %v5834_v40 = vpop.f32.mrf.mxu0 }
 0x430   :  { %v871_v42 = vpop.f32.mrf.mxu0 }
 0x431   :  { %v6053_v47 = vpack.i.bf16 %v871_v42, %v866_v39 }
 0x432   :  { %v5837_v48 = vpop.f32.mrf.mxu0 }
 0x433   :  { %6054 = vrot.lane.b32.xlu1 %v6053_v47, %s6372_s26 }
 0x459   :  { %v876_v49 = vpop.f32.mrf.mxu0 }
 0x45a   :  { %1141 = vrot.lane.b32.xlu0 %v876_v49, %s6372_s26 }
 0x45b   :  { %v5840_v51 = vpop.f32.mrf.mxu0 }
 0x462   :  { %v1108_v15 = vpop.f32.mrf.mxu0 }
 0x464   :  { %v5864_v52 = vpop.f32.mrf.mxu0 }
 0x465   :  { %v70_v52 = vld [vmem:[%s8015_s2] sm:$0xff] }
 0x466   :  { %v1113_v53 = vpop.f32.mrf.mxu0 }
 0x467   :  { %v6058_v54 = vpack.i.bf16 %v1113_v53, %v1108_v15  ;;  %v71_v53 = vld [vmem:[%s8015_s2 + $0x8] sm:$0xff] }
 0x468   :  { %v5867_v55 = vpop.f32.mrf.mxu0 }
 0x469   :  { %6059 = vrot.lane.b32.xlu1 %v6058_v54, %s8006_s24  ;;  %v1387_v54 = vpack.c.bf16 %v71_v53, %v70_v52  ;;  %v72_v55 = vld [vmem:[%s8015_s2 + $0x10] sm:$0xf] }
 0x46d   :  { %v1118_v57 = vpop.f32.mrf.mxu0 }
 0x46e   :  { %1153 = vrot.lane.b32.xlu0 %v1118_v57, %s8006_s24  ;;  %v1388_v57 = vpack.c.bf16 %v72_v55, %v72_v55 }
 0x46f   :  { %v5870_v41 = vpop.f32.mrf.mxu0 }
 0x470   :  { %v6084_v41 = vld [vmem:[%s7989_s7 + $0x8] sm:$0xff]  }
 0x471   :  { %5879 = vmatprep.subr.bf16.mxu0 %v6084_v41 }
 0x472   :  { %5880 = vmatpush3.bf16.msra.mxu0 %v6084_v41 }
 0x499   :  { %v6050_v58 = vpop.permute.xlu1 %6049 }
 0x49a   :  { %v6052_v60 = vunpack.i.h.bf16 %v6050_v58  ;;  %v6051_v12 = vunpack.i.l.bf16 %v6050_v58  ;;  %v6085_v58 = vld [vmem:[%s7989_s7] sm:$0xff]  }
 0x49b   :  { %v1130_v62 = vpop.permute.xlu0 %1129  ;;  %5881 = vmatprep.subr.bf16.mxu0 %v6085_v58 }
 0x49c   :  { %v1159_v45 = vsel %vm162_vm2, %v387_v28, %v6052_v60  ;;  %v1158_v0 = vsel %vm162_vm2, %v382_v25, %v6051_v12  ;;  %v1160_v5 = vsel %vm162_vm2, %v392_v30, %v1130_v62  ;;  %v6331_v25 = vld [vmem:[%s8013_s23 + $0x8] sm:$0xff]  ;;  %5882 = vmatpush3.bf16.msra.mxu0 %v6085_v58  ;;  %v7031_v58 = vld [vmem:[%s8014_s3] sm:$0xff] }
 0x49d   :  { %5895 = vmatprep.subr.mxu0 %v6358_v7 }
 0x4a5   :  { %v6055_v59 = vpop.permute.xlu1 %6054 }
 0x4a6   :  { %v6057_v44 = vunpack.i.h.bf16 %v6055_v59  ;;  %v6056_v43 = vunpack.i.l.bf16 %v6055_v59 }
 0x4a8   :  { %v1162_v56 = vsel %vm1161_vm6, %v1158_v0, %v6056_v43  ;;  %v1163_v3 = vsel %vm1161_vm6, %v1159_v45, %v6057_v44 }
 0x4cc   :  { %v1142_v50 = vpop.permute.xlu0 %1141 }
 0x4cd   :  { %v1164_v6 = vsel %vm1161_vm6, %v1160_v5, %v1142_v50 }
 0x4db   :  { %v6060_v63 = vpop.permute.xlu1 %6059 }
 0x4dc   :  { %v6062_v46 = vunpack.i.h.bf16 %v6060_v63  ;;  %v6061_v1 = vunpack.i.l.bf16 %v6060_v63 }
 0x4de   :  { %v1166_v4 = vsel %vm1165_vm7, %v1162_v56, %v6061_v1  ;;  %v1167_v61 = vsel %vm1165_vm7, %v1163_v3, %v6062_v46  ;;  %v4946_v1 = vld [vmem:[%s7995_s13] ss:$0 sm:$0xff] }
 0x4df   :  { %v1169_v2 = vpack.c.bf16 %v1167_v61, %v1166_v4  ;;  %v4947_v61 = vld [vmem:[%s7996_s14] ss:$0 sm:$0xff] }
 0x4e0   :  { %v1154_v9 = vpop.permute.xlu0 %1153 }
 0x4e1   :  { %v1168_v11 = vsel %vm1165_vm7, %v1164_v6, %v1154_v9  ;;  %5875 = vmatprep.mubr.msk.bf16.mxu1 %vm98_vm0, %v1169_v2 }
 0x4e2   :  { %v1170_v13 = vpack.c.bf16 %v1168_v11, %v1168_v11 }
 0x4e4   :  { %5876 = vmatmul.mubr.msk.bf16.vlgmr.msra.gmra.mxu1 %vm98_vm0, %v1170_v13 }
 0x4e5   :  { %5888 = vmatpush3.bf16.msra.mxu1 %v6082_v31  ;;  %5891 = vmatprep.mubr.msk.bf16.mxu1 %vm98_vm0, %v1387_v54 }
 0x4e6   :  { %5889 = vmatprep.subr.bf16.mxu1 %v6083_v33 }
 0x4e9   :  { %5890 = vmatpush3.bf16.msra.mxu1 %v6083_v33 }
 0x4ea   :  { %5910 = vmatprep.subr.mxu1 %v6358_v7 }
 0x4ec   :  { %5892 = vmatmul.mubr.msk.bf16.vlgmr.msra.gmra.mxu1 %vm98_vm0, %v1388_v57 }
 0x4ed   :  { %5916 = vmatprep.mubr.msk.f32.mxu1 %vm6359_vm1, %v6358_v7 }
 0x5a4   :  { %v5877_v8 = vpop.f32.mrf.mxu1 }
 0x5a5   :  { %v1243_v23 = vadd.f32 %v5877_v8, %v4941_v14 }
 0x5a6   :  { %v1234_v17 = vpop.f32.mrf.mxu1 }
 0x5a7   :  { %v1235_v18 = vadd.f32 %v4941_v14, %v1234_v17  ;;  %v1250_v30 = vadd.f32 %v6332_v29, %v1243_v23 }
 0x5a8   :  { %v5878_v16 = vpop.f32.mrf.mxu1 }
 0x5a9   :  { %v1248_v20 = vadd.f32 %v6330_v19, %v1235_v18  ;;  %v1258_v32 = vsel %vm1257_vm8, %v1250_v30, 0.0  ;;  %v4953_v16 = vld [vmem:[%s7992_s10] ss:$0 sm:$0xff] }
 0x5aa   :  { %v1237_v22 = vpop.f32.mrf.mxu1 }
 0x5ab   :  { %v1238_v24 = vadd.f32 %v4941_v14, %v1237_v22  ;;  %v1251_v21 = vsel %vm98_vm0, %v1248_v20, 0.0 }
 0x5ac   :  { %1252 = vadd.xlane.f32.xlu1 %v1251_v21  ;;  %v5893_v18 = vpop.f32.mrf.mxu1 }
 0x5ad   :  { %v1249_v27 = vadd.f32 %v6331_v25, %v1238_v24  ;;  %v6907_v19 = vadd.f32 %v5893_v18, %v4953_v16 }
 0x5af   :  { %v1254_v28 = vsel %vm98_vm0, %v1249_v27, 0.0 }
 0x5b0   :  { %1255 = vadd.xlane.f32.xlu0 %v1254_v28 }
 0x5b4   :  { %1259 = vadd.xlane.f32.xlu0 %v1258_v32 }
 0x635   :  { %v1253_v34 = vpop.xlane.xlu1 %1252 }
 0x636   :  { %v1262_v35 = vmul.f32 0.03125, %v1253_v34 }
 0x638   :  { %v1265_v36 = vsub.f32 %v1248_v20, %v1262_v35  ;;  %v1452_v20 = vpop.f32.mrf.mxu1 }
 0x639   :  { %v1256_v37 = vpop.xlane.xlu0 %1255  ;;  %v6916_v21 = vadd.f32 %v4953_v16, %v1452_v20 }
 0x63a   :  { %v1263_v38 = vmul.f32 0.03125, %v1256_v37  ;;  %v1268_v39 = vmul.f32 %v1265_v36, %v1265_v36  ;;  %v5894_v22 = vpop.f32.mrf.mxu1 }
 0x63c   :  { %v1266_v40 = vsub.f32 %v1249_v27, %v1263_v38  ;;  %v1271_v42 = vsel %vm98_vm0, %v1268_v39, 0.0  ;;  %v1455_v23 = vpop.f32.mrf.mxu1  ;;  %v4948_v27 = vld [vmem:[%s7990_s8] ss:$0 sm:$0xff]  ;;  %s6375_s8 = smov [#allocation2]  }
 0x63d   :  { %v1260_v47 = vpop.xlane.xlu0 %1259  ;;  %1272 = vadd.xlane.f32.xlu1 %v1271_v42  ;;  %v6914_v24 = vadd.f32 %v4953_v16, %v1455_v23 }
 0x63e   :  { %v1264_v48 = vmul.f32 0.03125, %v1260_v47  ;;  %v1269_v10 = vmul.f32 %v1266_v40, %v1266_v40 }
 0x640   :  { %v1267_v49 = vsub.f32 %v1250_v30, %v1264_v48  ;;  %v1274_v51 = vsel %vm98_vm0, %v1269_v10, 0.0 }
 0x641   :  { %1275 = vadd.xlane.f32.xlu0 %v1274_v51 }
 0x642   :  { %v1270_v26 = vmul.f32 %v1267_v49, %v1267_v49 }
 0x644   :  { %v1277_v15 = vsel %vm1257_vm8, %v1270_v26, 0.0 }
 0x645   :  { %1278 = vadd.xlane.f32.xlu1 %v1277_v15 }
 0x656   :  { %1710 = vrot.lane.b32.xlu1 %v6914_v24, %s6362_s0 }
 0x657   :  { %1712 = vrot.lane.b32.xlu0 %v6907_v19, %s6362_s0 }
 0x65a   :  { %1708 = vrot.lane.b32.xlu1 %v6916_v21, %s6362_s0 }
 0x65e   :  { %1954 = vrot.lane.b32.xlu1 %v6907_v19, %s6364_s20 }
 0x662   :  { %1952 = vrot.lane.b32.xlu1 %v6914_v24, %s6364_s20 }
 0x666   :  { %1950 = vrot.lane.b32.xlu1 %v6916_v21, %s6364_s20 }
 0x6c6   :  { %v1273_v59 = vpop.xlane.xlu1 %1272 }
 0x6c7   :  { %v1280_v60 = vmul.f32 0.03125, %v1273_v59 }
 0x6c9   :  { %v1285_v12 = vadd.f32 1e-05, %v1280_v60 }
 0x6ca   :  { %v1276_v62 = vpop.xlane.xlu0 %1275 }
 0x6cb   :  { %6264 = vrsqrt.f32 %v1285_v12  ;;  %v1281_v44 = vmul.f32 0.03125, %v1276_v62 }
 0x6cd   :  { %v1286_v43 = vadd.f32 1e-05, %v1281_v44 }
 0x6ce   :  { %v1279_v63 = vpop.xlane.xlu1 %1278  ;;  %v1713_v30 = vpop.permute.xlu0 %1712 }
 0x6cf   :  { %6266 = vrsqrt.f32 %v1286_v43  ;;  %v1282_v45 = vmul.f32 0.03125, %v1279_v63  ;;  %v7041_v43 = vld [vmem:[%s8014_s3 + $0x8] sm:$0xff] }
 0x6d1   :  { %v1287_v0 = vadd.f32 1e-05, %v1282_v45 }
 0x6d2   :  { %v1711_v34 = vpop.permute.xlu1 %1710 }
 0x6d3   :  { %6268 = vrsqrt.f32 %v1287_v0 }
 0x6d8   :  { %v6265_v50 = vpop.eup %6264 }
 0x6d9   :  { %v1291_v46 = vmul.f32 %v6265_v50, %v1265_v36  ;;  %v1709_v36 = vpop.permute.xlu1 %1708 }
 0x6db   :  { %v1298_v4 = vmul.f32 %v4946_v1, %v1291_v46 }
 0x6dc   :  { %v6267_v56 = vpop.eup %6266 }
 0x6dd   :  { %v1292_v3 = vmul.f32 %v6267_v56, %v1266_v40  ;;  %v6890_v9 = vadd.f32 %v4947_v61, %v1298_v4  ;;  %v1955_v37 = vpop.permute.xlu1 %1954 }
 0x6df   :  { %v1299_v5 = vmul.f32 %v4946_v1, %v1292_v3 }
 0x6e0   :  { %v6269_v2 = vpop.eup %6268 }
 0x6e1   :  { %v1293_v6 = vmul.f32 %v6269_v2, %v1267_v49  ;;  %v6892_v11 = vadd.f32 %v4947_v61, %v1299_v5  ;;  %v1953_v38 = vpop.permute.xlu1 %1952 }
 0x6e3   :  { %v1300_v13 = vmul.f32 %v4946_v1, %v1293_v6  ;;  %v1308_v8 = vpack.c.bf16 %v6892_v11, %v6890_v9  ;;  %v7048_v1 = vld [vmem:[%s8014_s3 + $0x10] sm:$0xf] }
 0x6e5   :  { %v6896_v14 = vadd.f32 %v4947_v61, %v1300_v13  ;;  %5883 = vmatprep.mubr.msk.bf16.mxu0 %vm98_vm0, %v1308_v8  ;;  %v1951_v39 = vpop.permute.xlu1 %1950 }
 0x6e7   :  { %v1309_v17 = vpack.c.bf16 %v6896_v14, %v6896_v14 }
 0x6e9   :  { %5884 = vmatmul.mubr.msk.bf16.vlgmr.msra.gmra.mxu0 %vm98_vm0, %v1309_v17 }
 0x6ea   :  { %5901 = vmatprep.mubr.msk.f32.mxu0 %vm6359_vm1, %v6358_v7  ;;  %5896 = vmatpush3.xpose.msk.msra.mxu0 %vm162_vm2, %v6907_v19 }
 0x6eb   :  { %5897 = vmatprep.subr.mxu0 %v6358_v7 }
 0x6ee   :  { %5898 = vmatpush3.xpose.msk.msra.mxu0 %vm162_vm2, %v6914_v24 }
 0x6ef   :  { %5899 = vmatprep.subr.mxu0 %v6358_v7 }
 0x6f2   :  { %5900 = vmatpush3.xpose.msk.msra.mxu0 %vm162_vm2, %v6916_v21 }
 0x6f3   :  { %5925 = vmatprep.subr.mxu0 %v6358_v7 }
 0x7a9   :  { %v5885_v25 = vpop.f32.mrf.mxu0 }
 0x7aa   :  { %v6955_v35 = vadd.f32 %v5885_v25, %v4948_v27 }
 0x7ab   :  { %v1373_v28 = vpop.f32.mrf.mxu0 }
 0x7ac   :  { %v6937_v29 = vadd.f32 %v4948_v27, %v1373_v28 }
 0x7ad   :  { %v5886_v32 = vpop.f32.mrf.mxu0 }
 0x7ae   :  { %1702 = vrot.lane.b32.xlu0 %v6937_v29, %s6362_s0  ;;  %5902 = vmatmul.mubr.msk.f32.vlgmr.msra.gmra.mxu0 %vm162_vm2, %v6937_v29 }
 0x7af   :  { %v1376_v31 = vpop.f32.mrf.mxu0  ;;  %5904 = vmatprep.mubr.msk.f32.mxu0 %vm6359_vm1, %v6358_v7  ;;  %5926 = vmatpush3.xpose.msk.msra.mxu0 %vm162_vm2, %v1713_v30 }
 0x7b0   :  { %v6946_v33 = vadd.f32 %v4948_v27, %v1376_v31  ;;  %5927 = vmatprep.subr.mxu0 %v6358_v7 }
 0x7b2   :  { %1946 = vrot.lane.b32.xlu1 %v6946_v33, %s6364_s20  ;;  %1704 = vrot.lane.b32.xlu0 %v6946_v33, %s6362_s0 }
 0x7b3   :  { %5905 = vmatmul.mubr.msk.f32.gmra.mxu0 %vm162_vm2, %v6946_v33 }
 0x7b4   :  { %5907 = vmatprep.mubr.msk.f32.mxu0 %vm6359_vm1, %v6358_v7  ;;  %5928 = vmatpush3.xpose.msk.msra.mxu0 %vm162_vm2, %v1711_v34 }
 0x7b5   :  { %5929 = vmatprep.subr.mxu0 %v6358_v7 }
 0x7b6   :  { %1607 = vrot.lane.b32.xlu1 %v6907_v19, %s6360_s29  ;;  %1706 = vrot.lane.b32.xlu0 %v6955_v35, %s6362_s0 }
 0x7b7   :  { %5908 = vmatmul.mubr.msk.f32.gmra.mxu0 %vm162_vm2, %v6955_v35 }
 0x7b8   :  { %5930 = vmatpush3.xpose.msk.msra.mxu0 %vm162_vm2, %v1709_v36  ;;  %5931 = vmatprep.mubr.msk.f32.mxu0 %vm6359_vm1, %v6358_v7 }
 0x7b9   :  { %5955 = vmatprep.subr.mxu0 %v6358_v7 }
 0x7ba   :  { %1603 = vrot.lane.b32.xlu1 %v6916_v21, %s6360_s29  ;;  %1944 = vrot.lane.b32.xlu0 %v6937_v29, %s6364_s20 }
 0x7be   :  { %1849 = vrot.lane.b32.xlu1 %v6907_v19, %s6361_s4  ;;  %1948 = vrot.lane.b32.xlu0 %v6955_v35, %s6364_s20 }
 0x7c2   :  { %1845 = vrot.lane.b32.xlu1 %v6916_v21, %s6361_s4  ;;  %1605 = vrot.lane.b32.xlu0 %v6914_v24, %s6360_s29  ;;  %s4885_s29 = sshll.u32 %s6375_s8, 4  ;;  %s4886_s29 = int_to_ptr.vmem [resolvable:$true] %s4885_s29 }
 0x7c3   :  { %p6341_p1 = scmp.lt.s32.totalorder %s4886_s29, %s4886_s29 }
 0x7c6   :  { %2196 = vrot.lane.b32.xlu1 %v6907_v19, %s6366_s1  ;;  %1847 = vrot.lane.b32.xlu0 %v6914_v24, %s6361_s4 }
 0x7ca   :  { %2089 = vrot.lane.b32.xlu1 %v6914_v24, %s6363_s30  ;;  %2091 = vrot.lane.b32.xlu0 %v6907_v19, %s6363_s30 }
 0x820   :  { %v1703_v40 = vpop.permute.xlu0 %1702 }
 0x821   :  { %5932 = vmatmul.mubr.msk.f32.vlgmr.msra.gmra.mxu0 %vm162_vm2, %v1703_v40 }
 0x822   :  { %5956 = vmatpush3.xpose.msk.msra.mxu0 %vm162_vm2, %v1955_v37  ;;  %5934 = vmatprep.mubr.msk.f32.mxu0 %vm6359_vm1, %v6358_v7 }
 0x823   :  { %5957 = vmatprep.subr.mxu0 %v6358_v7 }
 0x824   :  { %v1705_v42 = vpop.permute.xlu0 %1704  ;;  %v1947_v47 = vpop.permute.xlu1 %1946 }
 0x825   :  { %5935 = vmatmul.mubr.msk.f32.gmra.mxu0 %vm162_vm2, %v1705_v42 }
 0x826   :  { %5958 = vmatpush3.xpose.msk.msra.mxu0 %vm162_vm2, %v1953_v38  ;;  %5937 = vmatprep.mubr.msk.f32.mxu0 %vm6359_vm1, %v6358_v7 }
 0x827   :  { %5959 = vmatprep.subr.mxu0 %v6358_v7 }
 0x828   :  { %v1707_v48 = vpop.permute.xlu0 %1706  ;;  %v1608_v10 = vpop.permute.xlu1 %1607 }
 0x829   :  { %5911 = vmatpush3.msk.msra.mxu1 %vm313_vm3, %v1608_v10  ;;  %5938 = vmatmul.mubr.msk.f32.gmra.mxu0 %vm162_vm2, %v1707_v48 }
 0x82a   :  { %5960 = vmatpush3.xpose.msk.msra.mxu0 %vm162_vm2, %v1951_v39  ;;  %5961 = vmatprep.mubr.msk.f32.mxu0 %vm6359_vm1, %v6358_v7 }
 0x82b   :  { %5912 = vmatprep.subr.mxu1 %v6358_v7  ;;  %5985 = vmatprep.subr.mxu0 %v6358_v7 }
 0x82c   :  { %v1945_v49 = vpop.permute.xlu0 %1944  ;;  %v1604_v51 = vpop.permute.xlu1 %1603 }
 0x82d   :  { %5962 = vmatmul.mubr.msk.f32.vlgmr.msra.gmra.mxu0 %vm162_vm2, %v1945_v49 }
 0x82e   :  { %5964 = vmatprep.mubr.msk.f32.mxu0 %vm6359_vm1, %v6358_v7 }
 0x830   :  { %v1949_v26 = vpop.permute.xlu0 %1948  ;;  %v7011_v15 = vpop.permute.xlu1 %1849 }
 0x831   :  { %5965 = vmatmul.mubr.msk.f32.gmra.mxu0 %vm162_vm2, %v1947_v47 }
 0x832   :  { %5967 = vmatprep.mubr.msk.f32.mxu0 %vm6359_vm1, %v6358_v7 }
 0x834   :  { %v1606_v52 = vpop.permute.xlu0 %1605  ;;  %v7016_v53 = vpop.permute.xlu1 %1845 }
 0x835   :  { %5913 = vmatpush3.msra.mxu1 %v1606_v52  ;;  %5968 = vmatmul.mubr.msk.f32.gmra.mxu0 %vm162_vm2, %v1949_v26 }
 0x836   :  { %5914 = vmatprep.subr.mxu1 %v6358_v7  ;;  %5991 = vmatprep.mubr.msk.f32.mxu0 %vm6359_vm1, %v6358_v7 }
 0x837   :  { %5915 = vmatpush3.msra.mxu1 %v1604_v51 }
 0x838   :  { %v7022_v54 = vpop.permute.xlu1 %2196  ;;  %5940 = vmatprep.subr.mxu1 %v6358_v7  ;;  %v7070_v51 = vpop.permute.xlu0 %1847 }
 0x839   :  { %5986 = vmatpush3.xpose.msk.msra.mxu0 %vm162_vm2, %v7022_v54 }
 0x83a   :  { %5987 = vmatprep.subr.mxu0 %v6358_v7 }
 0x83c   :  { %v7074_v26 = vpop.permute.xlu0 %2091  ;;  %v7076_v52 = vpop.permute.xlu1 %2089 }
 0x86e   :  { %v1550_v55 = vpop.f32.mrf.mxu0 }
 0x86f   :  { %v1564_v57 = vmul.f32 0.35355338, %v1550_v55 }
 0x870   :  { %v5903_v41 = vpop.f32.mrf.mxu0 }
 0x871   :  { %v7034_v59 = vadd.f32 %v7031_v58, %v1564_v57 }
 0x873   :  { %v1555_v60 = vpop.f32.mrf.mxu0  ;;  %v1570_v12 = vsel %vm261_vm4, %v7034_v59, -inf }
 0x874   :  { %v1565_v62 = vmul.f32 0.35355338, %v1555_v60  ;;  %1571 = vmax.xlane.f32.xlu1 %v1570_v12 }
 0x875   :  { %v5906_v44 = vpop.f32.mrf.mxu0 }
 0x876   :  { %v1568_v63 = vadd.f32 %v7041_v43, %v1565_v62 }
 0x877   :  { %v1560_v45 = vpop.f32.mrf.mxu0 }
 0x878   :  { %v1566_v0 = vmul.f32 0.35355338, %v1560_v45  ;;  %v1573_v50 = vsel %vm261_vm4, %v1568_v63, -inf }
 0x879   :  { %1574 = vmax.xlane.f32.xlu0 %v1573_v50  ;;  %v5909_v46 = vpop.f32.mrf.mxu0 }
 0x87a   :  { %v1569_v56 = vadd.f32 %v7048_v1, %v1566_v0 }
 0x87c   :  { %v1576_v3 = vsel %vm268_vm5, %v1569_v56, -inf }
 0x87d   :  { %1577 = vmax.xlane.f32.xlu0 %v1576_v3 }
 0x8e1   :  { %v1792_v4 = vpop.f32.mrf.mxu0 }
 0x8e2   :  { %v1806_v61 = vmul.f32 0.35355338, %v1792_v4 }
 0x8e3   :  { %v5933_v5 = vpop.f32.mrf.mxu0 }
 0x8e4   :  { %v1809_v2 = vadd.f32 %v7031_v58, %v1806_v61 }
 0x8e5   :  { %v1797_v6 = vpop.f32.mrf.mxu0 }
 0x8e6   :  { %v1807_v13 = vmul.f32 0.35355338, %v1797_v6  ;;  %v1812_v8 = vsel %vm261_vm4, %v1809_v2, -inf }
 0x8e7   :  { %1813 = vmax.xlane.f32.xlu1 %v1812_v8  ;;  %v5936_v17 = vpop.f32.mrf.mxu0 }
 0x8e8   :  { %v1810_v18 = vadd.f32 %v7041_v43, %v1807_v13 }
 0x8e9   :  { %v1802_v16 = vpop.f32.mrf.mxu0 }
 0x8ea   :  { %v1808_v20 = vmul.f32 0.35355338, %v1802_v16  ;;  %v1815_v22 = vsel %vm261_vm4, %v1810_v18, -inf }
 0x8eb   :  { %1816 = vmax.xlane.f32.xlu0 %v1815_v22  ;;  %v5939_v23 = vpop.f32.mrf.mxu0 }
 0x8ec   :  { %v1811_v25 = vadd.f32 %v7048_v1, %v1808_v20 }
 0x8ed   :  { %v2034_v27 = vpop.f32.mrf.mxu0 }
 0x8ee   :  { %v2048_v28 = vmul.f32 0.35355338, %v2034_v27  ;;  %v1818_v30 = vsel %vm268_vm5, %v1811_v25, -inf }
 0x8ef   :  { %1819 = vmax.xlane.f32.xlu1 %v1818_v30  ;;  %v5963_v32 = vpop.f32.mrf.mxu0 }
 0x8f0   :  { %v2051_v31 = vadd.f32 %v7031_v58, %v2048_v28 }
 0x8f1   :  { %v2039_v34 = vpop.f32.mrf.mxu0 }
 0x8f2   :  { %v2049_v36 = vmul.f32 0.35355338, %v2039_v34  ;;  %v2054_v37 = vsel %vm261_vm4, %v2051_v31, -inf }
 0x8f3   :  { %2055 = vmax.xlane.f32.xlu0 %v2054_v37  ;;  %v5966_v38 = vpop.f32.mrf.mxu0 }
 0x8f4   :  { %v7061_v39 = vadd.f32 %v7041_v43, %v2049_v36 }
 0x8f5   :  { %v2044_v40 = vpop.f32.mrf.mxu0 }
 0x8f6   :  { %v2050_v42 = vmul.f32 0.35355338, %v2044_v40  ;;  %v2057_v47 = vsel %vm261_vm4, %v7061_v39, -inf }
 0x8f7   :  { %2058 = vmax.xlane.f32.xlu1 %v2057_v47  ;;  %v5969_v48 = vpop.f32.mrf.mxu0 }
 0x8f8   :  { %v7066_v10 = vadd.f32 %v7048_v1, %v2050_v42 }
 0x8fa   :  { %v2060_v49 = vsel %vm268_vm5, %v7066_v10, -inf }
 0x8fb   :  { %2061 = vmax.xlane.f32.xlu0 %v2060_v49 }
 0x8fd   :  { %v1572_v57 = vpop.xlane.xlu1 %1571 }
 0x8fe   :  { %v1579_v41 = vsub.f32 %v7034_v59, %v1572_v57 }
 0x900   :  { %v1582_v62 = vmul.f32 1.442695, %v1579_v41 }
 0x902   :  { %v1575_v55 = vpop.xlane.xlu0 %1574  ;;  %6270 = vpow2.f32 %v1582_v62 }
 0x903   :  { %v1580_v12 = vsub.f32 %v1568_v63, %v1575_v55 }
 0x905   :  { %v1584_v45 = vmul.f32 1.442695, %v1580_v12 }
 0x906   :  { %v1578_v60 = vpop.xlane.xlu0 %1577 }
 0x907   :  { %v1581_v44 = vsub.f32 %v1569_v56, %v1578_v60  ;;  %6272 = vpow2.f32 %v1584_v45 }
 0x908   :  { %2087 = vrot.lane.b32.xlu1 %v6916_v21, %s6363_s30 }
 0x909   :  { %v1586_v0 = vmul.f32 1.442695, %v1581_v44 }
 0x90b   :  { %6274 = vpow2.f32 %v1586_v0 }
 0x90f   :  { %v7081_v50 = vpop.eup %6270 }
 0x910   :  { %v1588_v3 = vsel %vm261_vm4, %v7081_v50, 0.0 }
 0x911   :  { %2194 = vrot.lane.b32.xlu0 %v6914_v24, %s6366_s1 }
 0x914   :  { %v7083_v46 = vpop.eup %6272 }
 0x915   :  { %v1591_v59 = vsel %vm261_vm4, %v7083_v46, 0.0 }
 0x918   :  { %v7087_v4 = vpop.eup %6274 }
 0x919   :  { %v1594_v63 = vsel %vm268_vm5, %v7087_v4, 0.0 }
 0x92c   :  { %1589 = vadd.xlane.f32.xlu1 %v1588_v3 }
 0x930   :  { %1592 = vadd.xlane.f32.xlu0 %v1591_v59  ;;  %1595 = vadd.xlane.f32.xlu1 %v1594_v63 }
 0x970   :  { %v1814_v56 = vpop.xlane.xlu1 %1813 }
 0x971   :  { %v1821_v61 = vsub.f32 %v1809_v2, %v1814_v56 }
 0x973   :  { %v1824_v5 = vmul.f32 1.442695, %v1821_v61 }
 0x974   :  { %v1817_v6 = vpop.xlane.xlu0 %1816 }
 0x975   :  { %6276 = vpow2.f32 %v1824_v5  ;;  %v1822_v13 = vsub.f32 %v1810_v18, %v1817_v6 }
 0x977   :  { %v1826_v8 = vmul.f32 1.442695, %v1822_v13 }
 0x978   :  { %v1820_v17 = vpop.xlane.xlu1 %1819 }
 0x979   :  { %6278 = vpow2.f32 %v1826_v8  ;;  %v1823_v16 = vsub.f32 %v1811_v25, %v1820_v17 }
 0x97b   :  { %v1828_v20 = vmul.f32 1.442695, %v1823_v16 }
 0x97c   :  { %v2056_v22 = vpop.xlane.xlu0 %2055 }
 0x97d   :  { %6280 = vpow2.f32 %v1828_v20  ;;  %v2063_v23 = vsub.f32 %v2051_v31, %v2056_v22 }
 0x97f   :  { %v2066_v27 = vmul.f32 1.442695, %v2063_v23 }
 0x980   :  { %v2059_v38 = vpop.xlane.xlu1 %2058 }
 0x981   :  { %6282 = vpow2.f32 %v2066_v27  ;;  %v2064_v40 = vsub.f32 %v7061_v39, %v2059_v38 }
 0x982   :  { %v7093_v28 = vpop.eup %6276 }
 0x983   :  { %v1830_v30 = vsel %vm261_vm4, %v7093_v28, 0.0  ;;  %v2068_v42 = vmul.f32 1.442695, %v2064_v40 }
 0x984   :  { %v2062_v2 = vpop.xlane.xlu0 %2061  ;;  %1831 = vadd.xlane.f32.xlu0 %v1830_v30  ;;  %v2088_v49 = vpop.permute.xlu1 %2087 }
 0x985   :  { %6284 = vpow2.f32 %v2068_v42  ;;  %v2065_v47 = vsub.f32 %v7066_v10, %v2062_v2 }
 0x986   :  { %v7097_v32 = vpop.eup %6278 }
 0x987   :  { %v1833_v18 = vsel %vm261_vm4, %v7097_v32, 0.0  ;;  %v2070_v48 = vmul.f32 1.442695, %v2065_v47 }
 0x988   :  { %v7101_v34 = vpop.permute.xlu0 %2194  ;;  %1834 = vadd.xlane.f32.xlu1 %v1833_v18 }
 0x989   :  { %5988 = vmatpush3.xpose.msk.msra.mxu0 %vm162_vm2, %v7101_v34  ;;  %6286 = vpow2.f32 %v2070_v48 }
 0x98a   :  { %v7105_v25 = vpop.eup %6280  ;;  %5989 = vmatprep.subr.mxu0 %v6358_v7 }
 0x98b   :  { %v1836_v31 = vsel %vm268_vm5, %v7105_v25, 0.0 }
 0x98c   :  { %1837 = vadd.xlane.f32.xlu0 %v1836_v31 }
 0x98e   :  { %v7110_v36 = vpop.eup %6282 }
 0x98f   :  { %v2072_v37 = vsel %vm261_vm4, %v7110_v36, 0.0 }
 0x990   :  { %2073 = vadd.xlane.f32.xlu0 %v2072_v37 }
 0x992   :  { %v7120_v57 = vpop.eup %6284 }
 0x996   :  { %v7124_v39 = vpop.eup %6286 }
 0x997   :  { %v2078_v10 = vsel %vm268_vm5, %v7124_v39, 0.0 }
 0x999   :  { %2186 = vrot.lane.b32.xlu1 %v6937_v29, %s6366_s1  ;;  %v2075_v29 = vsel %vm261_vm4, %v7120_v57, 0.0 }
 0x9a6   :  { %2192 = vrot.lane.b32.xlu0 %v6916_v21, %s6366_s1 }
 0x9b5   :  { %v1590_v55 = vpop.xlane.xlu1 %1589 }
 0x9b6   :  { %6288 = vrcp.f32 %v1590_v55 }
 0x9b9   :  { %v1593_v41 = vpop.xlane.xlu0 %1592  ;;  %v1596_v60 = vpop.xlane.xlu1 %1595 }
 0x9ba   :  { %6290 = vrcp.f32 %v1593_v41 }
 0x9bb   :  { %6292 = vrcp.f32 %v1596_v60 }
 0x9bd   :  { %2076 = vadd.xlane.f32.xlu1 %v2075_v29 }
 0x9c3   :  { %v6289_v12 = vpop.eup %6288 }
 0x9c4   :  { %v1600_v62 = vmul.f32 %v6289_v12, %v7081_v50 }
 0x9c5   :  { %2079 = vadd.xlane.f32.xlu0 %v2078_v10 }
 0x9c6   :  { %5917 = vmatmul.mubr.msk.f32.vlgmr.msra.gmra.mxu1 %vm261_vm4, %v1600_v62 }
 0x9c7   :  { %v6291_v44 = vpop.eup %6290  ;;  %5941 = vmatpush3.msk.msra.mxu1 %vm313_vm3, %v7011_v15  ;;  %5919 = vmatprep.mubr.msk.f32.mxu1 %vm6359_vm1, %v6358_v7 }
 0x9c8   :  { %5942 = vmatprep.subr.mxu1 %v6358_v7  ;;  %v1601_v45 = vmul.f32 %v6291_v44, %v7083_v46  ;;  %v6293_v0 = vpop.eup %6292 }
 0x9c9   :  { %5943 = vmatpush3.msra.mxu1 %v7070_v51  ;;  %v1602_v15 = vmul.f32 %v6293_v0, %v7087_v4 }
 0x9ca   :  { %5944 = vmatprep.subr.mxu1 %v6358_v7  ;;  %5920 = vmatmul.mubr.msk.f32.gmra.mxu1 %vm261_vm4, %v1601_v45 }
 0x9cb   :  { %5945 = vmatpush3.msra.mxu1 %v7016_v53  ;;  %5922 = vmatprep.mubr.msk.f32.mxu1 %vm6359_vm1, %v6358_v7 }
 0x9cc   :  { %5970 = vmatprep.subr.mxu1 %v6358_v7 }
 0x9ce   :  { %2190 = vrot.lane.b32.xlu1 %v6955_v35, %s6366_s1  ;;  %5923 = vmatmul.mubr.msk.f32.gmra.mxu1 %vm261_vm4, %v1602_v15 }
 0x9cf   :  { %5946 = vmatprep.mubr.msk.f32.mxu1 %vm6359_vm1, %v6358_v7 }
 0x9db   :  { %2188 = vrot.lane.b32.xlu0 %v6946_v33, %s6366_s1 }
 0xa0d   :  { %v1832_v51 = vpop.xlane.xlu0 %1831 }
 0xa0e   :  { %6294 = vrcp.f32 %v1832_v51 }
 0xa11   :  { %v1835_v53 = vpop.xlane.xlu1 %1834 }
 0xa12   :  { %6296 = vrcp.f32 %v1835_v53 }
 0xa15   :  { %v1838_v50 = vpop.xlane.xlu0 %1837  ;;  %v2187_v33 = vpop.permute.xlu1 %2186 }
 0xa16   :  { %6298 = vrcp.f32 %v1838_v50 }
 0xa19   :  { %v2074_v46 = vpop.xlane.xlu0 %2073 }
 0xa1a   :  { %6300 = vrcp.f32 %v2074_v46 }
 0xa1b   :  { %v6295_v3 = vpop.eup %6294 }
 0xa1c   :  { %v1842_v4 = vmul.f32 %v6295_v3, %v7093_v28 }
 0xa1d   :  { %v2193_v35 = vpop.permute.xlu0 %2192 }
 0xa1e   :  { %5947 = vmatmul.mubr.msk.f32.vlgmr.msra.gmra.mxu1 %vm261_vm4, %v1842_v4  ;;  %5990 = vmatpush3.xpose.msk.msra.mxu0 %vm162_vm2, %v2193_v35 }
 0xa1f   :  { %v6297_v59 = vpop.eup %6296  ;;  %5971 = vmatpush3.msk.msra.mxu1 %vm313_vm3, %v7074_v26  ;;  %5949 = vmatprep.mubr.msk.f32.mxu1 %vm6359_vm1, %v6358_v7 }
 0xa20   :  { %5972 = vmatprep.subr.mxu1 %v6358_v7  ;;  %v1843_v63 = vmul.f32 %v6297_v59, %v7097_v32 }
 0xa21   :  { %5973 = vmatpush3.msra.mxu1 %v7076_v52  ;;  %5992 = vmatmul.mubr.msk.f32.vlgmr.msra.gmra.mxu0 %vm162_vm2, %v2187_v33 }
 0xa22   :  { %5974 = vmatprep.subr.mxu1 %v6358_v7  ;;  %5950 = vmatmul.mubr.msk.f32.gmra.mxu1 %vm261_vm4, %v1843_v63 }
 0xa23   :  { %v6299_v56 = vpop.eup %6298  ;;  %5975 = vmatpush3.msra.mxu1 %v2088_v49  ;;  %5952 = vmatprep.mubr.msk.f32.mxu1 %vm6359_vm1, %v6358_v7 }
 0xa24   :  { %v1844_v26 = vmul.f32 %v6299_v56, %v7105_v25  ;;  %6023 = vmatprep.subr.mxu1 %v6358_v7  ;;  %5994 = vmatprep.mubr.msk.f32.mxu0 %vm6359_vm1, %v6358_v7 }
 0xa26   :  { %5953 = vmatmul.mubr.msk.f32.gmra.mxu1 %vm261_vm4, %v1844_v26 }
 0xa27   :  { %v6301_v52 = vpop.eup %6300  ;;  %5976 = vmatprep.mubr.msk.f32.mxu1 %vm6359_vm1, %v6358_v7 }
 0xa28   :  { %v2084_v61 = vmul.f32 %v6301_v52, %v7110_v36 }
 0xa2a   :  { %5977 = vmatmul.mubr.msk.f32.vlgmr.msra.gmra.mxu1 %vm261_vm4, %v2084_v61 }
 0xa2b   :  { %6026 = vmatpush3.xpose.msk.msra.mxu1 %vm162_vm2, %v7022_v54  ;;  %5979 = vmatprep.mubr.msk.f32.mxu1 %vm6359_vm1, %v6358_v7 }
 0xa2c   :  { %6024 = vmatprep.subr.mxu1 %v6358_v7 }
 0xa2f   :  { %6027 = vmatpush3.xpose.msk.msra.mxu1 %vm162_vm2, %v7101_v34 }
 0xa30   :  { %6025 = vmatprep.subr.mxu1 %v6358_v7 }
 0xa33   :  { %6028 = vmatpush3.xpose.msk.msra.mxu1 %vm162_vm2, %v2193_v35 }
 0xa34   :  { %6000 = vmatprep.subr.mxu1 %v6358_v7 }
 0xa46   :  { %v2077_v5 = vpop.xlane.xlu1 %2076 }
 0xa47   :  { %6302 = vrcp.f32 %v2077_v5 }
 0xa4a   :  { %v2191_v20 = vpop.permute.xlu1 %2190 }
 0xa4e   :  { %v2080_v6 = vpop.xlane.xlu0 %2079 }
 0xa4f   :  { %6304 = vrcp.f32 %v2080_v6 }
 0xa52   :  { %v2189_v13 = vpop.permute.xlu0 %2188 }
 0xa53   :  { %5995 = vmatmul.mubr.msk.f32.gmra.mxu0 %vm162_vm2, %v2189_v13 }
 0xa54   :  { %v6303_v54 = vpop.eup %6302 }
 0xa55   :  { %v2085_v8 = vmul.f32 %v6303_v54, %v7120_v57 }
 0xa57   :  { %5980 = vmatmul.mubr.msk.f32.gmra.mxu1 %vm261_vm4, %v2085_v8 }
 0xa58   :  { %5982 = vmatprep.mubr.msk.f32.mxu1 %vm6359_vm1, %v6358_v7 }
 0xa5c   :  { %v6305_v17 = vpop.eup %6304 }
 0xa5d   :  { %v2086_v16 = vmul.f32 %v6305_v17, %v7124_v39 }
 0xa5f   :  { %5983 = vmatmul.mubr.msk.f32.gmra.mxu1 %vm261_vm4, %v2086_v16 }
 0xa60   :  { %5997 = vmatprep.mubr.msk.f32.mxu1 %vm6359_vm1, %v6358_v7 }
 0xa63   :  { %5998 = vmatmul.mubr.msk.f32.vlgmr.msra.gmra.mxu1 %vm162_vm2, %v2191_v20 }
 0xa64   :  { %6006 = vmatprep.mubr.msk.f32.mxu1 %vm6359_vm1, %v6358_v7 }
 0xa86   :  { %v7197_v22 = vpop.f32.mrf.mxu1 }
 0xa88   :  { %v5918_v23 = vpop.f32.mrf.mxu1 }
 0xa8a   :  { %v7199_v27 = vpop.f32.mrf.mxu1 }
 0xa8c   :  { %v5921_v28 = vpop.f32.mrf.mxu1 }
 0xa8e   :  { %v7201_v30 = vpop.f32.mrf.mxu1 }
 0xa90   :  { %v5924_v2 = vpop.f32.mrf.mxu1 }
 0xa91   :  { %v6086_v2 = vld [vmem:[%s7993_s11 + $0x8] sm:$0xff]  }
 0xa92   :  { %6015 = vmatprep.subr.bf16.mxu0 %v6086_v2 }
 0xa93   :  { %6016 = vmatpush3.bf16.msra.mxu0 %v6086_v2 }
 0xade   :  { %v1930_v32 = vpop.f32.mrf.mxu1 }
 0xae0   :  { %v5948_v18 = vpop.f32.mrf.mxu1 }
 0xae1   :  { %v2276_v34 = vpop.f32.mrf.mxu0 }
 0xae2   :  { %v2290_v25 = vmul.f32 0.35355338, %v2276_v34  ;;  %v1935_v31 = vpop.f32.mrf.mxu1 }
 0xae3   :  { %v6063_v36 = vpack.i.bf16 %v1935_v31, %v1930_v32  ;;  %v5993_v37 = vpop.f32.mrf.mxu0  ;;  %v6087_v32 = vld [vmem:[%s7993_s11] sm:$0xff]  }
 0xae4   :  { %v2293_v38 = vadd.f32 %v7031_v58, %v2290_v25  ;;  %v5951_v40 = vpop.f32.mrf.mxu1  ;;  %6017 = vmatprep.subr.bf16.mxu0 %v6087_v32 }
 0xae5   :  { %6018 = vmatpush3.bf16.msra.mxu0 %v6087_v32  ;;  %v2619_v32 = vld [vmem:[%s7997_s15 + $0xc8] sm:$0xff] }
 0xae6   :  { %v1940_v42 = vpop.f32.mrf.mxu1  ;;  %v2296_v47 = vsel %vm261_vm4, %v2293_v38, -inf }
 0xae7   :  { %2297 = vmax.xlane.f32.xlu0 %v2296_v47 }
 0xae8   :  { %v5954_v48 = vpop.f32.mrf.mxu1 }
 0xaea   :  { %v2172_v49 = vpop.f32.mrf.mxu1 }
 0xaec   :  { %v5978_v55 = vpop.f32.mrf.mxu1 }
 0xb13   :  { %v2281_v57 = vpop.f32.mrf.mxu0 }
 0xb14   :  { %v2291_v41 = vmul.f32 0.35355338, %v2281_v57 }
 0xb15   :  { %v5996_v60 = vpop.f32.mrf.mxu0 }
 0xb16   :  { %v2294_v29 = vadd.f32 %v7041_v43, %v2291_v41 }
 0xb17   :  { %v2177_v39 = vpop.f32.mrf.mxu1 }
 0xb18   :  { %v6068_v12 = vpack.i.bf16 %v2177_v39, %v2172_v49  ;;  %v2299_v10 = vsel %vm261_vm4, %v2294_v29, -inf }
 0xb19   :  { %2300 = vmax.xlane.f32.xlu1 %v2299_v10  ;;  %v5981_v62 = vpop.f32.mrf.mxu1 }
 0xb1f   :  { %v2182_v58 = vpop.f32.mrf.mxu1 }
 0xb21   :  { %v5984_v44 = vpop.f32.mrf.mxu1 }
 0xb23   :  { %v2286_v45 = vpop.f32.mrf.mxu1 }
 0xb24   :  { %v2292_v0 = vmul.f32 0.35355338, %v2286_v45 }
 0xb25   :  { %v5999_v15 = vpop.f32.mrf.mxu1 }
 0xb26   :  { %v2295_v51 = vadd.f32 %v7048_v1, %v2292_v0 }
 0xb28   :  { %v2302_v53 = vsel %vm268_vm5, %v2295_v51, -inf }
 0xb29   :  { %2303 = vmax.xlane.f32.xlu0 %v2302_v53 }
 0xb70   :  { %v2298_v50 = vpop.xlane.xlu0 %2297 }
 0xb71   :  { %v2305_v46 = vsub.f32 %v2293_v38, %v2298_v50 }
 0xb73   :  { %v2308_v3 = vmul.f32 1.442695, %v2305_v46 }
 0xb75   :  { %6306 = vpow2.f32 %v2308_v3 }
 0xb82   :  { %v6307_v43 = vpop.eup %6306 }
 0xb83   :  { %v2314_v4 = vsel %vm261_vm4, %v6307_v43, 0.0 }
 0xb84   :  { %2315 = vadd.xlane.f32.xlu0 %v2314_v4 }
 0xba2   :  { %v2301_v35 = vpop.xlane.xlu1 %2300 }
 0xba3   :  { %v2306_v59 = vsub.f32 %v2294_v29, %v2301_v35 }
 0xba5   :  { %v2310_v33 = vmul.f32 1.442695, %v2306_v59 }
 0xba7   :  { %6308 = vpow2.f32 %v2310_v33 }
 0xbb2   :  { %v2304_v63 = vpop.xlane.xlu0 %2303 }
 0xbb3   :  { %v2307_v56 = vsub.f32 %v2295_v51, %v2304_v63 }
 0xbb4   :  { %v6309_v26 = vpop.eup %6308 }
 0xbb5   :  { %v2312_v52 = vmul.f32 1.442695, %v2307_v56  ;;  %v2317_v1 = vsel %vm261_vm4, %v6309_v26, 0.0 }
 0xbb6   :  { %2318 = vadd.xlane.f32.xlu1 %v2317_v1 }
 0xbb7   :  { %6310 = vpow2.f32 %v2312_v52 }
 0xbc4   :  { %v6311_v61 = vpop.eup %6310 }
 0xbc5   :  { %v2320_v5 = vsel %vm268_vm5, %v6311_v61, 0.0 }
 0xbc6   :  { %2321 = vadd.xlane.f32.xlu0 %v2320_v5 }
 0xbc7   :  { %2333 = vrot.lane.b32.xlu1 %v6907_v19, %s6365_s21 }
 0xbcb   :  { %2329 = vrot.lane.b32.xlu1 %v6916_v21, %s6365_s21 }
 0xbcf   :  { %6064 = vrot.lane.b32.xlu1 %v6063_v36, %s6371_s25 }
 0xbd3   :  { %6069 = vrot.lane.b32.xlu1 %v6068_v12, %s6372_s26 }
 0xbdc   :  { %2331 = vrot.lane.b32.xlu0 %v6914_v24, %s6365_s21 }
 0xbe0   :  { %2435 = vrot.lane.b32.xlu0 %v1940_v42, %s6371_s25 }
 0xbe4   :  { %2447 = vrot.lane.b32.xlu0 %v2182_v58, %s6372_s26  ;;  %s8016_s26 = smov 24  }
 0xc0d   :  { %v2316_v13 = vpop.xlane.xlu0 %2315 }
 0xc0e   :  { %6312 = vrcp.f32 %v2316_v13 }
 0xc1b   :  { %v6313_v21 = vpop.eup %6312 }
 0xc1c   :  { %v2326_v24 = vmul.f32 %v6313_v21, %v6307_v43 }
 0xc3f   :  { %v2319_v6 = vpop.xlane.xlu1 %2318 }
 0xc40   :  { %6314 = vrcp.f32 %v2319_v6 }
 0xc43   :  { %v2334_v54 = vpop.permute.xlu1 %2333 }
 0xc44   :  { %6001 = vmatpush3.msk.msra.mxu1 %vm313_vm3, %v2334_v54 }
 0xc45   :  { %6002 = vmatprep.subr.mxu1 %v6358_v7 }
 0xc47   :  { %v2330_v17 = vpop.permute.xlu1 %2329 }
 0xc4b   :  { %v6065_v38 = vpop.permute.xlu1 %6064 }
 0xc4c   :  { %v6067_v47 = vunpack.i.h.bf16 %v6065_v38  ;;  %v6066_v48 = vunpack.i.l.bf16 %v6065_v38  ;;  %v2615_v38 = vld [vmem:[%s7997_s15 + $0x48] sm:$0xff] }
 0xc4d   :  { %v6315_v16 = vpop.eup %6314 }
 0xc4e   :  { %v2327_v20 = vmul.f32 %v6315_v16, %v6309_v26  ;;  %v2465_v60 = vsel %vm162_vm2, %v7199_v27, %v6067_v47  ;;  %v2464_v29 = vsel %vm162_vm2, %v7197_v22, %v6066_v48  ;;  %v6374_v48 = vmov 0  }
 0xc4f   :  { %v2322_v19 = vpop.xlane.xlu0 %2321  ;;  %v6070_v42 = vpop.permute.xlu1 %6069 }
 0xc50   :  { %6316 = vrcp.f32 %v2322_v19  ;;  %v6072_v49 = vunpack.i.h.bf16 %v6070_v42  ;;  %v6071_v55 = vunpack.i.l.bf16 %v6070_v42 }
 0xc52   :  { %v2467_v10 = vsel %vm1161_vm6, %v2464_v29, %v6071_v55  ;;  %v2468_v62 = vsel %vm1161_vm6, %v2465_v60, %v6072_v49  ;;  %v5021_v49 = vld [vmem:[%s7997_s15 + $0x90] sm:$0xff]  ;;  %v5024_v29 = vld [vmem:[%s7997_s15 + $0xd8] sm:$0xff] }
 0xc53   :  { %v2332_v8 = vpop.permute.xlu0 %2331  ;;  %v5023_v55 = vld [vmem:[%s7997_s15 + $0xd0] sm:$0xff] }
 0xc54   :  { %6003 = vmatpush3.msra.mxu1 %v2332_v8  ;;  %v5095_v60 = vcombine.high %v5021_v49, %v5023_v55 }
 0xc55   :  { %6004 = vmatprep.subr.mxu1 %v6358_v7 }
 0xc56   :  { %6005 = vmatpush3.msra.mxu1 %v2330_v17 }
 0xc57   :  { %6007 = vmatmul.mubr.msk.f32.vlgmr.msra.gmra.mxu1 %vm261_vm4, %v2326_v24  ;;  %v2436_v40 = vpop.permute.xlu0 %2435 }
 0xc58   :  { %6009 = vmatprep.mubr.msk.f32.mxu1 %vm6359_vm1, %v6358_v7  ;;  %v2466_v58 = vsel %vm162_vm2, %v7201_v30, %v2436_v40  ;;  %v4998_v30 = vld [vmem:[%s7994_s12] ss:$0 sm:$0xff] }
 0xc5b   :  { %6010 = vmatmul.mubr.msk.f32.gmra.mxu1 %vm261_vm4, %v2327_v20  ;;  %v2448_v57 = vpop.permute.xlu0 %2447  ;;  %v2616_v20 = vld [vmem:[%s7997_s15 + $0x80] sm:$0xff] }
 0xc5c   :  { %6012 = vmatprep.mubr.msk.f32.mxu1 %vm6359_vm1, %v6358_v7  ;;  %v2469_v44 = vsel %vm1161_vm6, %v2466_v58, %v2448_v57  ;;  %v5022_v57 = vld [vmem:[%s7997_s15 + $0x98] sm:$0xff] }
 0xc5d   :  { %v6317_v23 = vpop.eup %6316 }
 0xc5e   :  { %v2328_v28 = vmul.f32 %v6317_v23, %v6311_v61  ;;  %v2618_v23 = vld [vmem:[%s7997_s15 + $0xc0] sm:$0xff] }
 0xc5f   :  { %v5010_v2 = vcombine.high %v2616_v20, %v2618_v23 }
 0xc60   :  { %6013 = vmatmul.mubr.msk.f32.gmra.mxu1 %vm261_vm4, %v2328_v28  ;;  %v2617_v28 = vld [vmem:[%s7997_s15 + $0x88] sm:$0xff] }
 0xc61   :  { %2764 = vmatprep.subr.bf16.mxu1 %v5010_v2  ;;  %2784 = vmatprep.mubr.bf16.mxu1 %v6374_v48  ;;  %v6097_v2 = vld [vmem:[%s7999_s17 + $0x1e8] sm:$0xff]  }
 0xd17   :  { %v2414_v18 = vpop.f32.mrf.mxu1 }
 0xd19   :  { %v6008_v34 = vpop.f32.mrf.mxu1 }
 0xd1a   :  { %v5011_v34 = vcombine.low %v2617_v28, %v2619_v32 }
 0xd1b   :  { %v2419_v25 = vpop.f32.mrf.mxu1 }
 0xd1c   :  { %v6073_v7 = vpack.i.bf16 %v2419_v25, %v2414_v18  ;;  %v5009_v18 = vcombine.low %v2616_v20, %v2618_v23  ;;  %v5012_v25 = vcombine.high %v2617_v28, %v2619_v32  ;;  %v6094_v20 = vld [vmem:[%s7999_s17 + $0x130] sm:$0xff]   ;;  %v6096_v28 = vld [vmem:[%s7999_s17 + $0x168] sm:$0xff]  }
 0xd1d   :  { %v6011_v31 = vpop.f32.mrf.mxu1  ;;  %v6095_v23 = vld [vmem:[%s7999_s17 + $0x1b0] sm:$0xff]   ;;  %v6098_v32 = vld [vmem:[%s7999_s17 + $0x128] sm:$0xff]  }
 0xd1e   :  { %6074 = vrot.lane.b32.xlu1 %v6073_v7, %s8016_s26  ;;  %2765 = vmatpush1.bf16.msra.mxu1 %v5009_v18  ;;  %v2612_v7 = vld [vmem:[%s7997_s15] sm:$0xff]  ;;  %v6099_v18 = vld [vmem:[%s7999_s17 + $0x1a8] sm:$0xff]  }
 0xd1f   :  { %2815 = vmatprep.subr.bf16.mxu0 %v5012_v25  ;;  %v2614_v31 = vld [vmem:[%s7997_s15 + $0x40] sm:$0xff] }
 0xd20   :  { %v2424_v36 = vpop.f32.mrf.mxu1  ;;  %v5005_v40 = vcombine.low %v2612_v7, %v2614_v31  ;;  %v6101_v25 = vld [vmem:[%s7999_s17 + $0x1e0] sm:$0xff]  }
 0xd21   :  { %2459 = vrot.lane.b32.xlu0 %v2424_v36, %s8016_s26  ;;  %v2613_v36 = vld [vmem:[%s7997_s15 + $0x8] sm:$0xff] }
 0xd22   :  { %v6014_v37 = vpop.f32.mrf.mxu1  ;;  %v5007_v42 = vcombine.low %v2613_v36, %v2615_v38  ;;  %v5008_v47 = vcombine.high %v2613_v36, %v2615_v38  ;;  %v6104_v36 = vld [vmem:[%s7999_s17 + $0x158] sm:$0xff]  }
 0xd23   :  { %v5006_v37 = vcombine.high %v2612_v7, %v2614_v31  ;;  %v6102_v7 = vld [vmem:[%s7999_s17 + $0x120] sm:$0xff]   ;;  %v6106_v38 = vld [vmem:[%s7999_s17 + $0x118] sm:$0xff]  }
 0xd24   :  { %v6103_v31 = vld [vmem:[%s7999_s17 + $0x1a0] sm:$0xff]  }
 0xd25   :  { %2766 = vmatprep.subr.bf16.mxu1 %v5006_v37  ;;  %v6105_v37 = vld [vmem:[%s7999_s17 + $0x1d8] sm:$0xff]  }
 0xd26   :  { %2767 = vmatpush1.bf16.msra.mxu1 %v5005_v40  ;;  %v6107_v40 = vld [vmem:[%s7999_s17 + $0x198] sm:$0xff]  }
 0xd27   :  { %3023 = vmatprep.subr.bf16.mxu1 %v5095_v60  ;;  %v6114_v60 = vld [vmem:[%s7999_s17 + $0x108] sm:$0xff]  }
 0xd90   :  { %v6075_v41 = vpop.permute.xlu1 %6074 }
 0xd91   :  { %v6077_v39 = vunpack.i.h.bf16 %v6075_v41  ;;  %v6076_v12 = vunpack.i.l.bf16 %v6075_v41  ;;  %v5094_v41 = vcombine.low %v5021_v49, %v5023_v55  ;;  %v6110_v49 = vld [vmem:[%s7999_s17 + $0x110] sm:$0xff]  }
 0xd92   :  { %v6111_v55 = vld [vmem:[%s7999_s17 + $0x190] sm:$0xff]  }
 0xd93   :  { %v2470_v45 = vsel %vm1165_vm7, %v2467_v10, %v6076_v12  ;;  %v2471_v0 = vsel %vm1165_vm7, %v2468_v62, %v6077_v39  ;;  %v2460_v15 = vpop.permute.xlu0 %2459  ;;  %v5096_v39 = vcombine.low %v5022_v57, %v5024_v29  ;;  %v5097_v12 = vcombine.high %v5022_v57, %v5024_v29  ;;  %v6112_v57 = vld [vmem:[%s7999_s17 + $0x148] sm:$0xff]  }
 0xd94   :  { %v2473_v27 = vpack.c.bf16 %v2471_v0, %v2470_v45  ;;  %v2472_v51 = vsel %vm1165_vm7, %v2469_v44, %v2460_v15  ;;  %v6115_v29 = vld [vmem:[%s7999_s17 + $0x188] sm:$0xff]  }
 0xd95   :  { %v2474_v22 = vpack.c.bf16 %v2472_v51, %v2472_v51 }
 0xd96   :  { %6019 = vmatprep.mubr.msk.bf16.mxu0 %vm98_vm0, %v2473_v27 }
 0xd97   :  { %6020 = vmatmul.mubr.msk.bf16.vlgmr.msra.gmra.mxu0 %vm98_vm0, %v2474_v22 }
 0xd98   :  { %2816 = vmatpush1.bf16.msra.mxu0 %v5011_v34  ;;  %2835 = vmatprep.mubr.bf16.mxu0 %v6374_v48  ;;  %v6100_v34 = vld [vmem:[%s7999_s17 + $0x160] sm:$0xff]  }
 0xd99   :  { %2817 = vmatprep.subr.bf16.mxu0 %v5008_v47  ;;  %v6109_v47 = vld [vmem:[%s7999_s17 + $0x1d0] sm:$0xff]  }
 0xd9c   :  { %2818 = vmatpush1.bf16.msra.mxu0 %v5007_v42  ;;  %v6108_v42 = vld [vmem:[%s7999_s17 + $0x150] sm:$0xff]  }
 0xd9d   :  { %3074 = vmatprep.subr.bf16.mxu0 %v5097_v12  ;;  %v6117_v12 = vld [vmem:[%s7999_s17 + $0x1c0] sm:$0xff]  }
 0xe57   :  { %v6021_v53 = vpop.f32.mrf.mxu0 }
 0xe58   :  { %v2547_v35 = vadd.f32 %v6021_v53, %v4998_v30 }
 0xe59   :  { %v2538_v50 = vpop.f32.mrf.mxu0 }
 0xe5a   :  { %v2539_v46 = vadd.f32 %v4998_v30, %v2538_v50  ;;  %v2554_v56 = vadd.f32 %v2547_v35, %v6896_v14 }
 0xe5b   :  { %v6022_v3 = vpop.f32.mrf.mxu0 }
 0xe5c   :  { %v2552_v43 = vadd.f32 %v2539_v46, %v6890_v9  ;;  %v2561_v52 = vsel %vm1257_vm8, %v2554_v56, 0.0 }
 0xe5d   :  { %v2541_v4 = vpop.f32.mrf.mxu0 }
 0xe5e   :  { %v2542_v59 = vadd.f32 %v4998_v30, %v2541_v4  ;;  %v2555_v33 = vsel %vm98_vm0, %v2552_v43, 0.0  ;;  %v5003_v30 = vld [vmem:[%s7995_s13 + $0x1] ss:$0 sm:$0xff] }
 0xe5f   :  { %2556 = vadd.xlane.f32.xlu1 %v2555_v33 }
 0xe60   :  { %v2553_v63 = vadd.f32 %v2542_v59, %v6892_v11  ;;  %v5017_v59 = vld [vmem:[%s7997_s15 + $0x10] sm:$0xff] }
 0xe62   :  { %v2558_v26 = vsel %vm98_vm0, %v2553_v63, 0.0 }
 0xe63   :  { %2559 = vadd.xlane.f32.xlu0 %v2558_v26  ;;  %v5019_v26 = vld [vmem:[%s7997_s15 + $0x50] sm:$0xff] }
 0xe67   :  { %2562 = vadd.xlane.f32.xlu0 %v2561_v52  ;;  %v5018_v52 = vld [vmem:[%s7997_s15 + $0x18] sm:$0xff] }
 0xee8   :  { %v2557_v1 = vpop.xlane.xlu1 %2556 }
 0xee9   :  { %v2564_v61 = vmul.f32 0.03125, %v2557_v1  ;;  %v5020_v1 = vld [vmem:[%s7997_s15 + $0x58] sm:$0xff] }
 0xeeb   :  { %v7263_v5 = vsub.f32 %v2552_v43, %v2564_v61  ;;  %v5004_v43 = vld [vmem:[%s7996_s14 + $0x1] ss:$0 sm:$0xff] }
 0xeec   :  { %v2560_v9 = vpop.xlane.xlu0 %2559 }
 0xeed   :  { %v2565_v6 = vmul.f32 0.03125, %v2560_v9  ;;  %v2570_v13 = vmul.f32 %v7263_v5, %v7263_v5  ;;  %v5091_v9 = vcombine.high %v5017_v59, %v5019_v26 }
 0xeef   :  { %v7267_v54 = vsub.f32 %v2553_v63, %v2565_v6  ;;  %v2573_v11 = vsel %vm98_vm0, %v2570_v13, 0.0  ;;  %v5093_v6 = vcombine.high %v5018_v52, %v5020_v1  ;;  %v5090_v13 = vcombine.low %v5017_v59, %v5019_v26 }
 0xef0   :  { %v2563_v14 = vpop.xlane.xlu0 %2562  ;;  %2574 = vadd.xlane.f32.xlu1 %v2573_v11 }
 0xef1   :  { %v2566_v19 = vmul.f32 0.03125, %v2563_v14  ;;  %v2571_v21 = vmul.f32 %v7267_v54, %v7267_v54  ;;  %v6088_v14 = vld [vmem:[%s7999_s17 + $0x178] sm:$0xff]  }
 0xef3   :  { %v7272_v8 = vsub.f32 %v2554_v56, %v2566_v19  ;;  %v2576_v17 = vsel %vm98_vm0, %v2571_v21, 0.0  ;;  %v6089_v19 = vld [vmem:[%s7999_s17 + $0x1f8] sm:$0xff]  }
 0xef4   :  { %2577 = vadd.xlane.f32.xlu0 %v2576_v17  ;;  %v6091_v17 = vld [vmem:[%s7999_s17 + $0x1b8] sm:$0xff]  }
 0xef5   :  { %v2572_v24 = vmul.f32 %v7272_v8, %v7272_v8 }
 0xef7   :  { %v2579_v16 = vsel %vm1257_vm8, %v2572_v24, 0.0  ;;  %v6092_v24 = vld [vmem:[%s7999_s17 + $0x170] sm:$0xff]  }
 0xef8   :  { %2580 = vadd.xlane.f32.xlu1 %v2579_v16  ;;  %v6093_v16 = vld [vmem:[%s7999_s17 + $0x1f0] sm:$0xff]  }
 0xf79   :  { %v2575_v10 = vpop.xlane.xlu1 %2574 }
 0xf7a   :  { %v2582_v62 = vmul.f32 0.03125, %v2575_v10  ;;  %v6118_v10 = vld [vmem:[%s7999_s17 + $0x100] sm:$0xff]  }
 0xf7c   :  { %v2587_v58 = vadd.f32 1e-05, %v2582_v62  ;;  %v6119_v62 = vld [vmem:[%s7999_s17 + $0x180] sm:$0xff]  }
 0xf7d   :  { %v2578_v44 = vpop.xlane.xlu0 %2577 }
 0xf7e   :  { %6318 = vrsqrt.f32 %v2587_v58  ;;  %v2583_v45 = vmul.f32 0.03125, %v2578_v44  ;;  %v6120_v58 = vld [vmem:[%s7999_s17 + $0x78] sm:$0xff]  }
 0xf7f   :  { %v6121_v44 = vld [vmem:[%s7999_s17 + $0xf8] sm:$0xff]  }
 0xf80   :  { %v2588_v0 = vadd.f32 1e-05, %v2583_v45 }
 0xf81   :  { %v2581_v15 = vpop.xlane.xlu1 %2580 }
 0xf82   :  { %6320 = vrsqrt.f32 %v2588_v0  ;;  %v2584_v27 = vmul.f32 0.03125, %v2581_v15 }
 0xf84   :  { %v2589_v51 = vadd.f32 1e-05, %v2584_v27 }
 0xf86   :  { %6322 = vrsqrt.f32 %v2589_v51 }
 0xf8b   :  { %v6319_v22 = vpop.eup %6318 }
 0xf8c   :  { %v2593_v53 = vmul.f32 %v6319_v22, %v7263_v5 }
 0xf8e   :  { %v2600_v46 = vmul.f32 %v5003_v30, %v2593_v53 }
 0xf8f   :  { %v6321_v50 = vpop.eup %6320 }
 0xf90   :  { %v2594_v3 = vmul.f32 %v6321_v50, %v7267_v54  ;;  %v7327_v33 = vadd.f32 %v5004_v43, %v2600_v46  ;;  %v5092_v54 = vcombine.low %v5018_v52, %v5020_v1  ;;  %v2686_v50 = vlaneseq }
 0xf92   :  { %v2601_v4 = vmul.f32 %v5003_v30, %v2594_v3 }
 0xf93   :  { %v6323_v35 = vpop.eup %6322 }
 0xf94   :  { %v7329_v63 = vadd.f32 %v5004_v43, %v2601_v4  ;;  %v2595_v56 = vmul.f32 %v6323_v35, %v7272_v8  ;;  %v6090_v8 = vld [vmem:[%s7999_s17 + $0x138] sm:$0xff]   ;;  %v2687_v35 = vshrl.u32 %v2686_v50, 7 }
 0xf96   :  { %v7343_v61 = vpack.c.bf16 %v7329_v63, %v7327_v33  ;;  %v2602_v5 = vmul.f32 %v5003_v30, %v2595_v56  ;;  %v7499_v1 = vsub.s32 1, %v2687_v35 }
 0xf98   :  { %5013 = vmatmul.mubr.msk.bf16.vlgmr.msra.gmra.mxu1 %vm98_vm0, %v7343_v61  ;;  %5015 = vmatmul.mubr.msk.bf16.vlgmr.msra.gmra.mxu0 %vm98_vm0, %v7343_v61  ;;  %v7349_v11 = vadd.f32 %v5004_v43, %v2602_v5  ;;  %v7501_v5 = vsub.s32 3, %v2687_v35 }
 0xf99   :  { %3024 = vmatpush1.bf16.msra.mxu1 %v5094_v41  ;;  %3075 = vmatpush1.bf16.msra.mxu0 %v5096_v39  ;;  %v6113_v41 = vld [vmem:[%s7999_s17 + $0x1c8] sm:$0xff]   ;;  %v6116_v39 = vld [vmem:[%s7999_s17 + $0x140] sm:$0xff]  }
 0xf9a   :  { %2794 = vmatprep.mubr.bf16.mxu1 %v6374_v48  ;;  %2845 = vmatprep.mubr.bf16.mxu0 %v6374_v48  ;;  %v7361_v21 = vpack.c.bf16 %v7349_v11, %v7349_v11 }
 0xf9b   :  { %3025 = vmatprep.subr.bf16.mxu1 %v5091_v9  ;;  %3076 = vmatprep.subr.bf16.mxu0 %v5093_v6  ;;  %v5025_v9 = vld [vmem:[%s7998_s16 + $0x4] sm:$0xf]  ;;  %v7506_v6 = vsub.s32 0, %v2687_v35 }
 0xf9d   :  { %3026 = vmatpush1.bf16.msra.mxu1 %v5090_v13  ;;  %3077 = vmatpush1.bf16.msra.mxu0 %v5092_v54  ;;  %v7508_v13 = vsub.s32 2, %v2687_v35 }
 0xf9e   :  { %5519 = vmatprep.subr.bf16.mxu1 %v6088_v14  ;;  %5547 = vmatprep.subr.bf16.mxu0 %v6089_v19  ;;  %v2958_v19 = vrot.slane %v5025_v9, %v7499_v1 }
 0xfa0   :  { %5014 = vmatmul.mubr.msk.bf16.gmra.mxu1 %vm98_vm0, %v7361_v21  ;;  %5016 = vmatmul.mubr.msk.bf16.gmra.mxu0 %vm98_vm0, %v7361_v21 }
 0xfa1   :  { %3043 = vmatprep.mubr.bf16.mxu1 %v6374_v48  ;;  %3094 = vmatprep.mubr.bf16.mxu0 %v6374_v48 }
 0xfa8   :  { %5098 = vmatmul.mubr.msk.bf16.vlgmr.msra.gmra.mxu1 %vm98_vm0, %v7343_v61  ;;  %5100 = vmatmul.mubr.msk.bf16.vlgmr.msra.gmra.mxu0 %vm98_vm0, %v7343_v61 }
 0xfa9   :  { %3053 = vmatprep.mubr.bf16.mxu1 %v6374_v48  ;;  %3104 = vmatprep.mubr.bf16.mxu0 %v6374_v48 }
 0xfaa   :  { %5520 = vmatpush3.bf16.msra.mxu1 %v6090_v8  ;;  %5548 = vmatpush3.bf16.msra.mxu0 %v6091_v17  ;;  %v2966_v8 = vrot.slane %v5025_v9, %v7501_v5  ;;  %v2954_v17 = vrot.slane %v5025_v9, %v7506_v6 }
 0xfab   :  { %5521 = vmatprep.subr.bf16.mxu1 %v6092_v24  ;;  %5549 = vmatprep.subr.bf16.mxu0 %v6093_v16  ;;  %v2962_v24 = vrot.slane %v5025_v9, %v7508_v13 }
 0xfae   :  { %5522 = vmatpush3.bf16.msra.mxu1 %v6094_v20  ;;  %5550 = vmatpush3.bf16.msra.mxu0 %v6095_v23 }
 0xfaf   :  { %5523 = vmatprep.subr.bf16.mxu1 %v6096_v28  ;;  %5551 = vmatprep.subr.bf16.mxu0 %v6097_v2 }
 0xfb0   :  { %5099 = vmatmul.mubr.msk.bf16.gmra.mxu1 %vm98_vm0, %v7361_v21  ;;  %5101 = vmatmul.mubr.msk.bf16.gmra.mxu0 %vm98_vm0, %v7361_v21 }
 0xfb2   :  { %5524 = vmatpush3.bf16.msra.mxu1 %v6098_v32  ;;  %5552 = vmatpush3.bf16.msra.mxu0 %v6099_v18 }
 0xfb3   :  { %5525 = vmatprep.subr.bf16.mxu1 %v6100_v34  ;;  %5553 = vmatprep.subr.bf16.mxu0 %v6101_v25 }
 0xfb6   :  { %5526 = vmatpush3.bf16.msra.mxu1 %v6102_v7  ;;  %5554 = vmatpush3.bf16.msra.mxu0 %v6103_v31 }
 0xfb7   :  { %5527 = vmatprep.subr.bf16.mxu1 %v6104_v36  ;;  %5555 = vmatprep.subr.bf16.mxu0 %v6105_v37 }
 0xfba   :  { %5528 = vmatpush3.bf16.msra.mxu1 %v6106_v38  ;;  %5556 = vmatpush3.bf16.msra.mxu0 %v6107_v40 }
 0xfbb   :  { %5529 = vmatprep.subr.bf16.mxu1 %v6108_v42  ;;  %5557 = vmatprep.subr.bf16.mxu0 %v6109_v47 }
 0xfbe   :  { %5530 = vmatpush3.bf16.msra.mxu1 %v6110_v49  ;;  %5558 = vmatpush3.bf16.msra.mxu0 %v6111_v55  ;;  %v7517_v55 = vld [vmem:[%s7998_s16] sm:$0xf] }
 0xfbf   :  { %5531 = vmatprep.subr.bf16.mxu1 %v6112_v57  ;;  %5559 = vmatprep.subr.bf16.mxu0 %v6113_v41 }
 0xfc2   :  { %5532 = vmatpush3.bf16.msra.mxu1 %v6114_v60  ;;  %5560 = vmatpush3.bf16.msra.mxu0 %v6115_v29 }
 0xfc3   :  { %5533 = vmatprep.subr.bf16.mxu1 %v6116_v39  ;;  %5561 = vmatprep.subr.bf16.mxu0 %v6117_v12  ;;  %v7521_v39 = vrot.slane %v7517_v55, %v7499_v1  ;;  %v7525_v12 = vrot.slane %v7517_v55, %v7501_v5 }
 0xfc6   :  { %5534 = vmatpush3.bf16.msra.mxu1 %v6118_v10  ;;  %5562 = vmatpush3.bf16.msra.mxu0 %v6119_v62 }
 0xfc7   :  { %5575 = vmatprep.subr.bf16.mxu1 %v6120_v58  ;;  %5603 = vmatprep.subr.bf16.mxu0 %v6121_v44 }
0x1058   :  { %v7475_v45 = vpop.f32.mrf.mxu1  ;;  %v7477_v0 = vpop.f32.mrf.mxu0 }
0x105a   :  { %v7479_v15 = vpop.f32.mrf.mxu1  ;;  %v7481_v27 = vpop.f32.mrf.mxu0 }
0x105c   :  { %v7483_v51 = vpop.f32.mrf.mxu1  ;;  %v7485_v22 = vpop.f32.mrf.mxu0 }
0x105e   :  { %v7487_v53 = vpop.f32.mrf.mxu1  ;;  %v7489_v30 = vpop.f32.mrf.mxu0 }
0x1060   :  { %v7491_v46 = vpop.f32.mrf.mxu1  ;;  %v7493_v3 = vpop.f32.mrf.mxu0 }
0x1062   :  { %v7495_v43 = vpop.f32.mrf.mxu1  ;;  %v7497_v4 = vpop.f32.mrf.mxu0 }
0x1064   :  { %v2800_v59 = vpop.f32.mrf.mxu1  ;;  %v2851_v56 = vpop.f32.mrf.mxu0 }
0x1066   :  { %v2801_v26 = vpop.f32.mrf.mxu1  ;;  %v2852_v52 = vpop.f32.mrf.mxu0 }
0x1067   :  { %v6122_v26 = vld [vmem:[%s7999_s17 + $0x38] sm:$0xff]  }
0x1068   :  { %v3045_v54 = vpop.f32.mrf.mxu1  ;;  %v3096_v14 = vpop.f32.mrf.mxu0  ;;  %v6123_v52 = vld [vmem:[%s7999_s17 + $0xb8] sm:$0xff]  }
0x1069   :  { %v3046_v25 = vadd.f32 %v3045_v54, %v2954_v17  ;;  %v3097_v7 = vadd.f32 %v3096_v14, %v2962_v24 }
0x106a   :  { %v3047_v16 = vpop.f32.mrf.mxu1  ;;  %v3098_v20 = vpop.f32.mrf.mxu0 }
0x106b   :  { %v3048_v2 = vadd.f32 %v3047_v16, %v2958_v19  ;;  %v3099_v32 = vadd.f32 %v3098_v20, %v2966_v8  ;;  %v3113_v10 = vmax.f32 %v3046_v25, 0.0  ;;  %v3115_v62 = vmax.f32 %v3097_v7, 0.0  ;;  %v6126_v7 = vld [vmem:[%s7999_s17 + $0x30] sm:$0xff]  }
0x106c   :  { %v3049_v23 = vpop.f32.mrf.mxu1  ;;  %v3100_v28 = vpop.f32.mrf.mxu0 }
0x106d   :  { %v3050_v18 = vadd.f32 %v3049_v23, %v2954_v17  ;;  %v3101_v34 = vadd.f32 %v3100_v28, %v2962_v24  ;;  %v3114_v57 = vmax.f32 %v3048_v2, 0.0  ;;  %v3116_v41 = vmax.f32 %v3099_v32, 0.0  ;;  %v6124_v28 = vld [vmem:[%s7999_s17 + $0x70] sm:$0xff]  }
0x106e   :  { %v3051_v31 = vpop.f32.mrf.mxu1  ;;  %v3102_v36 = vpop.f32.mrf.mxu0  ;;  %v2793_v32 = vadd.f32 %v7487_v53, %v7521_v39  ;;  %v2789_v53 = vadd.f32 %v7479_v15, %v7521_v39  ;;  %v6130_v15 = vld [vmem:[%s7999_s17 + $0x28] sm:$0xff]  }
0x106f   :  { %v3052_v37 = vadd.f32 %v3051_v31, %v2958_v19  ;;  %v3103_v38 = vadd.f32 %v3102_v36, %v2966_v8  ;;  %v3117_v40 = vmax.f32 %v3050_v18, 0.0  ;;  %v3119_v42 = vmax.f32 %v3101_v34, 0.0  ;;  %v6127_v31 = vld [vmem:[%s7999_s17 + $0xb0] sm:$0xff]  }
0x1070   :  { %v3055_v47 = vpop.f32.mrf.mxu1  ;;  %v3106_v49 = vpop.f32.mrf.mxu0 }
0x1071   :  { %v3118_v60 = vmax.f32 %v3052_v37, 0.0  ;;  %v3120_v29 = vmax.f32 %v3103_v38, 0.0  ;;  %v3125_v9 = vpack.c.bf16 %v3117_v40, %v3113_v10  ;;  %v3127_v54 = vpack.c.bf16 %v3119_v42, %v3115_v62  ;;  %v6128_v38 = vld [vmem:[%s7999_s17 + $0x68] sm:$0xff]   ;;  %v6133_v10 = vld [vmem:[%s7999_s17 + $0xe0] sm:$0xff]  }
0x1072   :  { %v3057_v58 = vpop.f32.mrf.mxu1  ;;  %v3108_v44 = vpop.f32.mrf.mxu0  ;;  %v3056_v14 = vadd.f32 %v3055_v47, %v2954_v17  ;;  %v3107_v16 = vadd.f32 %v3106_v49, %v2962_v24  ;;  %v2844_v17 = vadd.f32 %v7489_v30, %v7525_v12  ;;  %v2840_v30 = vadd.f32 %v7481_v27, %v7525_v12  ;;  %v6129_v40 = vld [vmem:[%s7999_s17 + $0xe8] sm:$0xff]  }
0x1073   :  { %v3126_v50 = vpack.c.bf16 %v3118_v60, %v3114_v57  ;;  %v3128_v35 = vpack.c.bf16 %v3120_v29, %v3116_v41  ;;  %v3058_v59 = vadd.f32 %v3057_v58, %v2958_v19  ;;  %v3109_v56 = vadd.f32 %v3108_v44, %v2966_v8  ;;  %v6125_v19 = vld [vmem:[%s7999_s17 + $0xf0] sm:$0xff]   ;;  %v6131_v27 = vld [vmem:[%s7999_s17 + $0xa8] sm:$0xff]   ;;  %v6132_v29 = vld [vmem:[%s7999_s17 + $0x60] sm:$0xff]  }
0x1074   :  { %v3059_v20 = vpop.f32.mrf.mxu1  ;;  %v3110_v23 = vpop.f32.mrf.mxu0  ;;  %v3121_v36 = vmax.f32 %v3056_v14, 0.0  ;;  %v3123_v37 = vmax.f32 %v3107_v16, 0.0  ;;  %v2859_v42 = vmax.f32 %v2793_v32, 0.0  ;;  %v2861_v47 = vmax.f32 %v2844_v17, 0.0  ;;  %v6134_v44 = vld [vmem:[%s7999_s17 + $0x20] sm:$0xff]   ;;  %v6143_v14 = vld [vmem:[%s7999_s17 + $0x90] sm:$0xff]  }
0x1075   :  { %v3122_v8 = vmax.f32 %v3058_v59, 0.0  ;;  %v3124_v2 = vmax.f32 %v3109_v56, 0.0  ;;  %3357 = vmatprep.mubr.bf16.mxu1 %v3126_v50  ;;  %3405 = vmatprep.mubr.bf16.mxu0 %v3128_v35  ;;  %v2855_v49 = vmax.f32 %v2789_v53, 0.0  ;;  %v2857_v57 = vmax.f32 %v2840_v30, 0.0  ;;  %v6135_v50 = vld [vmem:[%s7999_s17 + $0xa0] sm:$0xff]   ;;  %v6136_v35 = vld [vmem:[%s7999_s17 + $0x58] sm:$0xff]  }
0x1076   :  { %v3060_v24 = vpop.f32.mrf.mxu1  ;;  %v3111_v18 = vpop.f32.mrf.mxu0  ;;  %3358 = vmatmul.mubr.bf16.vlgmr.msra.gmra.mxu1 %v3125_v9  ;;  %3406 = vmatmul.mubr.bf16.vlgmr.msra.gmra.mxu0 %v3127_v54  ;;  %v3129_v41 = vpack.c.bf16 %v3121_v36, %v3121_v36  ;;  %v3131_v60 = vpack.c.bf16 %v3123_v37, %v3123_v37  ;;  %v6137_v59 = vld [vmem:[%s7999_s17 + $0xd8] sm:$0xff]   ;;  %v6141_v9 = vld [vmem:[%s7999_s17 + $0xd0] sm:$0xff]   ;;  %v6144_v16 = vld [vmem:[%s7999_s17 + $0x48] sm:$0xff]   ;;  %v2689_v23 = vrot.slane %v7517_v55, %v7506_v6 }
0x1077   :  { %v3130_v34 = vpack.c.bf16 %v3122_v8, %v3122_v8  ;;  %v3132_v25 = vpack.c.bf16 %v3124_v2, %v3124_v2  ;;  %5576 = vmatpush3.bf16.msra.mxu1 %v6122_v26  ;;  %5604 = vmatpush3.bf16.msra.mxu0 %v6123_v52  ;;  %v2867_v62 = vpack.c.bf16 %v2859_v42, %v2855_v49  ;;  %v6138_v56 = vld [vmem:[%s7999_s17 + $0x18] sm:$0xff]   ;;  %v6140_v52 = vld [vmem:[%s7999_s17 + $0x50] sm:$0xff]   ;;  %v6145_v20 = vld [vmem:[%s7999_s17 + $0xc8] sm:$0xff]  }
0x1078   :  { %5577 = vmatprep.subr.bf16.mxu1 %v6124_v28  ;;  %5605 = vmatprep.subr.bf16.mxu0 %v6125_v19  ;;  %v2869_v58 = vpack.c.bf16 %v2861_v47, %v2857_v57  ;;  %v6139_v26 = vld [vmem:[%s7999_s17 + $0x98] sm:$0xff]   ;;  %v6142_v54 = vld [vmem:[%s7999_s17 + $0x10] sm:$0xff]   ;;  %v2697_v28 = vrot.slane %v7517_v55, %v7508_v13  ;;  %v2791_v19 = vadd.f32 %v7483_v51, %v2689_v23  ;;  %v6146_v8 = vld [vmem:[%s7999_s17 + $0x8] sm:$0xff]  }
0x1079   :  { %3365 = vmatprep.mubr.bf16.mxu1 %v3130_v34  ;;  %3413 = vmatprep.mubr.bf16.mxu0 %v3132_v25  ;;  %v6147_v2 = vld [vmem:[%s7999_s17 + $0x88] sm:$0xff]   ;;  %v6148_v55 = vld [vmem:[%s7999_s17 + $0x40] sm:$0xff]   ;;  %v2787_v24 = vadd.f32 %v7475_v45, %v2689_v23  ;;  %v2799_v18 = vadd.f32 %v7495_v43, %v7521_v39 }
0x107a   :  { %v2842_v32 = vadd.f32 %v7485_v22, %v2697_v28  ;;  %v6149_v51 = vld [vmem:[%s7999_s17 + $0xc0] sm:$0xff]   ;;  %v2850_v22 = vadd.f32 %v7497_v4, %v7525_v12  ;;  %v5171_v25 = vld [vmem:[%s7997_s15 + $0xa8] sm:$0xff]  ;;  %v2838_v45 = vadd.f32 %v7477_v0, %v2697_v28 }
0x107b   :  { %5578 = vmatpush3.bf16.msra.mxu1 %v6126_v7  ;;  %5606 = vmatpush3.bf16.msra.mxu0 %v6127_v31  ;;  %v5170_v17 = vld [vmem:[%s7997_s15 + $0xa0] sm:$0xff]  ;;  %v5173_v7 = vld [vmem:[%s7997_s15 + $0xe8] sm:$0xff]  ;;  %v2858_v31 = vmax.f32 %v2791_v19, 0.0  ;;  %v2854_v30 = vmax.f32 %v2787_v24, 0.0  ;;  %v2863_v36 = vmax.f32 %v2799_v18, 0.0  ;;  %v6169_v24 = vld [vmem:[%s7999_s17 + $0x2d8] sm:$0xff]  }
0x107c   :  { %5579 = vmatprep.subr.bf16.mxu1 %v6128_v38  ;;  %5607 = vmatprep.subr.bf16.mxu0 %v6129_v40  ;;  %v5172_v34 = vld [vmem:[%s7997_s15 + $0xe0] sm:$0xff]  ;;  %v2860_v39 = vmax.f32 %v2842_v32, 0.0  ;;  %v5246_v53 = vcombine.high %v5171_v25, %v5173_v7  ;;  %v2865_v37 = vmax.f32 %v2850_v22, 0.0  ;;  %v2856_v38 = vmax.f32 %v2838_v45, 0.0  ;;  %v5167_v42 = vld [vmem:[%s7997_s15 + $0x28] sm:$0xff]  ;;  %v6170_v18 = vld [vmem:[%s7999_s17 + $0x218] sm:$0xff]  }
0x107d   :  { %v6150_v43 = vld [vmem:[%s7999_s17] sm:$0xff]   ;;  %v5244_v12 = vcombine.high %v5170_v17, %v5172_v34  ;;  %v5169_v47 = vld [vmem:[%s7997_s15 + $0x68] sm:$0xff]  ;;  %v5245_v49 = vcombine.low %v5171_v25, %v5173_v7  ;;  %v6171_v22 = vld [vmem:[%s7999_s17 + $0x298] sm:$0xff]  }
0x107e   :  { %3366 = vmatmul.mubr.bf16.gmra.mxu1 %v3129_v41  ;;  %3414 = vmatmul.mubr.bf16.gmra.mxu0 %v3131_v60  ;;  %v6151_v4 = vld [vmem:[%s7999_s17 + $0x80] sm:$0xff]   ;;  %v2868_v57 = vpack.c.bf16 %v2860_v39, %v2856_v38  ;;  %v2797_v41 = vadd.f32 %v7491_v46, %v2689_v23  ;;  %v2848_v60 = vadd.f32 %v7493_v3, %v2697_v28  ;;  %v6160_v23 = vld [vmem:[%s7999_s17 + $0x268] sm:$0xff]   ;;  %v6173_v25 = vld [vmem:[%s7999_s17 + $0x2d0] sm:$0xff]  }
0x107f   :  { %5580 = vmatpush3.bf16.msra.mxu1 %v6130_v15  ;;  %5608 = vmatpush3.bf16.msra.mxu0 %v6131_v27  ;;  %v5166_v0 = vld [vmem:[%s7997_s15 + $0x20] sm:$0xff]  ;;  %v2866_v15 = vpack.c.bf16 %v2858_v31, %v2854_v30  ;;  %v5243_v27 = vcombine.low %v5170_v17, %v5172_v34  ;;  %v6161_v28 = vld [vmem:[%s7999_s17 + $0x2e8] sm:$0xff]   ;;  %v6168_v17 = vld [vmem:[%s7999_s17 + $0x258] sm:$0xff]  }
0x1080   :  { %3645 = vmatprep.mubr.bf16.mxu1 %v2867_v62  ;;  %3693 = vmatprep.mubr.bf16.mxu0 %v2869_v58  ;;  %v5168_v40 = vld [vmem:[%s7997_s15 + $0x60] sm:$0xff]  ;;  %v5242_v58 = vcombine.high %v5167_v42, %v5169_v47  ;;  %v6162_v19 = vld [vmem:[%s7999_s17 + $0x228] sm:$0xff]   ;;  %v6172_v34 = vld [vmem:[%s7999_s17 + $0x250] sm:$0xff]  }
0x1081   :  { %5581 = vmatprep.subr.bf16.mxu1 %v6132_v29  ;;  %5609 = vmatprep.subr.bf16.mxu0 %v6133_v10  ;;  %v2871_v29 = vpack.c.bf16 %v2863_v36, %v2863_v36  ;;  %v2873_v10 = vpack.c.bf16 %v2865_v37, %v2865_v37  ;;  %v5240_v62 = vcombine.high %v5166_v0, %v5168_v40  ;;  %v6165_v32 = vld [vmem:[%s7999_s17 + $0x2e0] sm:$0xff]   ;;  %v6174_v7 = vld [vmem:[%s7999_s17 + $0x210] sm:$0xff]   ;;  %v6176_v31 = vld [vmem:[%s7999_s17 + $0x248] sm:$0xff]  }
0x1082   :  { %v6175_v45 = vld [vmem:[%s7999_s17 + $0x290] sm:$0xff]   ;;  %v6179_v39 = vld [vmem:[%s7999_s17 + $0x288] sm:$0xff]   ;;  %v6182_v30 = vld [vmem:[%s7999_s17 + $0x200] sm:$0xff]  }
0x1083   :  { %5582 = vmatpush3.bf16.msra.mxu1 %v6134_v44  ;;  %5610 = vmatpush3.bf16.msra.mxu0 %v6135_v50  ;;  %v2862_v44 = vmax.f32 %v2797_v41, 0.0  ;;  %v2864_v50 = vmax.f32 %v2848_v60, 0.0  ;;  %v6183_v36 = vld [vmem:[%s7999_s17 + $0x280] sm:$0xff]   ;;  %v7774_v37 = vld [vmem:[%s7997_s15 + $0xb0] sm:$0xff]  ;;  %v7784_v38 = vld [vmem:[%s7997_s15 + $0xb8] sm:$0xff] }
0x1084   :  { %5583 = vmatprep.subr.bf16.mxu1 %v6136_v35  ;;  %5611 = vmatprep.subr.bf16.mxu0 %v6137_v59  ;;  %v5239_v35 = vcombine.low %v5166_v0, %v5168_v40  ;;  %v5241_v59 = vcombine.low %v5167_v42, %v5169_v47  ;;  %v7779_v0 = vld [vmem:[%s7997_s15 + $0xf0] sm:$0xff]  ;;  %v7793_v47 = vld [vmem:[%s7997_s15 + $0xf8] sm:$0xff] }
0x1085   :  { %v2870_v46 = vpack.c.bf16 %v2862_v44, %v2862_v44  ;;  %v2872_v3 = vpack.c.bf16 %v2864_v50, %v2864_v50  ;;  %v5360_v40 = vcombine.low %v7774_v37, %v7779_v0  ;;  %v5361_v42 = vcombine.high %v7774_v37, %v7779_v0 }
0x1087   :  { %5584 = vmatpush3.bf16.msra.mxu1 %v6138_v56  ;;  %5612 = vmatpush3.bf16.msra.mxu0 %v6139_v26  ;;  %v6152_v56 = vld [vmem:[%s7999_s17 + $0x278] sm:$0xff]  }
0x1088   :  { %5585 = vmatprep.subr.bf16.mxu1 %v6140_v52  ;;  %5613 = vmatprep.subr.bf16.mxu0 %v6141_v9  ;;  %v6153_v26 = vld [vmem:[%s7999_s17 + $0x2f8] sm:$0xff]  }
0x1089   :  { %v6154_v52 = vld [vmem:[%s7999_s17 + $0x238] sm:$0xff]  }
0x108a   :  { %v6155_v9 = vld [vmem:[%s7999_s17 + $0x2b8] sm:$0xff]  }
0x108b   :  { %5586 = vmatpush3.bf16.msra.mxu1 %v6142_v54  ;;  %5614 = vmatpush3.bf16.msra.mxu0 %v6143_v14  ;;  %v6156_v54 = vld [vmem:[%s7999_s17 + $0x270] sm:$0xff]  }
0x108c   :  { %5587 = vmatprep.subr.bf16.mxu1 %v6144_v16  ;;  %5615 = vmatprep.subr.bf16.mxu0 %v6145_v20  ;;  %v6157_v14 = vld [vmem:[%s7999_s17 + $0x2f0] sm:$0xff]  }
0x108d   :  { %v6158_v16 = vld [vmem:[%s7999_s17 + $0x230] sm:$0xff]  }
0x108e   :  { %v6159_v20 = vld [vmem:[%s7999_s17 + $0x2b0] sm:$0xff]  }
0x108f   :  { %5588 = vmatpush3.bf16.msra.mxu1 %v6146_v8  ;;  %5616 = vmatpush3.bf16.msra.mxu0 %v6147_v2  ;;  %v6163_v8 = vld [vmem:[%s7999_s17 + $0x2a8] sm:$0xff]   ;;  %v6164_v2 = vld [vmem:[%s7999_s17 + $0x260] sm:$0xff]  }
0x1090   :  { %5589 = vmatprep.subr.bf16.mxu1 %v6148_v55  ;;  %5617 = vmatprep.subr.bf16.mxu0 %v6149_v51  ;;  %v6166_v55 = vld [vmem:[%s7999_s17 + $0x220] sm:$0xff]  }
0x1091   :  { %v6167_v51 = vld [vmem:[%s7999_s17 + $0x2a0] sm:$0xff]  }
0x1093   :  { %5590 = vmatpush3.bf16.msra.mxu1 %v6150_v43  ;;  %5618 = vmatpush3.bf16.msra.mxu0 %v6151_v4  ;;  %v6177_v43 = vld [vmem:[%s7999_s17 + $0x2c8] sm:$0xff]  }
0x1094   :  { %3858 = vmatprep.subr.bf16.mxu1 %v5244_v12  ;;  %3909 = vmatprep.subr.bf16.mxu0 %v5246_v53  ;;  %v6178_v4 = vld [vmem:[%s7999_s17 + $0x208] sm:$0xff]   ;;  %v6180_v12 = vld [vmem:[%s7999_s17 + $0x240] sm:$0xff]  }
0x1095   :  { %v6181_v53 = vld [vmem:[%s7999_s17 + $0x2c0] sm:$0xff]  }
0x1096   :  { %3646 = vmatmul.mubr.bf16.vlgmr.msra.gmra.mxu1 %v2866_v15  ;;  %3694 = vmatmul.mubr.bf16.vlgmr.msra.gmra.mxu0 %v2868_v57  ;;  %v5362_v15 = vcombine.low %v7784_v38, %v7793_v47 }
0x1097   :  { %3653 = vmatprep.mubr.bf16.mxu1 %v2871_v29  ;;  %3701 = vmatprep.mubr.bf16.mxu0 %v2873_v10 }
0x1098   :  { %3859 = vmatpush1.bf16.msra.mxu1 %v5243_v27  ;;  %3910 = vmatpush1.bf16.msra.mxu0 %v5245_v49  ;;  %v5363_v27 = vcombine.high %v7784_v38, %v7793_v47  ;;  %v6186_v38 = vld [vmem:[%s7999_s17 + $0x338] sm:$0xff]   ;;  %v6188_v47 = vld [vmem:[%s7999_s17 + $0x370] sm:$0xff]  }
0x1099   :  { %3860 = vmatprep.subr.bf16.mxu1 %v5240_v62  ;;  %3911 = vmatprep.subr.bf16.mxu0 %v5242_v58 }
0x109c   :  { %3861 = vmatpush1.bf16.msra.mxu1 %v5239_v35  ;;  %3912 = vmatpush1.bf16.msra.mxu0 %v5241_v59 }
0x109d   :  { %5631 = vmatprep.subr.bf16.mxu1 %v6152_v56  ;;  %5659 = vmatprep.subr.bf16.mxu0 %v6153_v26 }
0x109e   :  { %3654 = vmatmul.mubr.bf16.gmra.mxu1 %v2870_v46  ;;  %3702 = vmatmul.mubr.bf16.gmra.mxu0 %v2872_v3 }
0x109f   :  { %3878 = vmatprep.mubr.bf16.mxu1 %v6374_v48  ;;  %3929 = vmatprep.mubr.bf16.mxu0 %v6374_v48 }
0x10a6   :  { %5247 = vmatmul.mubr.msk.bf16.vlgmr.msra.gmra.mxu1 %vm98_vm0, %v7343_v61  ;;  %5249 = vmatmul.mubr.msk.bf16.vlgmr.msra.gmra.mxu0 %vm98_vm0, %v7343_v61 }
0x10a7   :  { %3888 = vmatprep.mubr.bf16.mxu1 %v6374_v48  ;;  %3939 = vmatprep.mubr.bf16.mxu0 %v6374_v48 }
0x10a8   :  { %5632 = vmatpush3.bf16.msra.mxu1 %v6154_v52  ;;  %5660 = vmatpush3.bf16.msra.mxu0 %v6155_v9 }
0x10a9   :  { %5633 = vmatprep.subr.bf16.mxu1 %v6156_v54  ;;  %5661 = vmatprep.subr.bf16.mxu0 %v6157_v14 }
0x10ac   :  { %5634 = vmatpush3.bf16.msra.mxu1 %v6158_v16  ;;  %5662 = vmatpush3.bf16.msra.mxu0 %v6159_v20 }
0x10ad   :  { %5635 = vmatprep.subr.bf16.mxu1 %v6160_v23  ;;  %5663 = vmatprep.subr.bf16.mxu0 %v6161_v28 }
0x10ae   :  { %5248 = vmatmul.mubr.msk.bf16.gmra.mxu1 %vm98_vm0, %v7361_v21  ;;  %5250 = vmatmul.mubr.msk.bf16.gmra.mxu0 %vm98_vm0, %v7361_v21 }
0x10b0   :  { %5636 = vmatpush3.bf16.msra.mxu1 %v6162_v19  ;;  %5664 = vmatpush3.bf16.msra.mxu0 %v6163_v8 }
0x10b1   :  { %5637 = vmatprep.subr.bf16.mxu1 %v6164_v2  ;;  %5665 = vmatprep.subr.bf16.mxu0 %v6165_v32 }
0x10b4   :  { %5638 = vmatpush3.bf16.msra.mxu1 %v6166_v55  ;;  %5666 = vmatpush3.bf16.msra.mxu0 %v6167_v51 }
0x10b5   :  { %5639 = vmatprep.subr.bf16.mxu1 %v6168_v17  ;;  %5667 = vmatprep.subr.bf16.mxu0 %v6169_v24 }
0x10b8   :  { %5640 = vmatpush3.bf16.msra.mxu1 %v6170_v18  ;;  %5668 = vmatpush3.bf16.msra.mxu0 %v6171_v22 }
0x10b9   :  { %5641 = vmatprep.subr.bf16.mxu1 %v6172_v34  ;;  %5669 = vmatprep.subr.bf16.mxu0 %v6173_v25 }
0x10bc   :  { %5642 = vmatpush3.bf16.msra.mxu1 %v6174_v7  ;;  %5670 = vmatpush3.bf16.msra.mxu0 %v6175_v45 }
0x10bd   :  { %5643 = vmatprep.subr.bf16.mxu1 %v6176_v31  ;;  %5671 = vmatprep.subr.bf16.mxu0 %v6177_v43 }
0x10c0   :  { %5644 = vmatpush3.bf16.msra.mxu1 %v6178_v4  ;;  %5672 = vmatpush3.bf16.msra.mxu0 %v6179_v39 }
0x10c1   :  { %5645 = vmatprep.subr.bf16.mxu1 %v6180_v12  ;;  %5673 = vmatprep.subr.bf16.mxu0 %v6181_v53 }
0x10c4   :  { %5646 = vmatpush3.bf16.msra.mxu1 %v6182_v30  ;;  %5674 = vmatpush3.bf16.msra.mxu0 %v6183_v36 }
0x10c5   :  { %4408 = vmatprep.subr.bf16.mxu1 %v5361_v42  ;;  %4459 = vmatprep.subr.bf16.mxu0 %v5363_v27 }
0x1136   :  { %v5535_v49 = vpop.f32.mrf.mxu1  ;;  %v5563_v57 = vpop.f32.mrf.mxu0 }
0x1138   :  { %v5536_v41 = vpop.f32.mrf.mxu1  ;;  %v5564_v60 = vpop.f32.mrf.mxu0 }
0x1139   :  { %v5537_v29 = vadd.f32 %v5536_v41, %v5535_v49  ;;  %v5565_v10 = vadd.f32 %v5564_v60, %v5563_v57 }
0x113a   :  { %v5538_v62 = vpop.f32.mrf.mxu1  ;;  %v5566_v58 = vpop.f32.mrf.mxu0 }
0x113b   :  { %v3408_v44 = vadd.f32 %v5565_v10, %v5537_v29  ;;  %v5174_v10 = vld [vmem:[%s7998_s16 + $0x8] sm:$0xf] }
0x113c   :  { %v5539_v50 = vpop.f32.mrf.mxu1  ;;  %v5567_v35 = vpop.f32.mrf.mxu0 }
0x113d   :  { %v5540_v59 = vadd.f32 %v5539_v50, %v5538_v62  ;;  %v5568_v46 = vadd.f32 %v5567_v35, %v5566_v58  ;;  %v3801_v50 = vrot.slane %v5174_v10, %v7501_v5  ;;  %v3789_v35 = vrot.slane %v5174_v10, %v7506_v6 }
0x113e   :  { %v5541_v3 = vpop.f32.mrf.mxu1  ;;  %v5569_v56 = vpop.f32.mrf.mxu0 }
0x113f   :  { %v3411_v26 = vadd.f32 %v5568_v46, %v5540_v59  ;;  %v3797_v59 = vrot.slane %v5174_v10, %v7508_v13 }
0x1140   :  { %v5542_v52 = vpop.f32.mrf.mxu1  ;;  %v5570_v9 = vpop.f32.mrf.mxu0 }
0x1141   :  { %v5543_v54 = vadd.f32 %v5542_v52, %v5541_v3  ;;  %v5571_v14 = vadd.f32 %v5570_v9, %v5569_v56 }
0x1142   :  { %v5544_v16 = vpop.f32.mrf.mxu1  ;;  %v5572_v20 = vpop.f32.mrf.mxu0 }
0x1143   :  { %v3416_v23 = vadd.f32 %v5571_v14, %v5543_v54 }
0x1144   :  { %v5545_v28 = vpop.f32.mrf.mxu1  ;;  %v5573_v19 = vpop.f32.mrf.mxu0 }
0x1145   :  { %v5283_v19 = vld [vmem:[%s7997_s15 + $0x30] sm:$0xff] }
0x1156   :  { %v5591_v8 = vpop.f32.mrf.mxu1  ;;  %v5619_v2 = vpop.f32.mrf.mxu0 }
0x1158   :  { %v5592_v32 = vpop.f32.mrf.mxu1  ;;  %v5620_v55 = vpop.f32.mrf.mxu0 }
0x1159   :  { %v5593_v51 = vadd.f32 %v5592_v32, %v5591_v8  ;;  %v5621_v17 = vadd.f32 %v5620_v55, %v5619_v2  ;;  %v5285_v32 = vld [vmem:[%s7997_s15 + $0x70] sm:$0xff]  ;;  %v5284_v55 = vld [vmem:[%s7997_s15 + $0x38] sm:$0xff] }
0x115a   :  { %v5594_v24 = vpop.f32.mrf.mxu1  ;;  %v5622_v18 = vpop.f32.mrf.mxu0 }
0x115b   :  { %v3648_v22 = vadd.f32 %v5593_v51, %v3408_v44  ;;  %v3793_v44 = vrot.slane %v5174_v10, %v7499_v1  ;;  %v5286_v51 = vld [vmem:[%s7997_s15 + $0x78] sm:$0xff] }
0x115c   :  { %v5595_v34 = vpop.f32.mrf.mxu1  ;;  %v5623_v25 = vpop.f32.mrf.mxu0 }
0x115d   :  { %v7799_v7 = vadd.f32 %v5621_v17, %v3648_v22  ;;  %v5596_v45 = vadd.f32 %v5595_v34, %v5594_v24  ;;  %v5624_v31 = vadd.f32 %v5623_v25, %v5622_v18 }
0x115e   :  { %v5597_v43 = vpop.f32.mrf.mxu1  ;;  %v5625_v4 = vpop.f32.mrf.mxu0 }
0x115f   :  { %v3651_v39 = vadd.f32 %v5596_v45, %v3411_v26 }
0x1160   :  { %v5598_v12 = vpop.f32.mrf.mxu1  ;;  %v5626_v53 = vpop.f32.mrf.mxu0 }
0x1161   :  { %v7801_v30 = vadd.f32 %v5624_v31, %v3651_v39  ;;  %v5599_v36 = vadd.f32 %v5598_v12, %v5597_v43  ;;  %v5627_v42 = vadd.f32 %v5626_v53, %v5625_v4  ;;  %v5357_v53 = vcombine.high %v5283_v19, %v5285_v32 }
0x1162   :  { %v5600_v27 = vpop.f32.mrf.mxu1  ;;  %v5628_v49 = vpop.f32.mrf.mxu0 }
0x1163   :  { %v3656_v57 = vadd.f32 %v5599_v36, %v3416_v23  ;;  %v5359_v36 = vcombine.high %v5284_v55, %v5286_v51 }
0x1164   :  { %v5601_v41 = vpop.f32.mrf.mxu1  ;;  %v5629_v60 = vpop.f32.mrf.mxu0 }
0x1165   :  { %v7803_v29 = vadd.f32 %v5627_v42, %v3656_v57 }
0x1166   :  { %v3880_v62 = vpop.f32.mrf.mxu1  ;;  %v3931_v58 = vpop.f32.mrf.mxu0 }
0x1167   :  { %v3881_v16 = vadd.f32 %v3880_v62, %v3789_v35  ;;  %v3932_v20 = vadd.f32 %v3931_v58, %v3797_v59 }
0x1168   :  { %v3882_v46 = vpop.f32.mrf.mxu1  ;;  %v3933_v3 = vpop.f32.mrf.mxu0 }
0x1169   :  { %v3883_v52 = vadd.f32 %v3882_v46, %v3793_v44  ;;  %v3934_v9 = vadd.f32 %v3933_v3, %v3801_v50  ;;  %v3948_v43 = vmax.f32 %v3881_v16, 0.0  ;;  %v3950_v4 = vmax.f32 %v3932_v20, 0.0  ;;  %v6185_v16 = vld [vmem:[%s7999_s17 + $0x3f8] sm:$0xff]   ;;  %v6193_v20 = vld [vmem:[%s7999_s17 + $0x3e8] sm:$0xff]  }
0x116a   :  { %v3884_v56 = vpop.f32.mrf.mxu1  ;;  %v3935_v26 = vpop.f32.mrf.mxu0 }
0x116b   :  { %v3885_v54 = vadd.f32 %v3884_v56, %v3789_v35  ;;  %v3936_v14 = vadd.f32 %v3935_v26, %v3797_v59  ;;  %v3949_v34 = vmax.f32 %v3883_v52, 0.0  ;;  %v3951_v25 = vmax.f32 %v3934_v9, 0.0 }
0x116c   :  { %v3886_v23 = vpop.f32.mrf.mxu1  ;;  %v3937_v28 = vpop.f32.mrf.mxu0  ;;  %v5356_v9 = vcombine.low %v5283_v19, %v5285_v32  ;;  %v6196_v19 = vld [vmem:[%s7999_s17 + $0x360] sm:$0xff]  }
0x116d   :  { %v3887_v8 = vadd.f32 %v3886_v23, %v3793_v44  ;;  %v3938_v2 = vadd.f32 %v3937_v28, %v3801_v50  ;;  %v3952_v17 = vmax.f32 %v3885_v54, 0.0  ;;  %v3954_v24 = vmax.f32 %v3936_v14, 0.0  ;;  %v6194_v23 = vld [vmem:[%s7999_s17 + $0x328] sm:$0xff]   ;;  %v6199_v32 = vld [vmem:[%s7999_s17 + $0x3a0] sm:$0xff]  }
0x116e   :  { %v3890_v18 = vpop.f32.mrf.mxu1  ;;  %v3941_v22 = vpop.f32.mrf.mxu0  ;;  %v6195_v28 = vld [vmem:[%s7999_s17 + $0x3a8] sm:$0xff]  }
0x116f   :  { %v3953_v45 = vmax.f32 %v3887_v8, 0.0  ;;  %v3955_v31 = vmax.f32 %v3938_v2, 0.0  ;;  %v3960_v41 = vpack.c.bf16 %v3952_v17, %v3948_v43  ;;  %v3962_v60 = vpack.c.bf16 %v3954_v24, %v3950_v4  ;;  %v6197_v8 = vld [vmem:[%s7999_s17 + $0x3e0] sm:$0xff]   ;;  %v6202_v17 = vld [vmem:[%s7999_s17 + $0x318] sm:$0xff]   ;;  %v6210_v43 = vld [vmem:[%s7999_s17 + $0x308] sm:$0xff]  }
0x1170   :  { %v3892_v39 = vpop.f32.mrf.mxu1  ;;  %v3943_v12 = vpop.f32.mrf.mxu0  ;;  %v3891_v10 = vadd.f32 %v3890_v18, %v3789_v35  ;;  %v3942_v62 = vadd.f32 %v3941_v22, %v3797_v59  ;;  %v6184_v59 = vld [vmem:[%s7999_s17 + $0x378] sm:$0xff]   ;;  %v6198_v2 = vld [vmem:[%s7999_s17 + $0x320] sm:$0xff]   ;;  %v6204_v18 = vld [vmem:[%s7999_s17 + $0x350] sm:$0xff]  }
0x1171   :  { %v3961_v42 = vpack.c.bf16 %v3953_v45, %v3949_v34  ;;  %v3963_v27 = vpack.c.bf16 %v3955_v31, %v3951_v25  ;;  %v3893_v49 = vadd.f32 %v3892_v39, %v3793_v44  ;;  %v3944_v57 = vadd.f32 %v3943_v12, %v3801_v50  ;;  %v6203_v24 = vld [vmem:[%s7999_s17 + $0x398] sm:$0xff]   ;;  %v6205_v22 = vld [vmem:[%s7999_s17 + $0x3d0] sm:$0xff]   ;;  %v6208_v45 = vld [vmem:[%s7999_s17 + $0x348] sm:$0xff]  }
0x1172   :  { %v3894_v58 = vpop.f32.mrf.mxu1  ;;  %v3945_v46 = vpop.f32.mrf.mxu0  ;;  %v5358_v44 = vcombine.low %v5284_v55, %v5286_v51  ;;  %v3956_v50 = vmax.f32 %v3891_v10, 0.0  ;;  %v3958_v35 = vmax.f32 %v3942_v62, 0.0  ;;  %v6200_v55 = vld [vmem:[%s7999_s17 + $0x358] sm:$0xff]   ;;  %v6206_v34 = vld [vmem:[%s7999_s17 + $0x310] sm:$0xff]   ;;  %v6209_v31 = vld [vmem:[%s7999_s17 + $0x3c8] sm:$0xff]  }
0x1173   :  { %v3957_v3 = vmax.f32 %v3893_v49, 0.0  ;;  %v3959_v56 = vmax.f32 %v3944_v57, 0.0  ;;  %4192 = vmatprep.mubr.bf16.mxu1 %v3961_v42  ;;  %4240 = vmatprep.mubr.bf16.mxu0 %v3963_v27  ;;  %v6201_v51 = vld [vmem:[%s7999_s17 + $0x3d8] sm:$0xff]   ;;  %v6207_v25 = vld [vmem:[%s7999_s17 + $0x390] sm:$0xff]   ;;  %v6211_v4 = vld [vmem:[%s7999_s17 + $0x388] sm:$0xff]  }
0x1174   :  { %v3895_v26 = vpop.f32.mrf.mxu1  ;;  %v3946_v52 = vpop.f32.mrf.mxu0  ;;  %4193 = vmatmul.mubr.bf16.vlgmr.msra.gmra.mxu1 %v3960_v41  ;;  %4241 = vmatmul.mubr.bf16.vlgmr.msra.gmra.mxu0 %v3962_v60  ;;  %v3964_v37 = vpack.c.bf16 %v3956_v50, %v3956_v50  ;;  %v3966_v0 = vpack.c.bf16 %v3958_v35, %v3958_v35  ;;  %v6212_v39 = vld [vmem:[%s7999_s17 + $0x340] sm:$0xff]  }
0x1175   :  { %v3965_v54 = vpack.c.bf16 %v3957_v3, %v3957_v3  ;;  %v3967_v14 = vpack.c.bf16 %v3959_v56, %v3959_v56  ;;  %4409 = vmatpush1.bf16.msra.mxu1 %v5360_v40  ;;  %4460 = vmatpush1.bf16.msra.mxu0 %v5362_v15  ;;  %v6187_v40 = vld [vmem:[%s7999_s17 + $0x3b8] sm:$0xff]   ;;  %v6191_v15 = vld [vmem:[%s7999_s17 + $0x3b0] sm:$0xff]   ;;  %v6213_v12 = vld [vmem:[%s7999_s17 + $0x3c0] sm:$0xff]  }
0x1176   :  { %4410 = vmatprep.subr.bf16.mxu1 %v5357_v53  ;;  %4461 = vmatprep.subr.bf16.mxu0 %v5359_v36  ;;  %v6214_v53 = vld [vmem:[%s7999_s17 + $0x300] sm:$0xff]  }
0x1177   :  { %4200 = vmatprep.mubr.bf16.mxu1 %v3965_v54  ;;  %4248 = vmatprep.mubr.bf16.mxu0 %v3967_v14  ;;  %v6215_v36 = vld [vmem:[%s7999_s17 + $0x380] sm:$0xff]  }
0x1179   :  { %4411 = vmatpush1.bf16.msra.mxu1 %v5356_v9  ;;  %4462 = vmatpush1.bf16.msra.mxu0 %v5358_v44 }
0x117a   :  { %5687 = vmatprep.subr.bf16.mxu1 %v6184_v59  ;;  %5715 = vmatprep.subr.bf16.mxu0 %v6185_v16 }
0x117c   :  { %4201 = vmatmul.mubr.bf16.gmra.mxu1 %v3964_v37  ;;  %4249 = vmatmul.mubr.bf16.gmra.mxu0 %v3966_v0 }
0x117d   :  { %4428 = vmatprep.mubr.bf16.mxu1 %v6374_v48  ;;  %4479 = vmatprep.mubr.bf16.mxu0 %v6374_v48 }
0x1184   :  { %5364 = vmatmul.mubr.msk.bf16.vlgmr.msra.gmra.mxu1 %vm98_vm0, %v7343_v61  ;;  %5366 = vmatmul.mubr.msk.bf16.vlgmr.msra.gmra.mxu0 %vm98_vm0, %v7343_v61  ;;  %v6189_v61 = vld [vmem:[%s7999_s17 + $0x3f0] sm:$0xff]  }
0x1185   :  { %4438 = vmatprep.mubr.bf16.mxu1 %v6374_v48  ;;  %4489 = vmatprep.mubr.bf16.mxu0 %v6374_v48  ;;  %v6190_v48 = vld [vmem:[%s7999_s17 + $0x330] sm:$0xff]  }
0x1186   :  { %5688 = vmatpush3.bf16.msra.mxu1 %v6186_v38  ;;  %5716 = vmatpush3.bf16.msra.mxu0 %v6187_v40 }
0x1187   :  { %5689 = vmatprep.subr.bf16.mxu1 %v6188_v47  ;;  %5717 = vmatprep.subr.bf16.mxu0 %v6189_v61  ;;  %v5291_v61 = vld [vmem:[%s7998_s16 + $0xc] sm:$0xf] }
0x118a   :  { %5690 = vmatpush3.bf16.msra.mxu1 %v6190_v48  ;;  %5718 = vmatpush3.bf16.msra.mxu0 %v6191_v15 }
0x118b   :  { %5719 = vmatprep.subr.bf16.mxu0 %v6193_v20  ;;  %v4339_v20 = vrot.slane %v5291_v61, %v7506_v6 }
0x118c   :  { %5365 = vmatmul.mubr.msk.bf16.gmra.mxu1 %vm98_vm0, %v7361_v21  ;;  %5367 = vmatmul.mubr.msk.bf16.gmra.mxu0 %vm98_vm0, %v7361_v21  ;;  %v6192_v21 = vld [vmem:[%s7999_s17 + $0x368] sm:$0xff]  }
0x118d   :  { %5691 = vmatprep.subr.bf16.mxu1 %v6192_v21  ;;  %v4343_v21 = vrot.slane %v5291_v61, %v7499_v1 }
0x118e   :  { %5692 = vmatpush3.bf16.msra.mxu1 %v6194_v23  ;;  %5720 = vmatpush3.bf16.msra.mxu0 %v6195_v28  ;;  %v4347_v23 = vrot.slane %v5291_v61, %v7508_v13 }
0x118f   :  { %5693 = vmatprep.subr.bf16.mxu1 %v6196_v19  ;;  %5721 = vmatprep.subr.bf16.mxu0 %v6197_v8 }
0x1192   :  { %5694 = vmatpush3.bf16.msra.mxu1 %v6198_v2  ;;  %5722 = vmatpush3.bf16.msra.mxu0 %v6199_v32 }
0x1193   :  { %5695 = vmatprep.subr.bf16.mxu1 %v6200_v55  ;;  %5723 = vmatprep.subr.bf16.mxu0 %v6201_v51 }
0x1196   :  { %5696 = vmatpush3.bf16.msra.mxu1 %v6202_v17  ;;  %5724 = vmatpush3.bf16.msra.mxu0 %v6203_v24 }
0x1197   :  { %5697 = vmatprep.subr.bf16.mxu1 %v6204_v18  ;;  %5725 = vmatprep.subr.bf16.mxu0 %v6205_v22 }
0x119a   :  { %5698 = vmatpush3.bf16.msra.mxu1 %v6206_v34  ;;  %5726 = vmatpush3.bf16.msra.mxu0 %v6207_v25 }
0x119b   :  { %5699 = vmatprep.subr.bf16.mxu1 %v6208_v45  ;;  %5727 = vmatprep.subr.bf16.mxu0 %v6209_v31 }
0x119e   :  { %5700 = vmatpush3.bf16.msra.mxu1 %v6210_v43  ;;  %5728 = vmatpush3.bf16.msra.mxu0 %v6211_v4 }
0x119f   :  { %5701 = vmatprep.subr.bf16.mxu1 %v6212_v39  ;;  %5729 = vmatprep.subr.bf16.mxu0 %v6213_v12 }
0x11a2   :  { %5702 = vmatpush3.bf16.msra.mxu1 %v6214_v53  ;;  %5730 = vmatpush3.bf16.msra.mxu0 %v6215_v36 }
0x1234   :  { %v5647_v42 = vpop.f32.mrf.mxu1  ;;  %v5675_v27 = vpop.f32.mrf.mxu0 }
0x1236   :  { %v5648_v49 = vpop.f32.mrf.mxu1  ;;  %v5676_v57 = vpop.f32.mrf.mxu0 }
0x1237   :  { %v5649_v41 = vadd.f32 %v5648_v49, %v5647_v42  ;;  %v5677_v60 = vadd.f32 %v5676_v57, %v5675_v27 }
0x1238   :  { %v5650_v10 = vpop.f32.mrf.mxu1  ;;  %v5678_v62 = vpop.f32.mrf.mxu0 }
0x1239   :  { %v4243_v58 = vadd.f32 %v5677_v60, %v5649_v41 }
0x123a   :  { %v5651_v46 = vpop.f32.mrf.mxu1  ;;  %v5679_v3 = vpop.f32.mrf.mxu0 }
0x123b   :  { %v7939_v56 = vadd.f32 %v4243_v58, %v7799_v7  ;;  %v5652_v26 = vadd.f32 %v5651_v46, %v5650_v10  ;;  %v5680_v52 = vadd.f32 %v5679_v3, %v5678_v62 }
0x123c   :  { %v5653_v9 = vpop.f32.mrf.mxu1  ;;  %v5681_v54 = vpop.f32.mrf.mxu0 }
0x123d   :  { %v4246_v14 = vadd.f32 %v5680_v52, %v5652_v26 }
0x123e   :  { %v5654_v44 = vpop.f32.mrf.mxu1  ;;  %v5682_v50 = vpop.f32.mrf.mxu0 }
0x123f   :  { %v7942_v35 = vadd.f32 %v4246_v14, %v7801_v30  ;;  %v5655_v59 = vadd.f32 %v5654_v44, %v5653_v9  ;;  %v5683_v16 = vadd.f32 %v5682_v50, %v5681_v54  ;;  %v4351_v30 = vrot.slane %v5291_v61, %v7501_v5 }
0x1240   :  { %v5656_v37 = vpop.f32.mrf.mxu1  ;;  %v5684_v0 = vpop.f32.mrf.mxu0 }
0x1241   :  { %v4251_v38 = vadd.f32 %v5683_v16, %v5655_v59 }
0x1242   :  { %v5657_v40 = vpop.f32.mrf.mxu1  ;;  %v5685_v47 = vpop.f32.mrf.mxu0 }
0x1243   :  { %v7945_v7 = vadd.f32 %v4251_v38, %v7803_v29 }
0x1244   :  { %v4430_v48 = vpop.f32.mrf.mxu1  ;;  %v4481_v15 = vpop.f32.mrf.mxu0 }
0x1245   :  { %v4431_v17 = vadd.f32 %v4430_v48, %v4339_v20  ;;  %v4482_v24 = vadd.f32 %v4481_v15, %v4347_v23 }
0x1246   :  { %v4432_v28 = vpop.f32.mrf.mxu1  ;;  %v4483_v19 = vpop.f32.mrf.mxu0 }
0x1247   :  { %v4433_v29 = vadd.f32 %v4432_v28, %v4343_v21  ;;  %v4484_v32 = vadd.f32 %v4483_v19, %v4351_v30  ;;  %v4498_v39 = vmax.f32 %v4431_v17, 0.0  ;;  %v4500_v12 = vmax.f32 %v4482_v24, 0.0 }
0x1248   :  { %v4434_v8 = vpop.f32.mrf.mxu1  ;;  %v4485_v2 = vpop.f32.mrf.mxu0 }
0x1249   :  { %v4435_v55 = vadd.f32 %v4434_v8, %v4339_v20  ;;  %v4486_v51 = vadd.f32 %v4485_v2, %v4347_v23  ;;  %v4499_v31 = vmax.f32 %v4433_v29, 0.0  ;;  %v4501_v13 = vmax.f32 %v4484_v32, 0.0  ;;  %v5400_v29 = vld [vmem:[%s8000_s18] ss:$0 sm:$0xff] }
0x124a   :  { %v4436_v18 = vpop.f32.mrf.mxu1  ;;  %v4487_v22 = vpop.f32.mrf.mxu0 }
0x124b   :  { %v4437_v34 = vadd.f32 %v4436_v18, %v4343_v21  ;;  %v4488_v1 = vadd.f32 %v4487_v22, %v4351_v30  ;;  %v4502_v25 = vmax.f32 %v4435_v55, 0.0  ;;  %v4504_v5 = vmax.f32 %v4486_v51, 0.0 }
0x124c   :  { %v4440_v45 = vpop.f32.mrf.mxu1  ;;  %v4491_v6 = vpop.f32.mrf.mxu0 }
0x124d   :  { %v4503_v43 = vmax.f32 %v4437_v34, 0.0  ;;  %v4505_v4 = vmax.f32 %v4488_v1, 0.0  ;;  %v4510_v41 = vpack.c.bf16 %v4502_v25, %v4498_v39  ;;  %v4512_v60 = vpack.c.bf16 %v4504_v5, %v4500_v12 }
0x124e   :  { %v4442_v53 = vpop.f32.mrf.mxu1  ;;  %v4493_v36 = vpop.f32.mrf.mxu0  ;;  %v4441_v10 = vadd.f32 %v4440_v45, %v4339_v20  ;;  %v4492_v62 = vadd.f32 %v4491_v6, %v4347_v23 }
0x124f   :  { %v4511_v42 = vpack.c.bf16 %v4503_v43, %v4499_v31  ;;  %v4513_v27 = vpack.c.bf16 %v4505_v4, %v4501_v13  ;;  %v4443_v49 = vadd.f32 %v4442_v53, %v4343_v21  ;;  %v4494_v57 = vadd.f32 %v4493_v36, %v4351_v30 }
0x1250   :  { %v4444_v58 = vpop.f32.mrf.mxu1  ;;  %v4495_v46 = vpop.f32.mrf.mxu0  ;;  %v4506_v44 = vmax.f32 %v4441_v10, 0.0  ;;  %v4508_v50 = vmax.f32 %v4492_v62, 0.0 }
0x1251   :  { %v4507_v3 = vmax.f32 %v4443_v49, 0.0  ;;  %v4509_v26 = vmax.f32 %v4494_v57, 0.0  ;;  %4742 = vmatprep.mubr.bf16.mxu1 %v4511_v42  ;;  %4790 = vmatprep.mubr.bf16.mxu0 %v4513_v27 }
0x1252   :  { %v4445_v52 = vpop.f32.mrf.mxu1  ;;  %v4496_v9 = vpop.f32.mrf.mxu0  ;;  %4743 = vmatmul.mubr.bf16.vlgmr.msra.gmra.mxu1 %v4510_v41  ;;  %4791 = vmatmul.mubr.bf16.vlgmr.msra.gmra.mxu0 %v4512_v60  ;;  %v4514_v59 = vpack.c.bf16 %v4506_v44, %v4506_v44  ;;  %v4516_v16 = vpack.c.bf16 %v4508_v50, %v4508_v50 }
0x1253   :  { %v4515_v54 = vpack.c.bf16 %v4507_v3, %v4507_v3  ;;  %v4517_v14 = vpack.c.bf16 %v4509_v26, %v4509_v26 }
0x1255   :  { %4750 = vmatprep.mubr.bf16.mxu1 %v4515_v54  ;;  %4798 = vmatprep.mubr.bf16.mxu0 %v4517_v14 }
0x125a   :  { %4751 = vmatmul.mubr.bf16.gmra.mxu1 %v4514_v59  ;;  %4799 = vmatmul.mubr.bf16.gmra.mxu0 %v4516_v16  ;;  %v5401_v16 = vld [vmem:[%s7995_s13 + $0x2] ss:$0 sm:$0xff]  ;;  %s6336_s13 = scalar_lea.vmem %s4886_s29, 384 }
0x125b   :  { %p6337_p0 = scmp.ne.s32.totalorder %s4886_s29, %s6336_s13  ;;  %p6342_p2 = scmp.lt.s32.totalorder %s6336_s13, %s6336_s13 }
0x125d   :  { %p6343_p3 = por %p6342_p2, %p6341_p1 }
0x125f   :  { %p6344_p4 = pnand %p6343_p3, %p6337_p0 }
0x1312   :  { %v5703_v37 = vpop.f32.mrf.mxu1  ;;  %v5731_v0 = vpop.f32.mrf.mxu0 }
0x1314   :  { %v5704_v38 = vpop.f32.mrf.mxu1  ;;  %v5732_v40 = vpop.f32.mrf.mxu0 }
0x1315   :  { %v5705_v47 = vadd.f32 %v5704_v38, %v5703_v37  ;;  %v5733_v61 = vadd.f32 %v5732_v40, %v5731_v0  ;;  %v5402_v0 = vld [vmem:[%s7996_s14 + $0x2] ss:$0 sm:$0xff] }
0x1316   :  { %v5706_v48 = vpop.f32.mrf.mxu1  ;;  %v5734_v15 = vpop.f32.mrf.mxu0 }
0x1317   :  { %v4793_v21 = vadd.f32 %v5733_v61, %v5705_v47 }
0x1318   :  { %v5707_v30 = vpop.f32.mrf.mxu1  ;;  %v5735_v20 = vpop.f32.mrf.mxu0 }
0x1319   :  { %v4806_v23 = vadd.f32 %v4793_v21, %v7939_v56  ;;  %v5708_v28 = vadd.f32 %v5707_v30, %v5706_v48  ;;  %v5736_v19 = vadd.f32 %v5735_v20, %v5734_v15 }
0x131a   :  { %v5709_v8 = vpop.f32.mrf.mxu1  ;;  %v5737_v2 = vpop.f32.mrf.mxu0 }
0x131b   :  { %v4796_v32 = vadd.f32 %v5736_v19, %v5708_v28  ;;  %v4809_v55 = vadd.f32 %v4806_v23, %v7327_v33 }
0x131c   :  { %v5710_v51 = vpop.f32.mrf.mxu1  ;;  %v5738_v17 = vpop.f32.mrf.mxu0 }
0x131d   :  { %v4807_v24 = vadd.f32 %v4796_v32, %v7942_v35  ;;  %v5711_v18 = vadd.f32 %v5710_v51, %v5709_v8  ;;  %v5739_v22 = vadd.f32 %v5738_v17, %v5737_v2  ;;  %v4819_v34 = vadd.f32 %v5400_v29, %v4809_v55 }
0x131e   :  { %v5712_v1 = vpop.f32.mrf.mxu1  ;;  %v5740_v56 = vpop.f32.mrf.mxu0 }
0x131f   :  { %v4801_v25 = vadd.f32 %v5739_v22, %v5711_v18  ;;  %v4822_v5 = vsel %vm98_vm0, %v4819_v34, 0.0  ;;  %v4810_v45 = vadd.f32 %v4807_v24, %v7329_v63 }
0x1320   :  { %v5713_v6 = vpop.f32.mrf.mxu1  ;;  %v5741_v31 = vpop.f32.mrf.mxu0  ;;  %4823 = vadd.xlane.f32.xlu0 %v4822_v5 }
0x1321   :  { %v4808_v13 = vadd.f32 %v4801_v25, %v7945_v7  ;;  %v4820_v33 = vadd.f32 %v5400_v29, %v4810_v45 }
0x1323   :  { %v4825_v43 = vsel %vm98_vm0, %v4820_v33, 0.0  ;;  %v4811_v35 = vadd.f32 %v4808_v13, %v7349_v11 }
0x1324   :  { %4826 = vadd.xlane.f32.xlu1 %v4825_v43 }
0x1325   :  { %v4821_v4 = vadd.f32 %v5400_v29, %v4811_v35 }
0x1327   :  { %v4828_v39 = vsel %vm1257_vm8, %v4821_v4, 0.0 }
0x1328   :  { %4829 = vadd.xlane.f32.xlu0 %v4828_v39 }
0x13a9   :  { %v4824_v12 = vpop.xlane.xlu0 %4823 }
0x13aa   :  { %v4831_v53 = vmul.f32 0.03125, %v4824_v12 }
0x13ac   :  { %v4834_v36 = vsub.f32 %v4819_v34, %v4831_v53 }
0x13ad   :  { %v4827_v42 = vpop.xlane.xlu1 %4826 }
0x13ae   :  { %v4832_v63 = vmul.f32 0.03125, %v4827_v42  ;;  %v4837_v27 = vmul.f32 %v4834_v36, %v4834_v36 }
0x13b0   :  { %v4835_v49 = vsub.f32 %v4820_v33, %v4832_v63  ;;  %v4840_v57 = vsel %vm98_vm0, %v4837_v27, 0.0 }
0x13b1   :  { %4841 = vadd.xlane.f32.xlu1 %v4840_v57  ;;  %v4830_v7 = vpop.xlane.xlu0 %4829 }
0x13b2   :  { %v4833_v41 = vmul.f32 0.03125, %v4830_v7  ;;  %v4838_v60 = vmul.f32 %v4835_v49, %v4835_v49 }
0x13b4   :  { %v4836_v10 = vsub.f32 %v4821_v4, %v4833_v41  ;;  %v4843_v11 = vsel %vm98_vm0, %v4838_v60, 0.0 }
0x13b5   :  { %4844 = vadd.xlane.f32.xlu0 %v4843_v11 }
0x13b6   :  { %v4839_v62 = vmul.f32 %v4836_v10, %v4836_v10 }
0x13b8   :  { %v4846_v58 = vsel %vm1257_vm8, %v4839_v62, 0.0 }
0x13b9   :  { %4847 = vadd.xlane.f32.xlu1 %v4846_v58 }
0x143a   :  { %v4842_v46 = vpop.xlane.xlu1 %4841 }
0x143b   :  { %v4849_v3 = vmul.f32 0.03125, %v4842_v46 }
0x143d   :  { %v4854_v26 = vadd.f32 1e-05, %v4849_v3 }
0x143e   :  { %v4845_v52 = vpop.xlane.xlu0 %4844 }
0x143f   :  { %6324 = vrsqrt.f32 %v4854_v26  ;;  %v4850_v9 = vmul.f32 0.03125, %v4845_v52 }
0x1441   :  { %v4855_v54 = vadd.f32 1e-05, %v4850_v9 }
0x1442   :  { %v4848_v14 = vpop.xlane.xlu1 %4847 }
0x1443   :  { %6326 = vrsqrt.f32 %v4855_v54  ;;  %v4851_v44 = vmul.f32 0.03125, %v4848_v14 }
0x1445   :  { %v4856_v50 = vadd.f32 1e-05, %v4851_v44 }
0x1447   :  { %6328 = vrsqrt.f32 %v4856_v50 }
0x144c   :  { %v6325_v59 = vpop.eup %6324 }
0x144d   :  { %v4860_v37 = vmul.f32 %v6325_v59, %v4834_v36 }
0x144f   :  { %v4867_v38 = vmul.f32 %v5401_v16, %v4860_v37 }
0x1450   :  { %v6327_v40 = vpop.eup %6326 }
0x1451   :  { %v4861_v47 = vmul.f32 %v6327_v40, %v4835_v49  ;;  %v4874_v61 = vadd.f32 %v5402_v0, %v4867_v38 }
0x1453   :  { %v4868_v48 = vmul.f32 %v5401_v16, %v4861_v47  ;;  %4877 = vst.msk [vmem:[#allocation2] sm:$0xff] %vm98_vm0, %v4874_v61 }
0x1454   :  { %v6329_v15 = vpop.eup %6328 }
0x1455   :  { %v4862_v21 = vmul.f32 %v6329_v15, %v4836_v10  ;;  %v4875_v30 = vadd.f32 %v5402_v0, %v4868_v48 }
0x1457   :  { %v4869_v20 = vmul.f32 %v5401_v16, %v4862_v21  ;;  %4878 = vst.msk [vmem:[#allocation2 + $0x8] sm:$0xff] %vm98_vm0, %v4875_v30 }
0x1459   :  { %v4876_v23 = vadd.f32 %v5402_v0, %v4869_v20 }
0x145b   :  { %4879 = vst.msk [vmem:[#allocation2 + $0x10] sm:$0xf] %vm1257_vm8, %v4876_v23 }
0x145c   :  { %6347 = shalt.err (!%p6344_p4)
}
0x145d   :  { %s6376_s14 = smov 128  }
0x145e   :  { %4891 = dma.vmem_to_hbm [thread:$0]  %s4886_s29, 384, %s8001_s19, [#allocation3], %s6376_s14, %s6376_s14, %s6371_s25  }
0x145f   :  { %6356 = dma.done.wait [#allocation3], 384  }
0x1460   :  { %6357 = vsyncadd [#allocation3], 4294966912 }
0x1461   :  { %4895 = vsyncpa [#allocation3], 1 }

</bundles_post_ra>
